<compile_context>
chip_gen: v7x
topology: tpu7x:2x2x1
jax: 0.10.0
libtpu: 0.0.40
codegen_flags: <defaults>
</compile_context>

<pallas_src>
import functools

import jax
import jax.numpy as jnp
from jax.experimental import pallas as pl
from jax.experimental.pallas import tpu as pltpu

LANE = 128


def _round_up(x, m):
    return (x + m - 1) // m * m


# ---------------------------------------------------------------------------
# Pallas kernels
# ---------------------------------------------------------------------------

def _gemm_bn_kernel(*refs, relu, has_residual):
    """Tiled (M,K)@(K,C) with f32 accumulator; epilogue = acc*scale + bias [+res] [+ReLU]."""
    if has_residual:
        x_ref, w_ref, s_ref, b_ref, r_ref, o_ref, acc_ref = refs
    else:
        x_ref, w_ref, s_ref, b_ref, o_ref, acc_ref = refs
        r_ref = None
    k = pl.program_id(2)

    @pl.when(k == 0)
    def _init():
        acc_ref[...] = jnp.zeros_like(acc_ref)

    acc_ref[...] += jnp.dot(x_ref[...], w_ref[...], preferred_element_type=jnp.float32)

    @pl.when(k == pl.num_programs(2) - 1)
    def _fin():
        out = acc_ref[...] * s_ref[...] + b_ref[...]
        if has_residual:
            out = out + r_ref[...]
        if relu:
            out = jnp.maximum(out, 0.0)
        o_ref[...] = out.astype(o_ref.dtype)


def _pool_fc_kernel(x_ref, w_ref, b_ref, o_ref):
    # x: (N, HW, C) -> mean over spatial, then (N, C) @ (C, Cout_p) + bias
    pooled = jnp.mean(x_ref[...], axis=1)
    o_ref[...] = (jnp.dot(pooled, w_ref[...], preferred_element_type=jnp.float32)
                  + b_ref[...]).astype(o_ref.dtype)


# ---------------------------------------------------------------------------
# Conv + folded BN (+ fused residual / ReLU) via im2col + tiled Pallas GEMM
# ---------------------------------------------------------------------------

def _im2col(x, k, stride, pad):
    # x: (N, H, W, C) -> (N*Ho*Wo, k*k*C), column order (kh, kw, C)
    if pad > 0:
        x = jnp.pad(x, ((0, 0), (pad, pad), (pad, pad), (0, 0)))
    N, H, W, C = x.shape
    Ho = (H - k) // stride + 1
    Wo = (W - k) // stride + 1
    patches = []
    for i in range(k):
        for j in range(k):
            patches.append(x[:, i:i + stride * Ho:stride, j:j + stride * Wo:stride, :])
    cols = jnp.stack(patches, axis=-2)                     # (N, Ho, Wo, k*k, C)
    return cols.reshape(N * Ho * Wo, k * k * C), (N, Ho, Wo)


def conv_bn(x, w, scale, bias, *, stride, pad, relu, residual=None):
    """x: (N,H,W,Cin_p) NHWC, channels possibly zero-padded to a multiple of 128.
    w: PyTorch conv weight (cout, cin_true, k, k).  Returns (N,Ho,Wo,Cout_p) f32,
    Cout_p = round_up(cout, 128), padded lanes identically zero."""
    cout, cin, k, _ = w.shape
    Cin_p = x.shape[-1]
    Cout_p = _round_up(cout, LANE)

    # im2col in bf16 (halves staging bytes; MXU operands are bf16 anyway).
    cols, (N, Ho, Wo) = _im2col(x.astype(jnp.bfloat16), k, stride, pad)
    M, K = cols.shape
    Kp = _round_up(K, LANE)

    # Tile selection (all well inside the 32 MiB default scoped VMEM, v7x included).
    tm = min(256, _round_up(M, 16))
    Mp = _round_up(M, tm)
    tn = 256 if Cout_p % 256 == 0 else 128
    tk = next(c for c in (512, 256, 128) if Kp % c == 0)

    if Mp > M or Kp > K:
        cols = jnp.pad(cols, ((0, Mp - M), (0, Kp - K)))

    # Weight matrix (k,k,Cin_p,Cout_p): zero rows for padded input channels,
    # zero columns for padded output channels; cast to bf16 for the MXU.
    wm = jnp.zeros((k, k, Cin_p, Cout_p), jnp.float32)
    wm = wm.at[:, :, :cin, :cout].set(jnp.transpose(w, (2, 3, 1, 0)))
    wm = wm.reshape(k * k * Cin_p, Cout_p)
    if Kp > K:
        wm = jnp.pad(wm, ((0, Kp - K), (0, 0)))
    wm = wm.astype(jnp.bfloat16)

    s_pad = jnp.zeros((1, Cout_p), jnp.float32).at[0, :cout].set(scale)
    b_pad = jnp.zeros((1, Cout_p), jnp.float32).at[0, :cout].set(bias)

    inputs = [cols, wm, s_pad, b_pad]
    in_specs = [
        pl.BlockSpec((tm, tk), lambda i, j, kk: (i, kk)),
        pl.BlockSpec((tk, tn), lambda i, j, kk: (kk, j)),
        pl.BlockSpec((1, tn), lambda i, j, kk: (0, j)),
        pl.BlockSpec((1, tn), lambda i, j, kk: (0, j)),
    ]

    has_residual = residual is not None
    if has_residual:
        r = residual.reshape(N * Ho * Wo, Cout_p).astype(jnp.float32)
        if Mp > M:
            r = jnp.pad(r, ((0, Mp - M), (0, 0)))
        inputs.append(r)
        in_specs.append(pl.BlockSpec((tm, tn), lambda i, j, kk: (i, j)))

    out = pl.pallas_call(
        functools.partial(_gemm_bn_kernel, relu=relu, has_residual=has_residual),
        out_shape=jax.ShapeDtypeStruct((Mp, Cout_p), jnp.float32),
        grid=(Mp // tm, Cout_p // tn, Kp // tk),
        in_specs=in_specs,
        out_specs=pl.BlockSpec((tm, tn), lambda i, j, kk: (i, j)),
        scratch_shapes=[pltpu.VMEM((tm, tn), jnp.float32)],
        compiler_params=pltpu.CompilerParams(
            dimension_semantics=("parallel", "parallel", "arbitrary")),
    )(*inputs)

    if Mp > M:
        out = out[:M]
    return out.reshape(N, Ho, Wo, Cout_p)


# ---------------------------------------------------------------------------
# Remaining ops
# ---------------------------------------------------------------------------

def maxpool_3x3_s2(x):
    # MaxPool2d(kernel_size=3, stride=2, padding=1), PyTorch (-inf padding) semantics.
    # TODO(synk): kept as a fused jnp.maximum tree in plain JAX per the perf review
    # (XLA fuses it into one pass; a Pallas version would need a 9x staged copy or halo tiling).
    N, H, W, C = x.shape
    xp = jnp.pad(x, ((0, 0), (1, 1), (1, 1), (0, 0)), constant_values=-jnp.inf)
    Ho = (H + 2 - 3) // 2 + 1
    Wo = (W + 2 - 3) // 2 + 1
    out = None
    for i in range(3):
        for j in range(3):
            v = xp[:, i:i + 2 * Ho:2, j:j + 2 * Wo:2, :]
            out = v if out is None else jnp.maximum(out, v)
    return out


def avgpool_linear(x, w, b):
    # Fused adaptive_avg_pool2d((1,1)) + flatten + Linear, fc output padded to 128 lanes.
    N, H, W, C = x.shape
    num_classes = w.shape[0]
    Cout_p = _round_up(num_classes, LANE)
    wp = jnp.zeros((C, Cout_p), jnp.float32).at[:, :num_classes].set(w.T)
    bp = jnp.zeros((1, Cout_p), jnp.float32).at[0, :num_classes].set(b)
    xr = x.reshape(N, H * W, C)
    out = pl.pallas_call(
        _pool_fc_kernel,
        out_shape=jax.ShapeDtypeStruct((N, Cout_p), jnp.float32),
        grid=(1,),
        in_specs=[pl.BlockSpec((N, H * W, C), lambda i: (0, 0, 0)),
                  pl.BlockSpec((C, Cout_p), lambda i: (0, 0)),
                  pl.BlockSpec((1, Cout_p), lambda i: (0, 0))],
        out_specs=pl.BlockSpec((N, Cout_p), lambda i: (0, 0)),
    )(xr, wp, bp)
    return out[:, :num_classes]


# ---------------------------------------------------------------------------
# ResNet forward
# ---------------------------------------------------------------------------

def basic_block(x, p, stride):
    out = conv_bn(x, p['conv1_w'], *p['bn1'], stride=stride, pad=1, relu=True)
    if 'sc_w' in p:
        sc = conv_bn(x, p['sc_w'], *p['bn_sc'], stride=stride, pad=0, relu=False)
    else:
        sc = x
    # TODO(synk): fake_relu only alters the backward pass in the reference repo; forward == relu.
    # Residual add + final ReLU are fused into the second conv's epilogue.
    return conv_bn(out, p['conv2_w'], *p['bn2'], stride=1, pad=1, relu=True, residual=sc)


def resnet_forward(x_nchw, params):
    x = jnp.transpose(x_nchw, (0, 2, 3, 1))  # NCHW -> NHWC (channels -> lanes)
    out = conv_bn(x, params['conv1_w'], *params['bn1'], stride=2, pad=3, relu=True)
    out = maxpool_3x3_s2(out)
    for name, first_stride in (('layer1', 1), ('layer2', 2), ('layer3', 2), ('layer4', 2)):
        for bi, bp in enumerate(params[name]):
            out = basic_block(out, bp, first_stride if bi == 0 else 1)
    return avgpool_linear(out, params['fc_w'], params['fc_b'])


# ---------------------------------------------------------------------------
# Deterministic parameter construction (inference-mode BN folded to scale/bias)
# ---------------------------------------------------------------------------

def _bn_fold(gamma, beta, mean, var, eps=1e-5):
    scale = gamma / jnp.sqrt(var + eps)
    return scale, beta - mean * scale


def make_params(layer_list=(1, 1, 1, 1), num_classes=10, num_channels=3, seed=0):
    keys = iter(jax.random.split(jax.random.PRNGKey(seed), 256))

    def init_conv(cout, cin, k):
        fan_in = cin * k * k
        return jax.random.normal(next(keys), (cout, cin, k, k), jnp.float32) / jnp.sqrt(fan_in)

    def init_bn(c):
        gamma = 1.0 + 0.1 * jax.random.normal(next(keys), (c,), jnp.float32)
        beta = 0.1 * jax.random.normal(next(keys), (c,), jnp.float32)
        mean = 0.1 * jax.random.normal(next(keys), (c,), jnp.float32)
        var = jnp.abs(1.0 + 0.1 * jax.random.normal(next(keys), (c,), jnp.float32))
        return _bn_fold(gamma, beta, mean, var)

    params = {
        'conv1_w': init_conv(64, num_channels, 7),
        'bn1': init_bn(64),
    }

    def make_block(cin, planes, stride):
        p = {
            'conv1_w': init_conv(planes, cin, 3),
            'bn1': init_bn(planes),
            'conv2_w': init_conv(planes, planes, 3),
            'bn2': init_bn(planes),
        }
        if stride != 1 or cin != planes:  # expansion = 1
            p['sc_w'] = init_conv(planes, cin, 1)
            p['bn_sc'] = init_bn(planes)
        return p

    in_ch = 64
    for name, planes, stride, nblocks in (('layer1', 64, 1, layer_list[0]),
                                          ('layer2', 128, 2, layer_list[1]),
                                          ('layer3', 256, 2, layer_list[2]),
                                          ('layer4', 512, 2, layer_list[3])):
        blocks = []
        for bi in range(nblocks):
            blocks.append(make_block(in_ch, planes, stride if bi == 0 else 1))
            in_ch = planes
        params[name] = blocks

    params['fc_w'] = (jax.random.normal(next(keys), (num_classes, 512), jnp.float32)
                      / jnp.sqrt(512.0))
    params['fc_b'] = 0.01 * jax.random.normal(next(keys), (num_classes,), jnp.float32)
    return params


# ---------------------------------------------------------------------------
# Demo
# ---------------------------------------------------------------------------

if __name__ == "__main__":
    params = make_params(layer_list=(1, 1, 1, 1), num_classes=10, num_channels=3, seed=0)
    x = jax.random.normal(jax.random.PRNGKey(0), (2, 3, 32, 32), jnp.float32)  # NCHW, PyTorch-style

    fwd = jax.jit(resnet_forward)
    logits = fwd(x, params)
    jax.block_until_ready(logits)

    assert logits.shape == (2, 10), logits.shape
    assert bool(jnp.all(jnp.isfinite(logits)))
    print("KERNEL_OK")
</pallas_src>

<mosaic_0001>
module attributes {stable_mosaic.version = 11 : i64} {
  func.func @_gemm_bn_kernel(%arg0: i32, %arg1: i32, %arg2: i32, %arg3: memref<256x256xbf16, #tpu.memory_space<vmem>>, %arg4: memref<256x128xbf16, #tpu.memory_space<vmem>>, %arg5: memref<1x128xf32, #tpu.memory_space<vmem>>, %arg6: memref<1x128xf32, #tpu.memory_space<vmem>>, %arg7: memref<256x128xf32, #tpu.memory_space<vmem>>, %arg8: memref<256x128xf32, #tpu.memory_space<vmem>>) attributes {dimension_semantics = [#tpu.dimension_semantics<parallel>, #tpu.dimension_semantics<parallel>, #tpu.dimension_semantics<arbitrary>], iteration_bounds = array<i64: 2, 1, 1>, scalar_prefetch = 0 : i64, scratch_operands = 1 : i64, tpu.core_type = #tpu.core_type<tc>, window_params = [{transform_indices = @transform_0, window_bounds = array<i64: 256, 256>}, {transform_indices = @transform_1, window_bounds = array<i64: 256, 128>}, {transform_indices = @transform_2, window_bounds = array<i64: 1, 128>}, {transform_indices = @transform_3, window_bounds = array<i64: 1, 128>}, {transform_indices = @transform_4, window_bounds = array<i64: 256, 128>}]} {
    %c0_i32 = arith.constant 0 : i32
    %0 = arith.cmpi eq, %arg2, %c0_i32 : i32
    %1 = arith.extui %0 : i1 to i32
    %c0_i32_0 = arith.constant 0 : i32
    %2 = arith.cmpi ne, %1, %c0_i32_0 : i32
    scf.if %2 {
      %cst_10 = arith.constant 0.000000e+00 : f32
      %12 = vector.broadcast %cst_10 : f32 to vector<256x128xf32>
      %c0_11 = arith.constant 0 : index
      %c0_12 = arith.constant 0 : index
      %13 = vector.load %arg8[%c0_11, %c0_12] : memref<256x128xf32, #tpu.memory_space<vmem>>, vector<256x128xf32>
      tpu.vector_store %arg8[%c0_11, %c0_12], %12 {strides = array<i32>} : memref<256x128xf32, #tpu.memory_space<vmem>>, vector<256x128xf32>,
    } else {
    }
    %c0 = arith.constant 0 : index
    %c0_1 = arith.constant 0 : index
    %3 = vector.load %arg8[%c0, %c0_1] : memref<256x128xf32, #tpu.memory_space<vmem>>, vector<256x128xf32>
    %c0_2 = arith.constant 0 : index
    %c0_3 = arith.constant 0 : index
    %4 = vector.load %arg3[%c0_2, %c0_3] : memref<256x256xbf16, #tpu.memory_space<vmem>>, vector<256x256xbf16>
    %c0_4 = arith.constant 0 : index
    %c0_5 = arith.constant 0 : index
    %5 = vector.load %arg4[%c0_4, %c0_5] : memref<256x128xbf16, #tpu.memory_space<vmem>>, vector<256x128xbf16>
    %cst = arith.constant dense<0.000000e+00> : vector<256x128xf32>
    %6 = tpu.matmul %4, %5, %cst {dimension_numbers = #tpu.dot_dimension_numbers<[1], [0], [0], [1], [0, 0, 1, 1], [], []>} : vector<256x256xbf16>, vector<256x128xbf16>, vector<256x128xf32> -> vector<256x128xf32>
    %7 = arith.addf %3, %6 : vector<256x128xf32>
    %c0_6 = arith.constant 0 : index
    %c0_7 = arith.constant 0 : index
    %8 = vector.load %arg8[%c0_6, %c0_7] : memref<256x128xf32, #tpu.memory_space<vmem>>, vector<256x128xf32>
    tpu.vector_store %arg8[%c0_6, %c0_7], %7 {strides = array<i32>} : memref<256x128xf32, #tpu.memory_space<vmem>>, vector<256x128xf32>,
    %c0_i32_8 = arith.constant 0 : i32
    %9 = arith.cmpi eq, %arg2, %c0_i32_8 : i32
    %10 = arith.extui %9 : i1 to i32
    %c0_i32_9 = arith.constant 0 : i32
    %11 = arith.cmpi ne, %10, %c0_i32_9 : i32
    scf.if %11 {
      %c0_10 = arith.constant 0 : index
      %c0_11 = arith.constant 0 : index
      %12 = vector.load %arg8[%c0_10, %c0_11] : memref<256x128xf32, #tpu.memory_space<vmem>>, vector<256x128xf32>
      %c0_12 = arith.constant 0 : index
      %c0_13 = arith.constant 0 : index
      %13 = vector.load %arg5[%c0_12, %c0_13] : memref<1x128xf32, #tpu.memory_space<vmem>>, vector<1x128xf32>
      %14 = vector.broadcast %13 : vector<1x128xf32> to vector<256x128xf32>
      %15 = arith.mulf %12, %14 : vector<256x128xf32>
      %c0_14 = arith.constant 0 : index
      %c0_15 = arith.constant 0 : index
      %16 = vector.load %arg6[%c0_14, %c0_15] : memref<1x128xf32, #tpu.memory_space<vmem>>, vector<1x128xf32>
      %17 = vector.broadcast %16 : vector<1x128xf32> to vector<256x128xf32>
      %18 = arith.addf %15, %17 : vector<256x128xf32>
      %cst_16 = arith.constant 0.000000e+00 : f32
      %19 = vector.broadcast %cst_16 : f32 to vector<256x128xf32>
      %20 = arith.maximumf %18, %19 : vector<256x128xf32>
      %c0_17 = arith.constant 0 : index
      %c0_18 = arith.constant 0 : index
      %21 = vector.load %arg7[%c0_17, %c0_18] : memref<256x128xf32, #tpu.memory_space<vmem>>, vector<256x128xf32>
      tpu.vector_store %arg7[%c0_17, %c0_18], %20 {strides = array<i32>} : memref<256x128xf32, #tpu.memory_space<vmem>>, vector<256x128xf32>,
    } else {
    }
    return
  }
  func.func @transform_0(%arg0: i32, %arg1: i32, %arg2: i32) -> (i32, i32) {
    %c0_i32 = arith.constant 0 : i32
    return %arg0, %arg2 : i32, i32
  }
  func.func @transform_1(%arg0: i32, %arg1: i32, %arg2: i32) -> (i32, i32) {
    %c0_i32 = arith.constant 0 : i32
    return %arg2, %arg1 : i32, i32
  }
  func.func @transform_2(%arg0: i32, %arg1: i32, %arg2: i32) -> (i32, i32) {
    %c0_i32 = arith.constant 0 : i32
    %c0_i32_0 = arith.constant 0 : i32
    return %c0_i32, %arg1 : i32, i32
  }
  func.func @transform_3(%arg0: i32, %arg1: i32, %arg2: i32) -> (i32, i32) {
    %c0_i32 = arith.constant 0 : i32
    %c0_i32_0 = arith.constant 0 : i32
    return %c0_i32, %arg1 : i32, i32
  }
  func.func @transform_4(%arg0: i32, %arg1: i32, %arg2: i32) -> (i32, i32) {
    %c0_i32 = arith.constant 0 : i32
    return %arg0, %arg1 : i32, i32
  }
}

module attributes {stable_mosaic.version = 11 : i64} {
  func.func @_gemm_bn_kernel(%arg0: i32, %arg1: i32, %arg2: i32, %arg3: memref<128x128xbf16, #tpu.memory_space<vmem>>, %arg4: memref<128x128xbf16, #tpu.memory_space<vmem>>, %arg5: memref<1x128xf32, #tpu.memory_space<vmem>>, %arg6: memref<1x128xf32, #tpu.memory_space<vmem>>, %arg7: memref<128x128xf32, #tpu.memory_space<vmem>>, %arg8: memref<128x128xf32, #tpu.memory_space<vmem>>) attributes {dimension_semantics = [#tpu.dimension_semantics<parallel>, #tpu.dimension_semantics<parallel>, #tpu.dimension_semantics<arbitrary>], iteration_bounds = array<i64: 1, 1, 9>, scalar_prefetch = 0 : i64, scratch_operands = 1 : i64, tpu.core_type = #tpu.core_type<tc>, window_params = [{transform_indices = @transform_0, window_bounds = array<i64: 128, 128>}, {transform_indices = @transform_1, window_bounds = array<i64: 128, 128>}, {transform_indices = @transform_2, window_bounds = array<i64: 1, 128>}, {transform_indices = @transform_3, window_bounds = array<i64: 1, 128>}, {transform_indices = @transform_4, window_bounds = array<i64: 128, 128>}]} {
    %c0_i32 = arith.constant 0 : i32
    %0 = arith.cmpi eq, %arg2, %c0_i32 : i32
    %1 = arith.extui %0 : i1 to i32
    %c0_i32_0 = arith.constant 0 : i32
    %2 = arith.cmpi ne, %1, %c0_i32_0 : i32
    scf.if %2 {
      %cst_9 = arith.constant 0.000000e+00 : f32
      %12 = vector.broadcast %cst_9 : f32 to vector<128x128xf32>
      %c0_10 = arith.constant 0 : index
      %c0_11 = arith.constant 0 : index
      %13 = vector.load %arg8[%c0_10, %c0_11] : memref<128x128xf32, #tpu.memory_space<vmem>>, vector<128x128xf32>
      tpu.vector_store %arg8[%c0_10, %c0_11], %12 {strides = array<i32>} : memref<128x128xf32, #tpu.memory_space<vmem>>, vector<128x128xf32>,
    } else {
    }
    %c0 = arith.constant 0 : index
    %c0_1 = arith.constant 0 : index
    %3 = vector.load %arg8[%c0, %c0_1] : memref<128x128xf32, #tpu.memory_space<vmem>>, vector<128x128xf32>
    %c0_2 = arith.constant 0 : index
    %c0_3 = arith.constant 0 : index
    %4 = vector.load %arg3[%c0_2, %c0_3] : memref<128x128xbf16, #tpu.memory_space<vmem>>, vector<128x128xbf16>
    %c0_4 = arith.constant 0 : index
    %c0_5 = arith.constant 0 : index
    %5 = vector.load %arg4[%c0_4, %c0_5] : memref<128x128xbf16, #tpu.memory_space<vmem>>, vector<128x128xbf16>
    %cst = arith.constant dense<0.000000e+00> : vector<128x128xf32>
    %6 = tpu.matmul %4, %5, %cst {dimension_numbers = #tpu.dot_dimension_numbers<[1], [0], [0], [1], [0, 0, 1, 1], [], []>} : vector<128x128xbf16>, vector<128x128xbf16>, vector<128x128xf32> -> vector<128x128xf32>
    %7 = arith.addf %3, %6 : vector<128x128xf32>
    %c0_6 = arith.constant 0 : index
    %c0_7 = arith.constant 0 : index
    %8 = vector.load %arg8[%c0_6, %c0_7] : memref<128x128xf32, #tpu.memory_space<vmem>>, vector<128x128xf32>
    tpu.vector_store %arg8[%c0_6, %c0_7], %7 {strides = array<i32>} : memref<128x128xf32, #tpu.memory_space<vmem>>, vector<128x128xf32>,
    %c8_i32 = arith.constant 8 : i32
    %9 = arith.cmpi eq, %arg2, %c8_i32 : i32
    %10 = arith.extui %9 : i1 to i32
    %c0_i32_8 = arith.constant 0 : i32
    %11 = arith.cmpi ne, %10, %c0_i32_8 : i32
    scf.if %11 {
      %c0_9 = arith.constant 0 : index
      %c0_10 = arith.constant 0 : index
      %12 = vector.load %arg8[%c0_9, %c0_10] : memref<128x128xf32, #tpu.memory_space<vmem>>, vector<128x128xf32>
      %c0_11 = arith.constant 0 : index
      %c0_12 = arith.constant 0 : index
      %13 = vector.load %arg5[%c0_11, %c0_12] : memref<1x128xf32, #tpu.memory_space<vmem>>, vector<1x128xf32>
      %14 = vector.broadcast %13 : vector<1x128xf32> to vector<128x128xf32>
      %15 = arith.mulf %12, %14 : vector<128x128xf32>
      %c0_13 = arith.constant 0 : index
      %c0_14 = arith.constant 0 : index
      %16 = vector.load %arg6[%c0_13, %c0_14] : memref<1x128xf32, #tpu.memory_space<vmem>>, vector<1x128xf32>
      %17 = vector.broadcast %16 : vector<1x128xf32> to vector<128x128xf32>
      %18 = arith.addf %15, %17 : vector<128x128xf32>
      %cst_15 = arith.constant 0.000000e+00 : f32
      %19 = vector.broadcast %cst_15 : f32 to vector<128x128xf32>
      %20 = arith.maximumf %18, %19 : vector<128x128xf32>
      %c0_16 = arith.constant 0 : index
      %c0_17 = arith.constant 0 : index
      %21 = vector.load %arg7[%c0_16, %c0_17] : memref<128x128xf32, #tpu.memory_space<vmem>>, vector<128x128xf32>
      tpu.vector_store %arg7[%c0_16, %c0_17], %20 {strides = array<i32>} : memref<128x128xf32, #tpu.memory_space<vmem>>, vector<128x128xf32>,
    } else {
    }
    return
  }
  func.func @transform_0(%arg0: i32, %arg1: i32, %arg2: i32) -> (i32, i32) {
    %c0_i32 = arith.constant 0 : i32
    return %arg0, %arg2 : i32, i32
  }
  func.func @transform_1(%arg0: i32, %arg1: i32, %arg2: i32) -> (i32, i32) {
    %c0_i32 = arith.constant 0 : i32
    return %arg2, %arg1 : i32, i32
  }
  func.func @transform_2(%arg0: i32, %arg1: i32, %arg2: i32) -> (i32, i32) {
    %c0_i32 = arith.constant 0 : i32
    %c0_i32_0 = arith.constant 0 : i32
    return %c0_i32, %arg1 : i32, i32
  }
  func.func @transform_3(%arg0: i32, %arg1: i32, %arg2: i32) -> (i32, i32) {
    %c0_i32 = arith.constant 0 : i32
    %c0_i32_0 = arith.constant 0 : i32
    return %c0_i32, %arg1 : i32, i32
  }
  func.func @transform_4(%arg0: i32, %arg1: i32, %arg2: i32) -> (i32, i32) {
    %c0_i32 = arith.constant 0 : i32
    return %arg0, %arg1 : i32, i32
  }
}

module attributes {stable_mosaic.version = 11 : i64} {
  func.func @_gemm_bn_kernel(%arg0: i32, %arg1: i32, %arg2: i32, %arg3: memref<128x128xbf16, #tpu.memory_space<vmem>>, %arg4: memref<128x128xbf16, #tpu.memory_space<vmem>>, %arg5: memref<1x128xf32, #tpu.memory_space<vmem>>, %arg6: memref<1x128xf32, #tpu.memory_space<vmem>>, %arg7: memref<128x128xf32, #tpu.memory_space<vmem>>, %arg8: memref<128x128xf32, #tpu.memory_space<vmem>>, %arg9: memref<128x128xf32, #tpu.memory_space<vmem>>) attributes {dimension_semantics = [#tpu.dimension_semantics<parallel>, #tpu.dimension_semantics<parallel>, #tpu.dimension_semantics<arbitrary>], iteration_bounds = array<i64: 1, 1, 9>, scalar_prefetch = 0 : i64, scratch_operands = 1 : i64, tpu.core_type = #tpu.core_type<tc>, window_params = [{transform_indices = @transform_0, window_bounds = array<i64: 128, 128>}, {transform_indices = @transform_1, window_bounds = array<i64: 128, 128>}, {transform_indices = @transform_2, window_bounds = array<i64: 1, 128>}, {transform_indices = @transform_3, window_bounds = array<i64: 1, 128>}, {transform_indices = @transform_4, window_bounds = array<i64: 128, 128>}, {transform_indices = @transform_5, window_bounds = array<i64: 128, 128>}]} {
    %c0_i32 = arith.constant 0 : i32
    %0 = arith.cmpi eq, %arg2, %c0_i32 : i32
    %1 = arith.extui %0 : i1 to i32
    %c0_i32_0 = arith.constant 0 : i32
    %2 = arith.cmpi ne, %1, %c0_i32_0 : i32
    scf.if %2 {
      %cst_9 = arith.constant 0.000000e+00 : f32
      %12 = vector.broadcast %cst_9 : f32 to vector<128x128xf32>
      %c0_10 = arith.constant 0 : index
      %c0_11 = arith.constant 0 : index
      %13 = vector.load %arg9[%c0_10, %c0_11] : memref<128x128xf32, #tpu.memory_space<vmem>>, vector<128x128xf32>
      tpu.vector_store %arg9[%c0_10, %c0_11], %12 {strides = array<i32>} : memref<128x128xf32, #tpu.memory_space<vmem>>, vector<128x128xf32>,
    } else {
    }
    %c0 = arith.constant 0 : index
    %c0_1 = arith.constant 0 : index
    %3 = vector.load %arg9[%c0, %c0_1] : memref<128x128xf32, #tpu.memory_space<vmem>>, vector<128x128xf32>
    %c0_2 = arith.constant 0 : index
    %c0_3 = arith.constant 0 : index
    %4 = vector.load %arg3[%c0_2, %c0_3] : memref<128x128xbf16, #tpu.memory_space<vmem>>, vector<128x128xbf16>
    %c0_4 = arith.constant 0 : index
    %c0_5 = arith.constant 0 : index
    %5 = vector.load %arg4[%c0_4, %c0_5] : memref<128x128xbf16, #tpu.memory_space<vmem>>, vector<128x128xbf16>
    %cst = arith.constant dense<0.000000e+00> : vector<128x128xf32>
    %6 = tpu.matmul %4, %5, %cst {dimension_numbers = #tpu.dot_dimension_numbers<[1], [0], [0], [1], [0, 0, 1, 1], [], []>} : vector<128x128xbf16>, vector<128x128xbf16>, vector<128x128xf32> -> vector<128x128xf32>
    %7 = arith.addf %3, %6 : vector<128x128xf32>
    %c0_6 = arith.constant 0 : index
    %c0_7 = arith.constant 0 : index
    %8 = vector.load %arg9[%c0_6, %c0_7] : memref<128x128xf32, #tpu.memory_space<vmem>>, vector<128x128xf32>
    tpu.vector_store %arg9[%c0_6, %c0_7], %7 {strides = array<i32>} : memref<128x128xf32, #tpu.memory_space<vmem>>, vector<128x128xf32>,
    %c8_i32 = arith.constant 8 : i32
    %9 = arith.cmpi eq, %arg2, %c8_i32 : i32
    %10 = arith.extui %9 : i1 to i32
    %c0_i32_8 = arith.constant 0 : i32
    %11 = arith.cmpi ne, %10, %c0_i32_8 : i32
    scf.if %11 {
      %c0_9 = arith.constant 0 : index
      %c0_10 = arith.constant 0 : index
      %12 = vector.load %arg9[%c0_9, %c0_10] : memref<128x128xf32, #tpu.memory_space<vmem>>, vector<128x128xf32>
      %c0_11 = arith.constant 0 : index
      %c0_12 = arith.constant 0 : index
      %13 = vector.load %arg5[%c0_11, %c0_12] : memref<1x128xf32, #tpu.memory_space<vmem>>, vector<1x128xf32>
      %14 = vector.broadcast %13 : vector<1x128xf32> to vector<128x128xf32>
      %15 = arith.mulf %12, %14 : vector<128x128xf32>
      %c0_13 = arith.constant 0 : index
      %c0_14 = arith.constant 0 : index
      %16 = vector.load %arg6[%c0_13, %c0_14] : memref<1x128xf32, #tpu.memory_space<vmem>>, vector<1x128xf32>
      %17 = vector.broadcast %16 : vector<1x128xf32> to vector<128x128xf32>
      %18 = arith.addf %15, %17 : vector<128x128xf32>
      %c0_15 = arith.constant 0 : index
      %c0_16 = arith.constant 0 : index
      %19 = vector.load %arg7[%c0_15, %c0_16] : memref<128x128xf32, #tpu.memory_space<vmem>>, vector<128x128xf32>
      %20 = arith.addf %18, %19 : vector<128x128xf32>
      %cst_17 = arith.constant 0.000000e+00 : f32
      %21 = vector.broadcast %cst_17 : f32 to vector<128x128xf32>
      %22 = arith.maximumf %20, %21 : vector<128x128xf32>
      %c0_18 = arith.constant 0 : index
      %c0_19 = arith.constant 0 : index
      %23 = vector.load %arg8[%c0_18, %c0_19] : memref<128x128xf32, #tpu.memory_space<vmem>>, vector<128x128xf32>
      tpu.vector_store %arg8[%c0_18, %c0_19], %22 {strides = array<i32>} : memref<128x128xf32, #tpu.memory_space<vmem>>, vector<128x128xf32>,
    } else {
    }
    return
  }
  func.func @transform_0(%arg0: i32, %arg1: i32, %arg2: i32) -> (i32, i32) {
    %c0_i32 = arith.constant 0 : i32
    return %arg0, %arg2 : i32, i32
  }
  func.func @transform_1(%arg0: i32, %arg1: i32, %arg2: i32) -> (i32, i32) {
    %c0_i32 = arith.constant 0 : i32
    return %arg2, %arg1 : i32, i32
  }
  func.func @transform_2(%arg0: i32, %arg1: i32, %arg2: i32) -> (i32, i32) {
    %c0_i32 = arith.constant 0 : i32
    %c0_i32_0 = arith.constant 0 : i32
    return %c0_i32, %arg1 : i32, i32
  }
  func.func @transform_3(%arg0: i32, %arg1: i32, %arg2: i32) -> (i32, i32) {
    %c0_i32 = arith.constant 0 : i32
    %c0_i32_0 = arith.constant 0 : i32
    return %c0_i32, %arg1 : i32, i32
  }
  func.func @transform_4(%arg0: i32, %arg1: i32, %arg2: i32) -> (i32, i32) {
    %c0_i32 = arith.constant 0 : i32
    return %arg0, %arg1 : i32, i32
  }
  func.func @transform_5(%arg0: i32, %arg1: i32, %arg2: i32) -> (i32, i32) {
    %c0_i32 = arith.constant 0 : i32
    return %arg0, %arg1 : i32, i32
  }
}

module attributes {stable_mosaic.version = 11 : i64} {
  func.func @_gemm_bn_kernel(%arg0: i32, %arg1: i32, %arg2: i32, %arg3: memref<32x128xbf16, #tpu.memory_space<vmem>>, %arg4: memref<128x128xbf16, #tpu.memory_space<vmem>>, %arg5: memref<1x128xf32, #tpu.memory_space<vmem>>, %arg6: memref<1x128xf32, #tpu.memory_space<vmem>>, %arg7: memref<32x128xf32, #tpu.memory_space<vmem>>, %arg8: memref<32x128xf32, #tpu.memory_space<vmem>>) attributes {dimension_semantics = [#tpu.dimension_semantics<parallel>, #tpu.dimension_semantics<parallel>, #tpu.dimension_semantics<arbitrary>], iteration_bounds = array<i64: 1, 1, 9>, scalar_prefetch = 0 : i64, scratch_operands = 1 : i64, tpu.core_type = #tpu.core_type<tc>, window_params = [{transform_indices = @transform_0, window_bounds = array<i64: 32, 128>}, {transform_indices = @transform_1, window_bounds = array<i64: 128, 128>}, {transform_indices = @transform_2, window_bounds = array<i64: 1, 128>}, {transform_indices = @transform_3, window_bounds = array<i64: 1, 128>}, {transform_indices = @transform_4, window_bounds = array<i64: 32, 128>}]} {
    %c0_i32 = arith.constant 0 : i32
    %0 = arith.cmpi eq, %arg2, %c0_i32 : i32
    %1 = arith.extui %0 : i1 to i32
    %c0_i32_0 = arith.constant 0 : i32
    %2 = arith.cmpi ne, %1, %c0_i32_0 : i32
    scf.if %2 {
      %cst_9 = arith.constant 0.000000e+00 : f32
      %12 = vector.broadcast %cst_9 : f32 to vector<32x128xf32>
      %c0_10 = arith.constant 0 : index
      %c0_11 = arith.constant 0 : index
      %13 = vector.load %arg8[%c0_10, %c0_11] : memref<32x128xf32, #tpu.memory_space<vmem>>, vector<32x128xf32>
      tpu.vector_store %arg8[%c0_10, %c0_11], %12 {strides = array<i32>} : memref<32x128xf32, #tpu.memory_space<vmem>>, vector<32x128xf32>,
    } else {
    }
    %c0 = arith.constant 0 : index
    %c0_1 = arith.constant 0 : index
    %3 = vector.load %arg8[%c0, %c0_1] : memref<32x128xf32, #tpu.memory_space<vmem>>, vector<32x128xf32>
    %c0_2 = arith.constant 0 : index
    %c0_3 = arith.constant 0 : index
    %4 = vector.load %arg3[%c0_2, %c0_3] : memref<32x128xbf16, #tpu.memory_space<vmem>>, vector<32x128xbf16>
    %c0_4 = arith.constant 0 : index
    %c0_5 = arith.constant 0 : index
    %5 = vector.load %arg4[%c0_4, %c0_5] : memref<128x128xbf16, #tpu.memory_space<vmem>>, vector<128x128xbf16>
    %cst = arith.constant dense<0.000000e+00> : vector<32x128xf32>
    %6 = tpu.matmul %4, %5, %cst {dimension_numbers = #tpu.dot_dimension_numbers<[1], [0], [0], [1], [0, 0, 1, 1], [], []>} : vector<32x128xbf16>, vector<128x128xbf16>, vector<32x128xf32> -> vector<32x128xf32>
    %7 = arith.addf %3, %6 : vector<32x128xf32>
    %c0_6 = arith.constant 0 : index
    %c0_7 = arith.constant 0 : index
    %8 = vector.load %arg8[%c0_6, %c0_7] : memref<32x128xf32, #tpu.memory_space<vmem>>, vector<32x128xf32>
    tpu.vector_store %arg8[%c0_6, %c0_7], %7 {strides = array<i32>} : memref<32x128xf32, #tpu.memory_space<vmem>>, vector<32x128xf32>,
    %c8_i32 = arith.constant 8 : i32
    %9 = arith.cmpi eq, %arg2, %c8_i32 : i32
    %10 = arith.extui %9 : i1 to i32
    %c0_i32_8 = arith.constant 0 : i32
    %11 = arith.cmpi ne, %10, %c0_i32_8 : i32
    scf.if %11 {
      %c0_9 = arith.constant 0 : index
      %c0_10 = arith.constant 0 : index
      %12 = vector.load %arg8[%c0_9, %c0_10] : memref<32x128xf32, #tpu.memory_space<vmem>>, vector<32x128xf32>
      %c0_11 = arith.constant 0 : index
      %c0_12 = arith.constant 0 : index
      %13 = vector.load %arg5[%c0_11, %c0_12] : memref<1x128xf32, #tpu.memory_space<vmem>>, vector<1x128xf32>
      %14 = vector.broadcast %13 : vector<1x128xf32> to vector<32x128xf32>
      %15 = arith.mulf %12, %14 : vector<32x128xf32>
      %c0_13 = arith.constant 0 : index
      %c0_14 = arith.constant 0 : index
      %16 = vector.load %arg6[%c0_13, %c0_14] : memref<1x128xf32, #tpu.memory_space<vmem>>, vector<1x128xf32>
      %17 = vector.broadcast %16 : vector<1x128xf32> to vector<32x128xf32>
      %18 = arith.addf %15, %17 : vector<32x128xf32>
      %cst_15 = arith.constant 0.000000e+00 : f32
      %19 = vector.broadcast %cst_15 : f32 to vector<32x128xf32>
      %20 = arith.maximumf %18, %19 : vector<32x128xf32>
      %c0_16 = arith.constant 0 : index
      %c0_17 = arith.constant 0 : index
      %21 = vector.load %arg7[%c0_16, %c0_17] : memref<32x128xf32, #tpu.memory_space<vmem>>, vector<32x128xf32>
      tpu.vector_store %arg7[%c0_16, %c0_17], %20 {strides = array<i32>} : memref<32x128xf32, #tpu.memory_space<vmem>>, vector<32x128xf32>,
    } else {
    }
    return
  }
  func.func @transform_0(%arg0: i32, %arg1: i32, %arg2: i32) -> (i32, i32) {
    %c0_i32 = arith.constant 0 : i32
    return %arg0, %arg2 : i32, i32
  }
  func.func @transform_1(%arg0: i32, %arg1: i32, %arg2: i32) -> (i32, i32) {
    %c0_i32 = arith.constant 0 : i32
    return %arg2, %arg1 : i32, i32
  }
  func.func @transform_2(%arg0: i32, %arg1: i32, %arg2: i32) -> (i32, i32) {
    %c0_i32 = arith.constant 0 : i32
    %c0_i32_0 = arith.constant 0 : i32
    return %c0_i32, %arg1 : i32, i32
  }
  func.func @transform_3(%arg0: i32, %arg1: i32, %arg2: i32) -> (i32, i32) {
    %c0_i32 = arith.constant 0 : i32
    %c0_i32_0 = arith.constant 0 : i32
    return %c0_i32, %arg1 : i32, i32
  }
  func.func @transform_4(%arg0: i32, %arg1: i32, %arg2: i32) -> (i32, i32) {
    %c0_i32 = arith.constant 0 : i32
    return %arg0, %arg1 : i32, i32
  }
}

module attributes {stable_mosaic.version = 11 : i64} {
  func.func @_gemm_bn_kernel(%arg0: i32, %arg1: i32, %arg2: i32, %arg3: memref<32x128xbf16, #tpu.memory_space<vmem>>, %arg4: memref<128x128xbf16, #tpu.memory_space<vmem>>, %arg5: memref<1x128xf32, #tpu.memory_space<vmem>>, %arg6: memref<1x128xf32, #tpu.memory_space<vmem>>, %arg7: memref<32x128xf32, #tpu.memory_space<vmem>>, %arg8: memref<32x128xf32, #tpu.memory_space<vmem>>) attributes {dimension_semantics = [#tpu.dimension_semantics<parallel>, #tpu.dimension_semantics<parallel>, #tpu.dimension_semantics<arbitrary>], iteration_bounds = array<i64: 1, 1, 1>, scalar_prefetch = 0 : i64, scratch_operands = 1 : i64, tpu.core_type = #tpu.core_type<tc>, window_params = [{transform_indices = @transform_0, window_bounds = array<i64: 32, 128>}, {transform_indices = @transform_1, window_bounds = array<i64: 128, 128>}, {transform_indices = @transform_2, window_bounds = array<i64: 1, 128>}, {transform_indices = @transform_3, window_bounds = array<i64: 1, 128>}, {transform_indices = @transform_4, window_bounds = array<i64: 32, 128>}]} {
    %c0_i32 = arith.constant 0 : i32
    %0 = arith.cmpi eq, %arg2, %c0_i32 : i32
    %1 = arith.extui %0 : i1 to i32
    %c0_i32_0 = arith.constant 0 : i32
    %2 = arith.cmpi ne, %1, %c0_i32_0 : i32
    scf.if %2 {
      %cst_10 = arith.constant 0.000000e+00 : f32
      %12 = vector.broadcast %cst_10 : f32 to vector<32x128xf32>
      %c0_11 = arith.constant 0 : index
      %c0_12 = arith.constant 0 : index
      %13 = vector.load %arg8[%c0_11, %c0_12] : memref<32x128xf32, #tpu.memory_space<vmem>>, vector<32x128xf32>
      tpu.vector_store %arg8[%c0_11, %c0_12], %12 {strides = array<i32>} : memref<32x128xf32, #tpu.memory_space<vmem>>, vector<32x128xf32>,
    } else {
    }
    %c0 = arith.constant 0 : index
    %c0_1 = arith.constant 0 : index
    %3 = vector.load %arg8[%c0, %c0_1] : memref<32x128xf32, #tpu.memory_space<vmem>>, vector<32x128xf32>
    %c0_2 = arith.constant 0 : index
    %c0_3 = arith.constant 0 : index
    %4 = vector.load %arg3[%c0_2, %c0_3] : memref<32x128xbf16, #tpu.memory_space<vmem>>, vector<32x128xbf16>
    %c0_4 = arith.constant 0 : index
    %c0_5 = arith.constant 0 : index
    %5 = vector.load %arg4[%c0_4, %c0_5] : memref<128x128xbf16, #tpu.memory_space<vmem>>, vector<128x128xbf16>
    %cst = arith.constant dense<0.000000e+00> : vector<32x128xf32>
    %6 = tpu.matmul %4, %5, %cst {dimension_numbers = #tpu.dot_dimension_numbers<[1], [0], [0], [1], [0, 0, 1, 1], [], []>} : vector<32x128xbf16>, vector<128x128xbf16>, vector<32x128xf32> -> vector<32x128xf32>
    %7 = arith.addf %3, %6 : vector<32x128xf32>
    %c0_6 = arith.constant 0 : index
    %c0_7 = arith.constant 0 : index
    %8 = vector.load %arg8[%c0_6, %c0_7] : memref<32x128xf32, #tpu.memory_space<vmem>>, vector<32x128xf32>
    tpu.vector_store %arg8[%c0_6, %c0_7], %7 {strides = array<i32>} : memref<32x128xf32, #tpu.memory_space<vmem>>, vector<32x128xf32>,
    %c0_i32_8 = arith.constant 0 : i32
    %9 = arith.cmpi eq, %arg2, %c0_i32_8 : i32
    %10 = arith.extui %9 : i1 to i32
    %c0_i32_9 = arith.constant 0 : i32
    %11 = arith.cmpi ne, %10, %c0_i32_9 : i32
    scf.if %11 {
      %c0_10 = arith.constant 0 : index
      %c0_11 = arith.constant 0 : index
      %12 = vector.load %arg8[%c0_10, %c0_11] : memref<32x128xf32, #tpu.memory_space<vmem>>, vector<32x128xf32>
      %c0_12 = arith.constant 0 : index
      %c0_13 = arith.constant 0 : index
      %13 = vector.load %arg5[%c0_12, %c0_13] : memref<1x128xf32, #tpu.memory_space<vmem>>, vector<1x128xf32>
      %14 = vector.broadcast %13 : vector<1x128xf32> to vector<32x128xf32>
      %15 = arith.mulf %12, %14 : vector<32x128xf32>
      %c0_14 = arith.constant 0 : index
      %c0_15 = arith.constant 0 : index
      %16 = vector.load %arg6[%c0_14, %c0_15] : memref<1x128xf32, #tpu.memory_space<vmem>>, vector<1x128xf32>
      %17 = vector.broadcast %16 : vector<1x128xf32> to vector<32x128xf32>
      %18 = arith.addf %15, %17 : vector<32x128xf32>
      %c0_16 = arith.constant 0 : index
      %c0_17 = arith.constant 0 : index
      %19 = vector.load %arg7[%c0_16, %c0_17] : memref<32x128xf32, #tpu.memory_space<vmem>>, vector<32x128xf32>
      tpu.vector_store %arg7[%c0_16, %c0_17], %18 {strides = array<i32>} : memref<32x128xf32, #tpu.memory_space<vmem>>, vector<32x128xf32>,
    } else {
    }
    return
  }
  func.func @transform_0(%arg0: i32, %arg1: i32, %arg2: i32) -> (i32, i32) {
    %c0_i32 = arith.constant 0 : i32
    return %arg0, %arg2 : i32, i32
  }
  func.func @transform_1(%arg0: i32, %arg1: i32, %arg2: i32) -> (i32, i32) {
    %c0_i32 = arith.constant 0 : i32
    return %arg2, %arg1 : i32, i32
  }
  func.func @transform_2(%arg0: i32, %arg1: i32, %arg2: i32) -> (i32, i32) {
    %c0_i32 = arith.constant 0 : i32
    %c0_i32_0 = arith.constant 0 : i32
    return %c0_i32, %arg1 : i32, i32
  }
  func.func @transform_3(%arg0: i32, %arg1: i32, %arg2: i32) -> (i32, i32) {
    %c0_i32 = arith.constant 0 : i32
    %c0_i32_0 = arith.constant 0 : i32
    return %c0_i32, %arg1 : i32, i32
  }
  func.func @transform_4(%arg0: i32, %arg1: i32, %arg2: i32) -> (i32, i32) {
    %c0_i32 = arith.constant 0 : i32
    return %arg0, %arg1 : i32, i32
  }
}

module attributes {stable_mosaic.version = 11 : i64} {
  func.func @_gemm_bn_kernel(%arg0: i32, %arg1: i32, %arg2: i32, %arg3: memref<32x128xbf16, #tpu.memory_space<vmem>>, %arg4: memref<128x128xbf16, #tpu.memory_space<vmem>>, %arg5: memref<1x128xf32, #tpu.memory_space<vmem>>, %arg6: memref<1x128xf32, #tpu.memory_space<vmem>>, %arg7: memref<32x128xf32, #tpu.memory_space<vmem>>, %arg8: memref<32x128xf32, #tpu.memory_space<vmem>>, %arg9: memref<32x128xf32, #tpu.memory_space<vmem>>) attributes {dimension_semantics = [#tpu.dimension_semantics<parallel>, #tpu.dimension_semantics<parallel>, #tpu.dimension_semantics<arbitrary>], iteration_bounds = array<i64: 1, 1, 9>, scalar_prefetch = 0 : i64, scratch_operands = 1 : i64, tpu.core_type = #tpu.core_type<tc>, window_params = [{transform_indices = @transform_0, window_bounds = array<i64: 32, 128>}, {transform_indices = @transform_1, window_bounds = array<i64: 128, 128>}, {transform_indices = @transform_2, window_bounds = array<i64: 1, 128>}, {transform_indices = @transform_3, window_bounds = array<i64: 1, 128>}, {transform_indices = @transform_4, window_bounds = array<i64: 32, 128>}, {transform_indices = @transform_5, window_bounds = array<i64: 32, 128>}]} {
    %c0_i32 = arith.constant 0 : i32
    %0 = arith.cmpi eq, %arg2, %c0_i32 : i32
    %1 = arith.extui %0 : i1 to i32
    %c0_i32_0 = arith.constant 0 : i32
    %2 = arith.cmpi ne, %1, %c0_i32_0 : i32
    scf.if %2 {
      %cst_9 = arith.constant 0.000000e+00 : f32
      %12 = vector.broadcast %cst_9 : f32 to vector<32x128xf32>
      %c0_10 = arith.constant 0 : index
      %c0_11 = arith.constant 0 : index
      %13 = vector.load %arg9[%c0_10, %c0_11] : memref<32x128xf32, #tpu.memory_space<vmem>>, vector<32x128xf32>
      tpu.vector_store %arg9[%c0_10, %c0_11], %12 {strides = array<i32>} : memref<32x128xf32, #tpu.memory_space<vmem>>, vector<32x128xf32>,
    } else {
    }
    %c0 = arith.constant 0 : index
    %c0_1 = arith.constant 0 : index
    %3 = vector.load %arg9[%c0, %c0_1] : memref<32x128xf32, #tpu.memory_space<vmem>>, vector<32x128xf32>
    %c0_2 = arith.constant 0 : index
    %c0_3 = arith.constant 0 : index
    %4 = vector.load %arg3[%c0_2, %c0_3] : memref<32x128xbf16, #tpu.memory_space<vmem>>, vector<32x128xbf16>
    %c0_4 = arith.constant 0 : index
    %c0_5 = arith.constant 0 : index
    %5 = vector.load %arg4[%c0_4, %c0_5] : memref<128x128xbf16, #tpu.memory_space<vmem>>, vector<128x128xbf16>
    %cst = arith.constant dense<0.000000e+00> : vector<32x128xf32>
    %6 = tpu.matmul %4, %5, %cst {dimension_numbers = #tpu.dot_dimension_numbers<[1], [0], [0], [1], [0, 0, 1, 1], [], []>} : vector<32x128xbf16>, vector<128x128xbf16>, vector<32x128xf32> -> vector<32x128xf32>
    %7 = arith.addf %3, %6 : vector<32x128xf32>
    %c0_6 = arith.constant 0 : index
    %c0_7 = arith.constant 0 : index
    %8 = vector.load %arg9[%c0_6, %c0_7] : memref<32x128xf32, #tpu.memory_space<vmem>>, vector<32x128xf32>
    tpu.vector_store %arg9[%c0_6, %c0_7], %7 {strides = array<i32>} : memref<32x128xf32, #tpu.memory_space<vmem>>, vector<32x128xf32>,
    %c8_i32 = arith.constant 8 : i32
    %9 = arith.cmpi eq, %arg2, %c8_i32 : i32
    %10 = arith.extui %9 : i1 to i32
    %c0_i32_8 = arith.constant 0 : i32
    %11 = arith.cmpi ne, %10, %c0_i32_8 : i32
    scf.if %11 {
      %c0_9 = arith.constant 0 : index
      %c0_10 = arith.constant 0 : index
      %12 = vector.load %arg9[%c0_9, %c0_10] : memref<32x128xf32, #tpu.memory_space<vmem>>, vector<32x128xf32>
      %c0_11 = arith.constant 0 : index
      %c0_12 = arith.constant 0 : index
      %13 = vector.load %arg5[%c0_11, %c0_12] : memref<1x128xf32, #tpu.memory_space<vmem>>, vector<1x128xf32>
      %14 = vector.broadcast %13 : vector<1x128xf32> to vector<32x128xf32>
      %15 = arith.mulf %12, %14 : vector<32x128xf32>
      %c0_13 = arith.constant 0 : index
      %c0_14 = arith.constant 0 : index
      %16 = vector.load %arg6[%c0_13, %c0_14] : memref<1x128xf32, #tpu.memory_space<vmem>>, vector<1x128xf32>
      %17 = vector.broadcast %16 : vector<1x128xf32> to vector<32x128xf32>
      %18 = arith.addf %15, %17 : vector<32x128xf32>
      %c0_15 = arith.constant 0 : index
      %c0_16 = arith.constant 0 : index
      %19 = vector.load %arg7[%c0_15, %c0_16] : memref<32x128xf32, #tpu.memory_space<vmem>>, vector<32x128xf32>
      %20 = arith.addf %18, %19 : vector<32x128xf32>
      %cst_17 = arith.constant 0.000000e+00 : f32
      %21 = vector.broadcast %cst_17 : f32 to vector<32x128xf32>
      %22 = arith.maximumf %20, %21 : vector<32x128xf32>
      %c0_18 = arith.constant 0 : index
      %c0_19 = arith.constant 0 : index
      %23 = vector.load %arg8[%c0_18, %c0_19] : memref<32x128xf32, #tpu.memory_space<vmem>>, vector<32x128xf32>
      tpu.vector_store %arg8[%c0_18, %c0_19], %22 {strides = array<i32>} : memref<32x128xf32, #tpu.memory_space<vmem>>, vector<32x128xf32>,
    } else {
    }
    return
  }
  func.func @transform_0(%arg0: i32, %arg1: i32, %arg2: i32) -> (i32, i32) {
    %c0_i32 = arith.constant 0 : i32
    return %arg0, %arg2 : i32, i32
  }
  func.func @transform_1(%arg0: i32, %arg1: i32, %arg2: i32) -> (i32, i32) {
    %c0_i32 = arith.constant 0 : i32
    return %arg2, %arg1 : i32, i32
  }
  func.func @transform_2(%arg0: i32, %arg1: i32, %arg2: i32) -> (i32, i32) {
    %c0_i32 = arith.constant 0 : i32
    %c0_i32_0 = arith.constant 0 : i32
    return %c0_i32, %arg1 : i32, i32
  }
  func.func @transform_3(%arg0: i32, %arg1: i32, %arg2: i32) -> (i32, i32) {
    %c0_i32 = arith.constant 0 : i32
    %c0_i32_0 = arith.constant 0 : i32
    return %c0_i32, %arg1 : i32, i32
  }
  func.func @transform_4(%arg0: i32, %arg1: i32, %arg2: i32) -> (i32, i32) {
    %c0_i32 = arith.constant 0 : i32
    return %arg0, %arg1 : i32, i32
  }
  func.func @transform_5(%arg0: i32, %arg1: i32, %arg2: i32) -> (i32, i32) {
    %c0_i32 = arith.constant 0 : i32
    return %arg0, %arg1 : i32, i32
  }
}

module attributes {stable_mosaic.version = 11 : i64} {
  func.func @_gemm_bn_kernel(%arg0: i32, %arg1: i32, %arg2: i32, %arg3: memref<16x128xbf16, #tpu.memory_space<vmem>>, %arg4: memref<128x256xbf16, #tpu.memory_space<vmem>>, %arg5: memref<1x256xf32, #tpu.memory_space<vmem>>, %arg6: memref<1x256xf32, #tpu.memory_space<vmem>>, %arg7: memref<16x256xf32, #tpu.memory_space<vmem>>, %arg8: memref<16x256xf32, #tpu.memory_space<vmem>>) attributes {dimension_semantics = [#tpu.dimension_semantics<parallel>, #tpu.dimension_semantics<parallel>, #tpu.dimension_semantics<arbitrary>], iteration_bounds = array<i64: 1, 1, 9>, scalar_prefetch = 0 : i64, scratch_operands = 1 : i64, tpu.core_type = #tpu.core_type<tc>, window_params = [{transform_indices = @transform_0, window_bounds = array<i64: 16, 128>}, {transform_indices = @transform_1, window_bounds = array<i64: 128, 256>}, {transform_indices = @transform_2, window_bounds = array<i64: 1, 256>}, {transform_indices = @transform_3, window_bounds = array<i64: 1, 256>}, {transform_indices = @transform_4, window_bounds = array<i64: 16, 256>}]} {
    %c0_i32 = arith.constant 0 : i32
    %0 = arith.cmpi eq, %arg2, %c0_i32 : i32
    %1 = arith.extui %0 : i1 to i32
    %c0_i32_0 = arith.constant 0 : i32
    %2 = arith.cmpi ne, %1, %c0_i32_0 : i32
    scf.if %2 {
      %cst_9 = arith.constant 0.000000e+00 : f32
      %12 = vector.broadcast %cst_9 : f32 to vector<16x256xf32>
      %c0_10 = arith.constant 0 : index
      %c0_11 = arith.constant 0 : index
      %13 = vector.load %arg8[%c0_10, %c0_11] : memref<16x256xf32, #tpu.memory_space<vmem>>, vector<16x256xf32>
      tpu.vector_store %arg8[%c0_10, %c0_11], %12 {strides = array<i32>} : memref<16x256xf32, #tpu.memory_space<vmem>>, vector<16x256xf32>,
    } else {
    }
    %c0 = arith.constant 0 : index
    %c0_1 = arith.constant 0 : index
    %3 = vector.load %arg8[%c0, %c0_1] : memref<16x256xf32, #tpu.memory_space<vmem>>, vector<16x256xf32>
    %c0_2 = arith.constant 0 : index
    %c0_3 = arith.constant 0 : index
    %4 = vector.load %arg3[%c0_2, %c0_3] : memref<16x128xbf16, #tpu.memory_space<vmem>>, vector<16x128xbf16>
    %c0_4 = arith.constant 0 : index
    %c0_5 = arith.constant 0 : index
    %5 = vector.load %arg4[%c0_4, %c0_5] : memref<128x256xbf16, #tpu.memory_space<vmem>>, vector<128x256xbf16>
    %cst = arith.constant dense<0.000000e+00> : vector<16x256xf32>
    %6 = tpu.matmul %4, %5, %cst {dimension_numbers = #tpu.dot_dimension_numbers<[1], [0], [0], [1], [0, 0, 1, 1], [], []>} : vector<16x128xbf16>, vector<128x256xbf16>, vector<16x256xf32> -> vector<16x256xf32>
    %7 = arith.addf %3, %6 : vector<16x256xf32>
    %c0_6 = arith.constant 0 : index
    %c0_7 = arith.constant 0 : index
    %8 = vector.load %arg8[%c0_6, %c0_7] : memref<16x256xf32, #tpu.memory_space<vmem>>, vector<16x256xf32>
    tpu.vector_store %arg8[%c0_6, %c0_7], %7 {strides = array<i32>} : memref<16x256xf32, #tpu.memory_space<vmem>>, vector<16x256xf32>,
    %c8_i32 = arith.constant 8 : i32
    %9 = arith.cmpi eq, %arg2, %c8_i32 : i32
    %10 = arith.extui %9 : i1 to i32
    %c0_i32_8 = arith.constant 0 : i32
    %11 = arith.cmpi ne, %10, %c0_i32_8 : i32
    scf.if %11 {
      %c0_9 = arith.constant 0 : index
      %c0_10 = arith.constant 0 : index
      %12 = vector.load %arg8[%c0_9, %c0_10] : memref<16x256xf32, #tpu.memory_space<vmem>>, vector<16x256xf32>
      %c0_11 = arith.constant 0 : index
      %c0_12 = arith.constant 0 : index
      %13 = vector.load %arg5[%c0_11, %c0_12] : memref<1x256xf32, #tpu.memory_space<vmem>>, vector<1x256xf32>
      %14 = vector.broadcast %13 : vector<1x256xf32> to vector<16x256xf32>
      %15 = arith.mulf %12, %14 : vector<16x256xf32>
      %c0_13 = arith.constant 0 : index
      %c0_14 = arith.constant 0 : index
      %16 = vector.load %arg6[%c0_13, %c0_14] : memref<1x256xf32, #tpu.memory_space<vmem>>, vector<1x256xf32>
      %17 = vector.broadcast %16 : vector<1x256xf32> to vector<16x256xf32>
      %18 = arith.addf %15, %17 : vector<16x256xf32>
      %cst_15 = arith.constant 0.000000e+00 : f32
      %19 = vector.broadcast %cst_15 : f32 to vector<16x256xf32>
      %20 = arith.maximumf %18, %19 : vector<16x256xf32>
      %c0_16 = arith.constant 0 : index
      %c0_17 = arith.constant 0 : index
      %21 = vector.load %arg7[%c0_16, %c0_17] : memref<16x256xf32, #tpu.memory_space<vmem>>, vector<16x256xf32>
      tpu.vector_store %arg7[%c0_16, %c0_17], %20 {strides = array<i32>} : memref<16x256xf32, #tpu.memory_space<vmem>>, vector<16x256xf32>,
    } else {
    }
    return
  }
  func.func @transform_0(%arg0: i32, %arg1: i32, %arg2: i32) -> (i32, i32) {
    %c0_i32 = arith.constant 0 : i32
    return %arg0, %arg2 : i32, i32
  }
  func.func @transform_1(%arg0: i32, %arg1: i32, %arg2: i32) -> (i32, i32) {
    %c0_i32 = arith.constant 0 : i32
    return %arg2, %arg1 : i32, i32
  }
  func.func @transform_2(%arg0: i32, %arg1: i32, %arg2: i32) -> (i32, i32) {
    %c0_i32 = arith.constant 0 : i32
    %c0_i32_0 = arith.constant 0 : i32
    return %c0_i32, %arg1 : i32, i32
  }
  func.func @transform_3(%arg0: i32, %arg1: i32, %arg2: i32) -> (i32, i32) {
    %c0_i32 = arith.constant 0 : i32
    %c0_i32_0 = arith.constant 0 : i32
    return %c0_i32, %arg1 : i32, i32
  }
  func.func @transform_4(%arg0: i32, %arg1: i32, %arg2: i32) -> (i32, i32) {
    %c0_i32 = arith.constant 0 : i32
    return %arg0, %arg1 : i32, i32
  }
}

module attributes {stable_mosaic.version = 11 : i64} {
  func.func @_gemm_bn_kernel(%arg0: i32, %arg1: i32, %arg2: i32, %arg3: memref<16x128xbf16, #tpu.memory_space<vmem>>, %arg4: memref<128x256xbf16, #tpu.memory_space<vmem>>, %arg5: memref<1x256xf32, #tpu.memory_space<vmem>>, %arg6: memref<1x256xf32, #tpu.memory_space<vmem>>, %arg7: memref<16x256xf32, #tpu.memory_space<vmem>>, %arg8: memref<16x256xf32, #tpu.memory_space<vmem>>) attributes {dimension_semantics = [#tpu.dimension_semantics<parallel>, #tpu.dimension_semantics<parallel>, #tpu.dimension_semantics<arbitrary>], iteration_bounds = array<i64: 1, 1, 1>, scalar_prefetch = 0 : i64, scratch_operands = 1 : i64, tpu.core_type = #tpu.core_type<tc>, window_params = [{transform_indices = @transform_0, window_bounds = array<i64: 16, 128>}, {transform_indices = @transform_1, window_bounds = array<i64: 128, 256>}, {transform_indices = @transform_2, window_bounds = array<i64: 1, 256>}, {transform_indices = @transform_3, window_bounds = array<i64: 1, 256>}, {transform_indices = @transform_4, window_bounds = array<i64: 16, 256>}]} {
    %c0_i32 = arith.constant 0 : i32
    %0 = arith.cmpi eq, %arg2, %c0_i32 : i32
    %1 = arith.extui %0 : i1 to i32
    %c0_i32_0 = arith.constant 0 : i32
    %2 = arith.cmpi ne, %1, %c0_i32_0 : i32
    scf.if %2 {
      %cst_10 = arith.constant 0.000000e+00 : f32
      %12 = vector.broadcast %cst_10 : f32 to vector<16x256xf32>
      %c0_11 = arith.constant 0 : index
      %c0_12 = arith.constant 0 : index
      %13 = vector.load %arg8[%c0_11, %c0_12] : memref<16x256xf32, #tpu.memory_space<vmem>>, vector<16x256xf32>
      tpu.vector_store %arg8[%c0_11, %c0_12], %12 {strides = array<i32>} : memref<16x256xf32, #tpu.memory_space<vmem>>, vector<16x256xf32>,
    } else {
    }
    %c0 = arith.constant 0 : index
    %c0_1 = arith.constant 0 : index
    %3 = vector.load %arg8[%c0, %c0_1] : memref<16x256xf32, #tpu.memory_space<vmem>>, vector<16x256xf32>
    %c0_2 = arith.constant 0 : index
    %c0_3 = arith.constant 0 : index
    %4 = vector.load %arg3[%c0_2, %c0_3] : memref<16x128xbf16, #tpu.memory_space<vmem>>, vector<16x128xbf16>
    %c0_4 = arith.constant 0 : index
    %c0_5 = arith.constant 0 : index
    %5 = vector.load %arg4[%c0_4, %c0_5] : memref<128x256xbf16, #tpu.memory_space<vmem>>, vector<128x256xbf16>
    %cst = arith.constant dense<0.000000e+00> : vector<16x256xf32>
    %6 = tpu.matmul %4, %5, %cst {dimension_numbers = #tpu.dot_dimension_numbers<[1], [0], [0], [1], [0, 0, 1, 1], [], []>} : vector<16x128xbf16>, vector<128x256xbf16>, vector<16x256xf32> -> vector<16x256xf32>
    %7 = arith.addf %3, %6 : vector<16x256xf32>
    %c0_6 = arith.constant 0 : index
    %c0_7 = arith.constant 0 : index
    %8 = vector.load %arg8[%c0_6, %c0_7] : memref<16x256xf32, #tpu.memory_space<vmem>>, vector<16x256xf32>
    tpu.vector_store %arg8[%c0_6, %c0_7], %7 {strides = array<i32>} : memref<16x256xf32, #tpu.memory_space<vmem>>, vector<16x256xf32>,
    %c0_i32_8 = arith.constant 0 : i32
    %9 = arith.cmpi eq, %arg2, %c0_i32_8 : i32
    %10 = arith.extui %9 : i1 to i32
    %c0_i32_9 = arith.constant 0 : i32
    %11 = arith.cmpi ne, %10, %c0_i32_9 : i32
    scf.if %11 {
      %c0_10 = arith.constant 0 : index
      %c0_11 = arith.constant 0 : index
      %12 = vector.load %arg8[%c0_10, %c0_11] : memref<16x256xf32, #tpu.memory_space<vmem>>, vector<16x256xf32>
      %c0_12 = arith.constant 0 : index
      %c0_13 = arith.constant 0 : index
      %13 = vector.load %arg5[%c0_12, %c0_13] : memref<1x256xf32, #tpu.memory_space<vmem>>, vector<1x256xf32>
      %14 = vector.broadcast %13 : vector<1x256xf32> to vector<16x256xf32>
      %15 = arith.mulf %12, %14 : vector<16x256xf32>
      %c0_14 = arith.constant 0 : index
      %c0_15 = arith.constant 0 : index
      %16 = vector.load %arg6[%c0_14, %c0_15] : memref<1x256xf32, #tpu.memory_space<vmem>>, vector<1x256xf32>
      %17 = vector.broadcast %16 : vector<1x256xf32> to vector<16x256xf32>
      %18 = arith.addf %15, %17 : vector<16x256xf32>
      %c0_16 = arith.constant 0 : index
      %c0_17 = arith.constant 0 : index
      %19 = vector.load %arg7[%c0_16, %c0_17] : memref<16x256xf32, #tpu.memory_space<vmem>>, vector<16x256xf32>
      tpu.vector_store %arg7[%c0_16, %c0_17], %18 {strides = array<i32>} : memref<16x256xf32, #tpu.memory_space<vmem>>, vector<16x256xf32>,
    } else {
    }
    return
  }
  func.func @transform_0(%arg0: i32, %arg1: i32, %arg2: i32) -> (i32, i32) {
    %c0_i32 = arith.constant 0 : i32
    return %arg0, %arg2 : i32, i32
  }
  func.func @transform_1(%arg0: i32, %arg1: i32, %arg2: i32) -> (i32, i32) {
    %c0_i32 = arith.constant 0 : i32
    return %arg2, %arg1 : i32, i32
  }
  func.func @transform_2(%arg0: i32, %arg1: i32, %arg2: i32) -> (i32, i32) {
    %c0_i32 = arith.constant 0 : i32
    %c0_i32_0 = arith.constant 0 : i32
    return %c0_i32, %arg1 : i32, i32
  }
  func.func @transform_3(%arg0: i32, %arg1: i32, %arg2: i32) -> (i32, i32) {
    %c0_i32 = arith.constant 0 : i32
    %c0_i32_0 = arith.constant 0 : i32
    return %c0_i32, %arg1 : i32, i32
  }
  func.func @transform_4(%arg0: i32, %arg1: i32, %arg2: i32) -> (i32, i32) {
    %c0_i32 = arith.constant 0 : i32
    return %arg0, %arg1 : i32, i32
  }
}

module attributes {stable_mosaic.version = 11 : i64} {
  func.func @_gemm_bn_kernel(%arg0: i32, %arg1: i32, %arg2: i32, %arg3: memref<16x256xbf16, #tpu.memory_space<vmem>>, %arg4: memref<256x256xbf16, #tpu.memory_space<vmem>>, %arg5: memref<1x256xf32, #tpu.memory_space<vmem>>, %arg6: memref<1x256xf32, #tpu.memory_space<vmem>>, %arg7: memref<16x256xf32, #tpu.memory_space<vmem>>, %arg8: memref<16x256xf32, #tpu.memory_space<vmem>>, %arg9: memref<16x256xf32, #tpu.memory_space<vmem>>) attributes {dimension_semantics = [#tpu.dimension_semantics<parallel>, #tpu.dimension_semantics<parallel>, #tpu.dimension_semantics<arbitrary>], iteration_bounds = array<i64: 1, 1, 9>, scalar_prefetch = 0 : i64, scratch_operands = 1 : i64, tpu.core_type = #tpu.core_type<tc>, window_params = [{transform_indices = @transform_0, window_bounds = array<i64: 16, 256>}, {transform_indices = @transform_1, window_bounds = array<i64: 256, 256>}, {transform_indices = @transform_2, window_bounds = array<i64: 1, 256>}, {transform_indices = @transform_3, window_bounds = array<i64: 1, 256>}, {transform_indices = @transform_4, window_bounds = array<i64: 16, 256>}, {transform_indices = @transform_5, window_bounds = array<i64: 16, 256>}]} {
    %c0_i32 = arith.constant 0 : i32
    %0 = arith.cmpi eq, %arg2, %c0_i32 : i32
    %1 = arith.extui %0 : i1 to i32
    %c0_i32_0 = arith.constant 0 : i32
    %2 = arith.cmpi ne, %1, %c0_i32_0 : i32
    scf.if %2 {
      %cst_9 = arith.constant 0.000000e+00 : f32
      %12 = vector.broadcast %cst_9 : f32 to vector<16x256xf32>
      %c0_10 = arith.constant 0 : index
      %c0_11 = arith.constant 0 : index
      %13 = vector.load %arg9[%c0_10, %c0_11] : memref<16x256xf32, #tpu.memory_space<vmem>>, vector<16x256xf32>
      tpu.vector_store %arg9[%c0_10, %c0_11], %12 {strides = array<i32>} : memref<16x256xf32, #tpu.memory_space<vmem>>, vector<16x256xf32>,
    } else {
    }
    %c0 = arith.constant 0 : index
    %c0_1 = arith.constant 0 : index
    %3 = vector.load %arg9[%c0, %c0_1] : memref<16x256xf32, #tpu.memory_space<vmem>>, vector<16x256xf32>
    %c0_2 = arith.constant 0 : index
    %c0_3 = arith.constant 0 : index
    %4 = vector.load %arg3[%c0_2, %c0_3] : memref<16x256xbf16, #tpu.memory_space<vmem>>, vector<16x256xbf16>
    %c0_4 = arith.constant 0 : index
    %c0_5 = arith.constant 0 : index
    %5 = vector.load %arg4[%c0_4, %c0_5] : memref<256x256xbf16, #tpu.memory_space<vmem>>, vector<256x256xbf16>
    %cst = arith.constant dense<0.000000e+00> : vector<16x256xf32>
    %6 = tpu.matmul %4, %5, %cst {dimension_numbers = #tpu.dot_dimension_numbers<[1], [0], [0], [1], [0, 0, 1, 1], [], []>} : vector<16x256xbf16>, vector<256x256xbf16>, vector<16x256xf32> -> vector<16x256xf32>
    %7 = arith.addf %3, %6 : vector<16x256xf32>
    %c0_6 = arith.constant 0 : index
    %c0_7 = arith.constant 0 : index
    %8 = vector.load %arg9[%c0_6, %c0_7] : memref<16x256xf32, #tpu.memory_space<vmem>>, vector<16x256xf32>
    tpu.vector_store %arg9[%c0_6, %c0_7], %7 {strides = array<i32>} : memref<16x256xf32, #tpu.memory_space<vmem>>, vector<16x256xf32>,
    %c8_i32 = arith.constant 8 : i32
    %9 = arith.cmpi eq, %arg2, %c8_i32 : i32
    %10 = arith.extui %9 : i1 to i32
    %c0_i32_8 = arith.constant 0 : i32
    %11 = arith.cmpi ne, %10, %c0_i32_8 : i32
    scf.if %11 {
      %c0_9 = arith.constant 0 : index
      %c0_10 = arith.constant 0 : index
      %12 = vector.load %arg9[%c0_9, %c0_10] : memref<16x256xf32, #tpu.memory_space<vmem>>, vector<16x256xf32>
      %c0_11 = arith.constant 0 : index
      %c0_12 = arith.constant 0 : index
      %13 = vector.load %arg5[%c0_11, %c0_12] : memref<1x256xf32, #tpu.memory_space<vmem>>, vector<1x256xf32>
      %14 = vector.broadcast %13 : vector<1x256xf32> to vector<16x256xf32>
      %15 = arith.mulf %12, %14 : vector<16x256xf32>
      %c0_13 = arith.constant 0 : index
      %c0_14 = arith.constant 0 : index
      %16 = vector.load %arg6[%c0_13, %c0_14] : memref<1x256xf32, #tpu.memory_space<vmem>>, vector<1x256xf32>
      %17 = vector.broadcast %16 : vector<1x256xf32> to vector<16x256xf32>
      %18 = arith.addf %15, %17 : vector<16x256xf32>
      %c0_15 = arith.constant 0 : index
      %c0_16 = arith.constant 0 : index
      %19 = vector.load %arg7[%c0_15, %c0_16] : memref<16x256xf32, #tpu.memory_space<vmem>>, vector<16x256xf32>
      %20 = arith.addf %18, %19 : vector<16x256xf32>
      %cst_17 = arith.constant 0.000000e+00 : f32
      %21 = vector.broadcast %cst_17 : f32 to vector<16x256xf32>
      %22 = arith.maximumf %20, %21 : vector<16x256xf32>
      %c0_18 = arith.constant 0 : index
      %c0_19 = arith.constant 0 : index
      %23 = vector.load %arg8[%c0_18, %c0_19] : memref<16x256xf32, #tpu.memory_space<vmem>>, vector<16x256xf32>
      tpu.vector_store %arg8[%c0_18, %c0_19], %22 {strides = array<i32>} : memref<16x256xf32, #tpu.memory_space<vmem>>, vector<16x256xf32>,
    } else {
    }
    return
  }
  func.func @transform_0(%arg0: i32, %arg1: i32, %arg2: i32) -> (i32, i32) {
    %c0_i32 = arith.constant 0 : i32
    return %arg0, %arg2 : i32, i32
  }
  func.func @transform_1(%arg0: i32, %arg1: i32, %arg2: i32) -> (i32, i32) {
    %c0_i32 = arith.constant 0 : i32
    return %arg2, %arg1 : i32, i32
  }
  func.func @transform_2(%arg0: i32, %arg1: i32, %arg2: i32) -> (i32, i32) {
    %c0_i32 = arith.constant 0 : i32
    %c0_i32_0 = arith.constant 0 : i32
    return %c0_i32, %arg1 : i32, i32
  }
  func.func @transform_3(%arg0: i32, %arg1: i32, %arg2: i32) -> (i32, i32) {
    %c0_i32 = arith.constant 0 : i32
    %c0_i32_0 = arith.constant 0 : i32
    return %c0_i32, %arg1 : i32, i32
  }
  func.func @transform_4(%arg0: i32, %arg1: i32, %arg2: i32) -> (i32, i32) {
    %c0_i32 = arith.constant 0 : i32
    return %arg0, %arg1 : i32, i32
  }
  func.func @transform_5(%arg0: i32, %arg1: i32, %arg2: i32) -> (i32, i32) {
    %c0_i32 = arith.constant 0 : i32
    return %arg0, %arg1 : i32, i32
  }
}

module attributes {stable_mosaic.version = 11 : i64} {
  func.func @_gemm_bn_kernel(%arg0: i32, %arg1: i32, %arg2: i32, %arg3: memref<16x256xbf16, #tpu.memory_space<vmem>>, %arg4: memref<256x256xbf16, #tpu.memory_space<vmem>>, %arg5: memref<1x256xf32, #tpu.memory_space<vmem>>, %arg6: memref<1x256xf32, #tpu.memory_space<vmem>>, %arg7: memref<16x256xf32, #tpu.memory_space<vmem>>, %arg8: memref<16x256xf32, #tpu.memory_space<vmem>>) attributes {dimension_semantics = [#tpu.dimension_semantics<parallel>, #tpu.dimension_semantics<parallel>, #tpu.dimension_semantics<arbitrary>], iteration_bounds = array<i64: 1, 2, 9>, scalar_prefetch = 0 : i64, scratch_operands = 1 : i64, tpu.core_type = #tpu.core_type<tc>, window_params = [{transform_indices = @transform_0, window_bounds = array<i64: 16, 256>}, {transform_indices = @transform_1, window_bounds = array<i64: 256, 256>}, {transform_indices = @transform_2, window_bounds = array<i64: 1, 256>}, {transform_indices = @transform_3, window_bounds = array<i64: 1, 256>}, {transform_indices = @transform_4, window_bounds = array<i64: 16, 256>}]} {
    %c0_i32 = arith.constant 0 : i32
    %0 = arith.cmpi eq, %arg2, %c0_i32 : i32
    %1 = arith.extui %0 : i1 to i32
    %c0_i32_0 = arith.constant 0 : i32
    %2 = arith.cmpi ne, %1, %c0_i32_0 : i32
    scf.if %2 {
      %cst_9 = arith.constant 0.000000e+00 : f32
      %12 = vector.broadcast %cst_9 : f32 to vector<16x256xf32>
      %c0_10 = arith.constant 0 : index
      %c0_11 = arith.constant 0 : index
      %13 = vector.load %arg8[%c0_10, %c0_11] : memref<16x256xf32, #tpu.memory_space<vmem>>, vector<16x256xf32>
      tpu.vector_store %arg8[%c0_10, %c0_11], %12 {strides = array<i32>} : memref<16x256xf32, #tpu.memory_space<vmem>>, vector<16x256xf32>,
    } else {
    }
    %c0 = arith.constant 0 : index
    %c0_1 = arith.constant 0 : index
    %3 = vector.load %arg8[%c0, %c0_1] : memref<16x256xf32, #tpu.memory_space<vmem>>, vector<16x256xf32>
    %c0_2 = arith.constant 0 : index
    %c0_3 = arith.constant 0 : index
    %4 = vector.load %arg3[%c0_2, %c0_3] : memref<16x256xbf16, #tpu.memory_space<vmem>>, vector<16x256xbf16>
    %c0_4 = arith.constant 0 : index
    %c0_5 = arith.constant 0 : index
    %5 = vector.load %arg4[%c0_4, %c0_5] : memref<256x256xbf16, #tpu.memory_space<vmem>>, vector<256x256xbf16>
    %cst = arith.constant dense<0.000000e+00> : vector<16x256xf32>
    %6 = tpu.matmul %4, %5, %cst {dimension_numbers = #tpu.dot_dimension_numbers<[1], [0], [0], [1], [0, 0, 1, 1], [], []>} : vector<16x256xbf16>, vector<256x256xbf16>, vector<16x256xf32> -> vector<16x256xf32>
    %7 = arith.addf %3, %6 : vector<16x256xf32>
    %c0_6 = arith.constant 0 : index
    %c0_7 = arith.constant 0 : index
    %8 = vector.load %arg8[%c0_6, %c0_7] : memref<16x256xf32, #tpu.memory_space<vmem>>, vector<16x256xf32>
    tpu.vector_store %arg8[%c0_6, %c0_7], %7 {strides = array<i32>} : memref<16x256xf32, #tpu.memory_space<vmem>>, vector<16x256xf32>,
    %c8_i32 = arith.constant 8 : i32
    %9 = arith.cmpi eq, %arg2, %c8_i32 : i32
    %10 = arith.extui %9 : i1 to i32
    %c0_i32_8 = arith.constant 0 : i32
    %11 = arith.cmpi ne, %10, %c0_i32_8 : i32
    scf.if %11 {
      %c0_9 = arith.constant 0 : index
      %c0_10 = arith.constant 0 : index
      %12 = vector.load %arg8[%c0_9, %c0_10] : memref<16x256xf32, #tpu.memory_space<vmem>>, vector<16x256xf32>
      %c0_11 = arith.constant 0 : index
      %c0_12 = arith.constant 0 : index
      %13 = vector.load %arg5[%c0_11, %c0_12] : memref<1x256xf32, #tpu.memory_space<vmem>>, vector<1x256xf32>
      %14 = vector.broadcast %13 : vector<1x256xf32> to vector<16x256xf32>
      %15 = arith.mulf %12, %14 : vector<16x256xf32>
      %c0_13 = arith.constant 0 : index
      %c0_14 = arith.constant 0 : index
      %16 = vector.load %arg6[%c0_13, %c0_14] : memref<1x256xf32, #tpu.memory_space<vmem>>, vector<1x256xf32>
      %17 = vector.broadcast %16 : vector<1x256xf32> to vector<16x256xf32>
      %18 = arith.addf %15, %17 : vector<16x256xf32>
      %cst_15 = arith.constant 0.000000e+00 : f32
      %19 = vector.broadcast %cst_15 : f32 to vector<16x256xf32>
      %20 = arith.maximumf %18, %19 : vector<16x256xf32>
      %c0_16 = arith.constant 0 : index
      %c0_17 = arith.constant 0 : index
      %21 = vector.load %arg7[%c0_16, %c0_17] : memref<16x256xf32, #tpu.memory_space<vmem>>, vector<16x256xf32>
      tpu.vector_store %arg7[%c0_16, %c0_17], %20 {strides = array<i32>} : memref<16x256xf32, #tpu.memory_space<vmem>>, vector<16x256xf32>,
    } else {
    }
    return
  }
  func.func @transform_0(%arg0: i32, %arg1: i32, %arg2: i32) -> (i32, i32) {
    %c0_i32 = arith.constant 0 : i32
    return %arg0, %arg2 : i32, i32
  }
  func.func @transform_1(%arg0: i32, %arg1: i32, %arg2: i32) -> (i32, i32) {
    %c0_i32 = arith.constant 0 : i32
    return %arg2, %arg1 : i32, i32
  }
  func.func @transform_2(%arg0: i32, %arg1: i32, %arg2: i32) -> (i32, i32) {
    %c0_i32 = arith.constant 0 : i32
    %c0_i32_0 = arith.constant 0 : i32
    return %c0_i32, %arg1 : i32, i32
  }
  func.func @transform_3(%arg0: i32, %arg1: i32, %arg2: i32) -> (i32, i32) {
    %c0_i32 = arith.constant 0 : i32
    %c0_i32_0 = arith.constant 0 : i32
    return %c0_i32, %arg1 : i32, i32
  }
  func.func @transform_4(%arg0: i32, %arg1: i32, %arg2: i32) -> (i32, i32) {
    %c0_i32 = arith.constant 0 : i32
    return %arg0, %arg1 : i32, i32
  }
}

module attributes {stable_mosaic.version = 11 : i64} {
  func.func @_gemm_bn_kernel(%arg0: i32, %arg1: i32, %arg2: i32, %arg3: memref<16x256xbf16, #tpu.memory_space<vmem>>, %arg4: memref<256x256xbf16, #tpu.memory_space<vmem>>, %arg5: memref<1x256xf32, #tpu.memory_space<vmem>>, %arg6: memref<1x256xf32, #tpu.memory_space<vmem>>, %arg7: memref<16x256xf32, #tpu.memory_space<vmem>>, %arg8: memref<16x256xf32, #tpu.memory_space<vmem>>) attributes {dimension_semantics = [#tpu.dimension_semantics<parallel>, #tpu.dimension_semantics<parallel>, #tpu.dimension_semantics<arbitrary>], iteration_bounds = array<i64: 1, 2, 1>, scalar_prefetch = 0 : i64, scratch_operands = 1 : i64, tpu.core_type = #tpu.core_type<tc>, window_params = [{transform_indices = @transform_0, window_bounds = array<i64: 16, 256>}, {transform_indices = @transform_1, window_bounds = array<i64: 256, 256>}, {transform_indices = @transform_2, window_bounds = array<i64: 1, 256>}, {transform_indices = @transform_3, window_bounds = array<i64: 1, 256>}, {transform_indices = @transform_4, window_bounds = array<i64: 16, 256>}]} {
    %c0_i32 = arith.constant 0 : i32
    %0 = arith.cmpi eq, %arg2, %c0_i32 : i32
    %1 = arith.extui %0 : i1 to i32
    %c0_i32_0 = arith.constant 0 : i32
    %2 = arith.cmpi ne, %1, %c0_i32_0 : i32
    scf.if %2 {
      %cst_10 = arith.constant 0.000000e+00 : f32
      %12 = vector.broadcast %cst_10 : f32 to vector<16x256xf32>
      %c0_11 = arith.constant 0 : index
      %c0_12 = arith.constant 0 : index
      %13 = vector.load %arg8[%c0_11, %c0_12] : memref<16x256xf32, #tpu.memory_space<vmem>>, vector<16x256xf32>
      tpu.vector_store %arg8[%c0_11, %c0_12], %12 {strides = array<i32>} : memref<16x256xf32, #tpu.memory_space<vmem>>, vector<16x256xf32>,
    } else {
    }
    %c0 = arith.constant 0 : index
    %c0_1 = arith.constant 0 : index
    %3 = vector.load %arg8[%c0, %c0_1] : memref<16x256xf32, #tpu.memory_space<vmem>>, vector<16x256xf32>
    %c0_2 = arith.constant 0 : index
    %c0_3 = arith.constant 0 : index
    %4 = vector.load %arg3[%c0_2, %c0_3] : memref<16x256xbf16, #tpu.memory_space<vmem>>, vector<16x256xbf16>
    %c0_4 = arith.constant 0 : index
    %c0_5 = arith.constant 0 : index
    %5 = vector.load %arg4[%c0_4, %c0_5] : memref<256x256xbf16, #tpu.memory_space<vmem>>, vector<256x256xbf16>
    %cst = arith.constant dense<0.000000e+00> : vector<16x256xf32>
    %6 = tpu.matmul %4, %5, %cst {dimension_numbers = #tpu.dot_dimension_numbers<[1], [0], [0], [1], [0, 0, 1, 1], [], []>} : vector<16x256xbf16>, vector<256x256xbf16>, vector<16x256xf32> -> vector<16x256xf32>
    %7 = arith.addf %3, %6 : vector<16x256xf32>
    %c0_6 = arith.constant 0 : index
    %c0_7 = arith.constant 0 : index
    %8 = vector.load %arg8[%c0_6, %c0_7] : memref<16x256xf32, #tpu.memory_space<vmem>>, vector<16x256xf32>
    tpu.vector_store %arg8[%c0_6, %c0_7], %7 {strides = array<i32>} : memref<16x256xf32, #tpu.memory_space<vmem>>, vector<16x256xf32>,
    %c0_i32_8 = arith.constant 0 : i32
    %9 = arith.cmpi eq, %arg2, %c0_i32_8 : i32
    %10 = arith.extui %9 : i1 to i32
    %c0_i32_9 = arith.constant 0 : i32
    %11 = arith.cmpi ne, %10, %c0_i32_9 : i32
    scf.if %11 {
      %c0_10 = arith.constant 0 : index
      %c0_11 = arith.constant 0 : index
      %12 = vector.load %arg8[%c0_10, %c0_11] : memref<16x256xf32, #tpu.memory_space<vmem>>, vector<16x256xf32>
      %c0_12 = arith.constant 0 : index
      %c0_13 = arith.constant 0 : index
      %13 = vector.load %arg5[%c0_12, %c0_13] : memref<1x256xf32, #tpu.memory_space<vmem>>, vector<1x256xf32>
      %14 = vector.broadcast %13 : vector<1x256xf32> to vector<16x256xf32>
      %15 = arith.mulf %12, %14 : vector<16x256xf32>
      %c0_14 = arith.constant 0 : index
      %c0_15 = arith.constant 0 : index
      %16 = vector.load %arg6[%c0_14, %c0_15] : memref<1x256xf32, #tpu.memory_space<vmem>>, vector<1x256xf32>
      %17 = vector.broadcast %16 : vector<1x256xf32> to vector<16x256xf32>
      %18 = arith.addf %15, %17 : vector<16x256xf32>
      %c0_16 = arith.constant 0 : index
      %c0_17 = arith.constant 0 : index
      %19 = vector.load %arg7[%c0_16, %c0_17] : memref<16x256xf32, #tpu.memory_space<vmem>>, vector<16x256xf32>
      tpu.vector_store %arg7[%c0_16, %c0_17], %18 {strides = array<i32>} : memref<16x256xf32, #tpu.memory_space<vmem>>, vector<16x256xf32>,
    } else {
    }
    return
  }
  func.func @transform_0(%arg0: i32, %arg1: i32, %arg2: i32) -> (i32, i32) {
    %c0_i32 = arith.constant 0 : i32
    return %arg0, %arg2 : i32, i32
  }
  func.func @transform_1(%arg0: i32, %arg1: i32, %arg2: i32) -> (i32, i32) {
    %c0_i32 = arith.constant 0 : i32
    return %arg2, %arg1 : i32, i32
  }
  func.func @transform_2(%arg0: i32, %arg1: i32, %arg2: i32) -> (i32, i32) {
    %c0_i32 = arith.constant 0 : i32
    %c0_i32_0 = arith.constant 0 : i32
    return %c0_i32, %arg1 : i32, i32
  }
  func.func @transform_3(%arg0: i32, %arg1: i32, %arg2: i32) -> (i32, i32) {
    %c0_i32 = arith.constant 0 : i32
    %c0_i32_0 = arith.constant 0 : i32
    return %c0_i32, %arg1 : i32, i32
  }
  func.func @transform_4(%arg0: i32, %arg1: i32, %arg2: i32) -> (i32, i32) {
    %c0_i32 = arith.constant 0 : i32
    return %arg0, %arg1 : i32, i32
  }
}

module attributes {stable_mosaic.version = 11 : i64} {
  func.func @_gemm_bn_kernel(%arg0: i32, %arg1: i32, %arg2: i32, %arg3: memref<16x512xbf16, #tpu.memory_space<vmem>>, %arg4: memref<512x256xbf16, #tpu.memory_space<vmem>>, %arg5: memref<1x256xf32, #tpu.memory_space<vmem>>, %arg6: memref<1x256xf32, #tpu.memory_space<vmem>>, %arg7: memref<16x256xf32, #tpu.memory_space<vmem>>, %arg8: memref<16x256xf32, #tpu.memory_space<vmem>>, %arg9: memref<16x256xf32, #tpu.memory_space<vmem>>) attributes {dimension_semantics = [#tpu.dimension_semantics<parallel>, #tpu.dimension_semantics<parallel>, #tpu.dimension_semantics<arbitrary>], iteration_bounds = array<i64: 1, 2, 9>, scalar_prefetch = 0 : i64, scratch_operands = 1 : i64, tpu.core_type = #tpu.core_type<tc>, window_params = [{transform_indices = @transform_0, window_bounds = array<i64: 16, 512>}, {transform_indices = @transform_1, window_bounds = array<i64: 512, 256>}, {transform_indices = @transform_2, window_bounds = array<i64: 1, 256>}, {transform_indices = @transform_3, window_bounds = array<i64: 1, 256>}, {transform_indices = @transform_4, window_bounds = array<i64: 16, 256>}, {transform_indices = @transform_5, window_bounds = array<i64: 16, 256>}]} {
    %c0_i32 = arith.constant 0 : i32
    %0 = arith.cmpi eq, %arg2, %c0_i32 : i32
    %1 = arith.extui %0 : i1 to i32
    %c0_i32_0 = arith.constant 0 : i32
    %2 = arith.cmpi ne, %1, %c0_i32_0 : i32
    scf.if %2 {
      %cst_9 = arith.constant 0.000000e+00 : f32
      %12 = vector.broadcast %cst_9 : f32 to vector<16x256xf32>
      %c0_10 = arith.constant 0 : index
      %c0_11 = arith.constant 0 : index
      %13 = vector.load %arg9[%c0_10, %c0_11] : memref<16x256xf32, #tpu.memory_space<vmem>>, vector<16x256xf32>
      tpu.vector_store %arg9[%c0_10, %c0_11], %12 {strides = array<i32>} : memref<16x256xf32, #tpu.memory_space<vmem>>, vector<16x256xf32>,
    } else {
    }
    %c0 = arith.constant 0 : index
    %c0_1 = arith.constant 0 : index
    %3 = vector.load %arg9[%c0, %c0_1] : memref<16x256xf32, #tpu.memory_space<vmem>>, vector<16x256xf32>
    %c0_2 = arith.constant 0 : index
    %c0_3 = arith.constant 0 : index
    %4 = vector.load %arg3[%c0_2, %c0_3] : memref<16x512xbf16, #tpu.memory_space<vmem>>, vector<16x512xbf16>
    %c0_4 = arith.constant 0 : index
    %c0_5 = arith.constant 0 : index
    %5 = vector.load %arg4[%c0_4, %c0_5] : memref<512x256xbf16, #tpu.memory_space<vmem>>, vector<512x256xbf16>
    %cst = arith.constant dense<0.000000e+00> : vector<16x256xf32>
    %6 = tpu.matmul %4, %5, %cst {dimension_numbers = #tpu.dot_dimension_numbers<[1], [0], [0], [1], [0, 0, 1, 1], [], []>} : vector<16x512xbf16>, vector<512x256xbf16>, vector<16x256xf32> -> vector<16x256xf32>
    %7 = arith.addf %3, %6 : vector<16x256xf32>
    %c0_6 = arith.constant 0 : index
    %c0_7 = arith.constant 0 : index
    %8 = vector.load %arg9[%c0_6, %c0_7] : memref<16x256xf32, #tpu.memory_space<vmem>>, vector<16x256xf32>
    tpu.vector_store %arg9[%c0_6, %c0_7], %7 {strides = array<i32>} : memref<16x256xf32, #tpu.memory_space<vmem>>, vector<16x256xf32>,
    %c8_i32 = arith.constant 8 : i32
    %9 = arith.cmpi eq, %arg2, %c8_i32 : i32
    %10 = arith.extui %9 : i1 to i32
    %c0_i32_8 = arith.constant 0 : i32
    %11 = arith.cmpi ne, %10, %c0_i32_8 : i32
    scf.if %11 {
      %c0_9 = arith.constant 0 : index
      %c0_10 = arith.constant 0 : index
      %12 = vector.load %arg9[%c0_9, %c0_10] : memref<16x256xf32, #tpu.memory_space<vmem>>, vector<16x256xf32>
      %c0_11 = arith.constant 0 : index
      %c0_12 = arith.constant 0 : index
      %13 = vector.load %arg5[%c0_11, %c0_12] : memref<1x256xf32, #tpu.memory_space<vmem>>, vector<1x256xf32>
      %14 = vector.broadcast %13 : vector<1x256xf32> to vector<16x256xf32>
      %15 = arith.mulf %12, %14 : vector<16x256xf32>
      %c0_13 = arith.constant 0 : index
      %c0_14 = arith.constant 0 : index
      %16 = vector.load %arg6[%c0_13, %c0_14] : memref<1x256xf32, #tpu.memory_space<vmem>>, vector<1x256xf32>
      %17 = vector.broadcast %16 : vector<1x256xf32> to vector<16x256xf32>
      %18 = arith.addf %15, %17 : vector<16x256xf32>
      %c0_15 = arith.constant 0 : index
      %c0_16 = arith.constant 0 : index
      %19 = vector.load %arg7[%c0_15, %c0_16] : memref<16x256xf32, #tpu.memory_space<vmem>>, vector<16x256xf32>
      %20 = arith.addf %18, %19 : vector<16x256xf32>
      %cst_17 = arith.constant 0.000000e+00 : f32
      %21 = vector.broadcast %cst_17 : f32 to vector<16x256xf32>
      %22 = arith.maximumf %20, %21 : vector<16x256xf32>
      %c0_18 = arith.constant 0 : index
      %c0_19 = arith.constant 0 : index
      %23 = vector.load %arg8[%c0_18, %c0_19] : memref<16x256xf32, #tpu.memory_space<vmem>>, vector<16x256xf32>
      tpu.vector_store %arg8[%c0_18, %c0_19], %22 {strides = array<i32>} : memref<16x256xf32, #tpu.memory_space<vmem>>, vector<16x256xf32>,
    } else {
    }
    return
  }
  func.func @transform_0(%arg0: i32, %arg1: i32, %arg2: i32) -> (i32, i32) {
    %c0_i32 = arith.constant 0 : i32
    return %arg0, %arg2 : i32, i32
  }
  func.func @transform_1(%arg0: i32, %arg1: i32, %arg2: i32) -> (i32, i32) {
    %c0_i32 = arith.constant 0 : i32
    return %arg2, %arg1 : i32, i32
  }
  func.func @transform_2(%arg0: i32, %arg1: i32, %arg2: i32) -> (i32, i32) {
    %c0_i32 = arith.constant 0 : i32
    %c0_i32_0 = arith.constant 0 : i32
    return %c0_i32, %arg1 : i32, i32
  }
  func.func @transform_3(%arg0: i32, %arg1: i32, %arg2: i32) -> (i32, i32) {
    %c0_i32 = arith.constant 0 : i32
    %c0_i32_0 = arith.constant 0 : i32
    return %c0_i32, %arg1 : i32, i32
  }
  func.func @transform_4(%arg0: i32, %arg1: i32, %arg2: i32) -> (i32, i32) {
    %c0_i32 = arith.constant 0 : i32
    return %arg0, %arg1 : i32, i32
  }
  func.func @transform_5(%arg0: i32, %arg1: i32, %arg2: i32) -> (i32, i32) {
    %c0_i32 = arith.constant 0 : i32
    return %arg0, %arg1 : i32, i32
  }
}

module attributes {stable_mosaic.version = 11 : i64} {
  func.func @_pool_fc_kernel(%arg0: i32, %arg1: memref<2x1x512xf32, #tpu.memory_space<vmem>>, %arg2: memref<512x128xf32, #tpu.memory_space<vmem>>, %arg3: memref<1x128xf32, #tpu.memory_space<vmem>>, %arg4: memref<2x128xf32, #tpu.memory_space<vmem>>) attributes {dimension_semantics = [#tpu.dimension_semantics<arbitrary>], iteration_bounds = array<i64: 1>, scalar_prefetch = 0 : i64, scratch_operands = 0 : i64, tpu.core_type = #tpu.core_type<tc>, window_params = [{pipeline_mode = #tpu.pipeline_mode<synchronous>, transform_indices = @transform_0, window_bounds = array<i64: 2, 1, 512>}, {pipeline_mode = #tpu.pipeline_mode<synchronous>, transform_indices = @transform_1, window_bounds = array<i64: 512, 128>}, {pipeline_mode = #tpu.pipeline_mode<synchronous>, transform_indices = @transform_2, window_bounds = array<i64: 1, 128>}, {pipeline_mode = #tpu.pipeline_mode<synchronous>, transform_indices = @transform_3, window_bounds = array<i64: 2, 128>}]} {
    %c0 = arith.constant 0 : index
    %c0_0 = arith.constant 0 : index
    %c0_1 = arith.constant 0 : index
    %0 = vector.load %arg1[%c0, %c0_0, %c0_1] : memref<2x1x512xf32, #tpu.memory_space<vmem>>, vector<2x1x512xf32>
    %cst = arith.constant dense<0.000000e+00> : vector<2x512xf32>
    %1 = vector.multi_reduction <add>, %0, %cst [1] : vector<2x1x512xf32> to vector<2x512xf32>
    %cst_2 = arith.constant 1.000000e+00 : f32
    %2 = vector.broadcast %cst_2 : f32 to vector<2x512xf32>
    %3 = arith.divf %1, %2 : vector<2x512xf32>
    %c0_3 = arith.constant 0 : index
    %c0_4 = arith.constant 0 : index
    %4 = vector.load %arg2[%c0_3, %c0_4] : memref<512x128xf32, #tpu.memory_space<vmem>>, vector<512x128xf32>
    %cst_5 = arith.constant dense<0.000000e+00> : vector<2x128xf32>
    %5 = tpu.matmul %3, %4, %cst_5 {dimension_numbers = #tpu.dot_dimension_numbers<[1], [0], [0], [1], [0, 0, 1, 1], [], []>} : vector<2x512xf32>, vector<512x128xf32>, vector<2x128xf32> -> vector<2x128xf32>
    %c0_6 = arith.constant 0 : index
    %c0_7 = arith.constant 0 : index
    %6 = vector.load %arg3[%c0_6, %c0_7] : memref<1x128xf32, #tpu.memory_space<vmem>>, vector<1x128xf32>
    %7 = vector.broadcast %6 : vector<1x128xf32> to vector<2x128xf32>
    %8 = arith.addf %5, %7 : vector<2x128xf32>
    %c0_8 = arith.constant 0 : index
    %c0_9 = arith.constant 0 : index
    %9 = vector.load %arg4[%c0_8, %c0_9] : memref<2x128xf32, #tpu.memory_space<vmem>>, vector<2x128xf32>
    tpu.vector_store %arg4[%c0_8, %c0_9], %8 {strides = array<i32>} : memref<2x128xf32, #tpu.memory_space<vmem>>, vector<2x128xf32>,
    return
  }
  func.func @transform_0(%arg0: i32) -> (i32, i32, i32) {
    %c0_i32 = arith.constant 0 : i32
    %c0_i32_0 = arith.constant 0 : i32
    %c0_i32_1 = arith.constant 0 : i32
    %c0_i32_2 = arith.constant 0 : i32
    return %c0_i32, %c0_i32_0, %c0_i32_1 : i32, i32, i32
  }
  func.func @transform_1(%arg0: i32) -> (i32, i32) {
    %c0_i32 = arith.constant 0 : i32
    %c0_i32_0 = arith.constant 0 : i32
    %c0_i32_1 = arith.constant 0 : i32
    return %c0_i32, %c0_i32_0 : i32, i32
  }
  func.func @transform_2(%arg0: i32) -> (i32, i32) {
    %c0_i32 = arith.constant 0 : i32
    %c0_i32_0 = arith.constant 0 : i32
    %c0_i32_1 = arith.constant 0 : i32
    return %c0_i32, %c0_i32_0 : i32, i32
  }
  func.func @transform_3(%arg0: i32) -> (i32, i32) {
    %c0_i32 = arith.constant 0 : i32
    %c0_i32_0 = arith.constant 0 : i32
    %c0_i32_1 = arith.constant 0 : i32
    return %c0_i32, %c0_i32_0 : i32, i32
  }
}

</mosaic_0001>

<bundles_post_ra>
// kernel: resnet_forward.13
= control target key start
LH: loop header
LB: loop body
LE: loop exit
PB: predicated region body
PF: predicated region fallthrough
CT: control target
= control target key end

     0   :  { %s1556_s15 = smov 0   ;;  %s1558_s16 = smov 0   ;;  %s1786_s0 = inlined_call_operand.vmem [shape: bf16[512,256], index: 0, kind: input, shape index: {}]   ;;  %s1787_s1 = inlined_call_operand.vmem [shape: bf16[256,128], index: 1, kind: input, shape index: {}]   ;;  %s1788_s2 = inlined_call_operand.vmem [shape: f32[1,128], index: 2, kind: input, shape index: {}]   ;;  %s1789_s3 = inlined_call_operand.vmem [shape: f32[1,128], index: 3, kind: input, shape index: {}]   ;;  %s1790_s4 = inlined_call_operand.vmem [shape: f32[512,128], index: 4, kind: output, shape index: {}]  }
   0x1   :  { %s1560_s17 = smov 0  }
   0x2 LB: > { %s33_s18 = sadd.s32 1, %s1525_s16  ;;  %p1232_p0 = scmp.ge.s32.totalorder %s1529_s17, 1  ;;  %s1529_s17 = sphi %s1560_s17, %s14_s17   ;;  %s1525_s16 = sphi %s1558_s16, %s1792_s16   ;;  %s1521_s15 = sphi %s1556_s15, %s1791_s15  }
   0x3   : > { %p35_p1 = scmp.ge.s32.totalorder %s33_s18, 2  ;;  %p224_p2 = scmp.lt.s32.totalorder %s1529_s17, 3 }
   0x5   : > { %s1794_s18 = smov (%p35_p1, %s33_s18), 0  ;;  %p225_p3 = pnand %p1232_p0, %p224_p2 }
   0x6   : > { %v1443_v0 = vld [vmem:[%s1787_s1 + $0x40] sm:$0xff] (!%p225_p3)   ;;  %s1233_s21 = sshll.u32 (!%p225_p3), %s1521_s15, 5  ;;  %v1445_v2 = vld [vmem:[%s1787_s1 + $0x48] sm:$0xff] (!%p225_p3)   ;;  %v1447_v4 = vld [vmem:[%s1787_s1 + $0x50] sm:$0xff] (!%p225_p3)  }
   0x7   : > { %228 = sbr.rel (%p225_p3) target bundleno = 320 (0x140), region = 36  ;;  %v1444_v1 = vld [vmem:[%s1787_s1] sm:$0xff] (!%p225_p3)   ;;  %1291 = vmatprep.subr.bf16.mxu0 (!%p225_p3), %v1443_v0  ;;  %1403 = vmatprep.subr.bf16.mxu1 (!%p225_p3), %v1443_v0  ;;  %v1446_v3 = vld [vmem:[%s1787_s1 + $0x8] sm:$0xff] (!%p225_p3)   ;;  %p274_p4 = scmp.lt.s32.totalorder (!%p225_p3), %s1233_s21, 63  ;;  %v1448_v5 = vld [vmem:[%s1787_s1 + $0x10] sm:$0xff] (!%p225_p3)  }
   0x8   : > { %1292 = vmatpush3.bf16.msra.mxu0 (!%p225_p3), %v1444_v1  ;;  %1411 = vmatpush3.bf16.msra.mxu1 (!%p225_p3), %v1444_v1  ;;  %v1449_v6 = vld [vmem:[%s1787_s1 + $0x58] sm:$0xff] (!%p225_p3)   ;;  %v1451_v8 = vld [vmem:[%s1787_s1 + $0x60] sm:$0xff] (!%p225_p3)   ;;  %v1453_v10 = vld [vmem:[%s1787_s1 + $0x68] sm:$0xff] (!%p225_p3)  }
   0x9   : > { %1293 = vmatprep.subr.bf16.mxu0 (!%p225_p3), %v1445_v2  ;;  %1404 = vmatprep.subr.bf16.mxu1 (!%p225_p3), %v1445_v2  ;;  %v1450_v7 = vld [vmem:[%s1787_s1 + $0x18] sm:$0xff] (!%p225_p3)   ;;  %v1452_v9 = vld [vmem:[%s1787_s1 + $0x20] sm:$0xff] (!%p225_p3)   ;;  %v1454_v13 = vld [vmem:[%s1787_s1 + $0x28] sm:$0xff] (!%p225_p3)  }
   0xa   : > { %v1455_v14 = vld [vmem:[%s1787_s1 + $0x70] sm:$0xff] (!%p225_p3)   ;;  %v1457_v16 = vld [vmem:[%s1787_s1 + $0x78] sm:$0xff] (!%p225_p3)   ;;  %v1667_v51 = vld [vmem:[%s1788_s2] ss:$0 sm:$0xff] (!%p225_p3) }
   0xb   : > { %v1456_v15 = vld [vmem:[%s1787_s1 + $0x30] sm:$0xff] (!%p225_p3)   ;;  %v1458_v17 = vld [vmem:[%s1787_s1 + $0x38] sm:$0xff] (!%p225_p3)   ;;  %v1672_v57 = vld [vmem:[%s1789_s3] ss:$0 sm:$0xff] (!%p225_p3) }
   0xc   : > { %1294 = vmatpush3.bf16.msra.mxu0 (!%p225_p3), %v1446_v3  ;;  %1412 = vmatpush3.bf16.msra.mxu1 (!%p225_p3), %v1446_v3 }
   0xd   : > { %1295 = vmatprep.subr.bf16.mxu0 (!%p225_p3), %v1447_v4  ;;  %1405 = vmatprep.subr.bf16.mxu1 (!%p225_p3), %v1447_v4 }
   0xe   : > { %s1796_s21 = smov (!%p274_p4, %s1233_s21), 63 }
   0xf   : > { %s1290_s10 = sshll.u32 %s1796_s21, 3 }
  0x10   : > { %1296 = vmatpush3.bf16.msra.mxu0 %v1448_v5  ;;  %1413 = vmatpush3.bf16.msra.mxu1 %v1448_v5  ;;  %s1609_s15 = scalar_lea.vmem %s1786_s0, %s1290_s10 }
  0x11   : > { %1297 = vmatprep.subr.bf16.mxu0 %v1449_v6  ;;  %1406 = vmatprep.subr.bf16.mxu1 %v1449_v6  ;;  %v1461_v11 = vld [vmem:[%s1609_s15 + $0x4] ss:$8 sps:$4 sm:$0xff]   ;;  %v1459_v18 = vld [vmem:[%s1609_s15] ss:$8 sps:$4 sm:$0xff]   ;;  %v1465_v20 = vld [vmem:[%s1609_s15 + $0x14] ss:$8 sps:$4 sm:$0xff]  }
  0x12   : > { %v1464_v12 = vld [vmem:[%s1609_s15 + $0x84] ss:$8 sps:$4 sm:$0xff]   ;;  %729 = vmatprep.mubr.bf16.mxu0 %v1461_v11  ;;  %v1462_v19 = vld [vmem:[%s1609_s15 + $0x80] ss:$8 sps:$4 sm:$0xff]   ;;  %v1467_v21 = vld [vmem:[%s1609_s15 + $0x94] ss:$8 sps:$4 sm:$0xff]  }
  0x13   : > { %793 = vmatprep.mubr.bf16.mxu1 %v1464_v12  ;;  %v1469_v22 = vld [vmem:[%s1609_s15 + $0x10] ss:$8 sps:$4 sm:$0xff]   ;;  %v1471_v24 = vld [vmem:[%s1609_s15 + $0x24] ss:$8 sps:$4 sm:$0xff]   ;;  %v1475_v26 = vld [vmem:[%s1609_s15 + $0x20] ss:$8 sps:$4 sm:$0xff]  }
  0x14   : > { %1298 = vmatpush3.bf16.msra.mxu0 %v1450_v7  ;;  %1414 = vmatpush3.bf16.msra.mxu1 %v1450_v7  ;;  %v1470_v23 = vld [vmem:[%s1609_s15 + $0x90] ss:$8 sps:$4 sm:$0xff]   ;;  %v1473_v25 = vld [vmem:[%s1609_s15 + $0xa4] ss:$8 sps:$4 sm:$0xff]   ;;  %v1476_v27 = vld [vmem:[%s1609_s15 + $0xa0] ss:$8 sps:$4 sm:$0xff]  }
  0x15   : > { %1299 = vmatprep.subr.bf16.mxu0 %v1451_v8  ;;  %1407 = vmatprep.subr.bf16.mxu1 %v1451_v8  ;;  %v1477_v28 = vld [vmem:[%s1609_s15 + $0x34] ss:$8 sps:$4 sm:$0xff]   ;;  %v1481_v30 = vld [vmem:[%s1609_s15 + $0x30] ss:$8 sps:$4 sm:$0xff]   ;;  %v1483_v32 = vld [vmem:[%s1609_s15 + $0x44] ss:$8 sps:$4 sm:$0xff]  }
  0x16   : > { %v1479_v29 = vld [vmem:[%s1609_s15 + $0xb4] ss:$8 sps:$4 sm:$0xff]   ;;  %v1482_v31 = vld [vmem:[%s1609_s15 + $0xb0] ss:$8 sps:$4 sm:$0xff]   ;;  %v1485_v33 = vld [vmem:[%s1609_s15 + $0xc4] ss:$8 sps:$4 sm:$0xff]  }
  0x17   : > { %v1487_v34 = vld [vmem:[%s1609_s15 + $0x40] ss:$8 sps:$4 sm:$0xff]   ;;  %v1489_v36 = vld [vmem:[%s1609_s15 + $0x54] ss:$8 sps:$4 sm:$0xff]   ;;  %v1493_v38 = vld [vmem:[%s1609_s15 + $0x50] ss:$8 sps:$4 sm:$0xff]  }
  0x18   : > { %1300 = vmatpush3.bf16.msra.mxu0 %v1452_v9  ;;  %1415 = vmatpush3.bf16.msra.mxu1 %v1452_v9  ;;  %v1488_v35 = vld [vmem:[%s1609_s15 + $0xc0] ss:$8 sps:$4 sm:$0xff]   ;;  %v1491_v37 = vld [vmem:[%s1609_s15 + $0xd4] ss:$8 sps:$4 sm:$0xff]   ;;  %v1494_v39 = vld [vmem:[%s1609_s15 + $0xd0] ss:$8 sps:$4 sm:$0xff]  }
  0x19   : > { %1301 = vmatprep.subr.bf16.mxu0 %v1453_v10  ;;  %1408 = vmatprep.subr.bf16.mxu1 %v1453_v10  ;;  %v1495_v40 = vld [vmem:[%s1609_s15 + $0x64] ss:$8 sps:$4 sm:$0xff]   ;;  %v1499_v42 = vld [vmem:[%s1609_s15 + $0x60] ss:$8 sps:$4 sm:$0xff]   ;;  %v1501_v44 = vld [vmem:[%s1609_s15 + $0x74] ss:$8 sps:$4 sm:$0xff]  }
  0x1a   : > { %v1497_v41 = vld [vmem:[%s1609_s15 + $0xe4] ss:$8 sps:$4 sm:$0xff]   ;;  %v1500_v43 = vld [vmem:[%s1609_s15 + $0xe0] ss:$8 sps:$4 sm:$0xff]   ;;  %v1503_v45 = vld [vmem:[%s1609_s15 + $0xf4] ss:$8 sps:$4 sm:$0xff]  }
  0x1b   : > { %v1505_v46 = vld [vmem:[%s1609_s15 + $0x70] ss:$8 sps:$4 sm:$0xff]  }
  0x1c   : > { %1302 = vmatpush3.bf16.msra.mxu0 %v1454_v13  ;;  %1416 = vmatpush3.bf16.msra.mxu1 %v1454_v13  ;;  %v1506_v47 = vld [vmem:[%s1609_s15 + $0xf0] ss:$8 sps:$4 sm:$0xff]   ;;  %s1685_s15 = scalar_lea.vmem %s1790_s4, %s1290_s10 }
  0x1d   : > { %1303 = vmatprep.subr.bf16.mxu0 %v1455_v14  ;;  %1409 = vmatprep.subr.bf16.mxu1 %v1455_v14 }
  0x20   : > { %1304 = vmatpush3.bf16.msra.mxu0 %v1456_v15  ;;  %1417 = vmatpush3.bf16.msra.mxu1 %v1456_v15 }
  0x21   : > { %1305 = vmatprep.subr.bf16.mxu0 %v1457_v16  ;;  %1410 = vmatprep.subr.bf16.mxu1 %v1457_v16 }
  0x24   : > { %1306 = vmatpush3.bf16.msra.mxu0 %v1458_v17  ;;  %1418 = vmatpush3.bf16.msra.mxu1 %v1458_v17 }
  0x27   : > { %730 = vmatmul.mubr.bf16.vlgmr.msra.gmra.mrb[0].mxu0 %v1459_v18  ;;  %794 = vmatmul.mubr.bf16.vlgmr.msra.gmra.mrb[0].mxu1 %v1462_v19 }
  0x28   : > { %737 = vmatprep.mubr.bf16.mxu0 %v1465_v20  ;;  %801 = vmatprep.mubr.bf16.mxu1 %v1467_v21 }
  0x2f   : > { %738 = vmatmul.mubr.bf16.gmra.mrb[4].mxu0 %v1469_v22  ;;  %802 = vmatmul.mubr.bf16.gmra.mrb[4].mxu1 %v1470_v23 }
  0x30   : > { %745 = vmatprep.mubr.bf16.mxu0 %v1471_v24  ;;  %809 = vmatprep.mubr.bf16.mxu1 %v1473_v25 }
  0x37   : > { %746 = vmatmul.mubr.bf16.gmra.mrb[8].mxu0 %v1475_v26  ;;  %810 = vmatmul.mubr.bf16.gmra.mrb[8].mxu1 %v1476_v27 }
  0x38   : > { %753 = vmatprep.mubr.bf16.mxu0 %v1477_v28  ;;  %817 = vmatprep.mubr.bf16.mxu1 %v1479_v29 }
  0x3f   : > { %754 = vmatmul.mubr.bf16.gmra.mrb[12].mxu0 %v1481_v30  ;;  %818 = vmatmul.mubr.bf16.gmra.mrb[12].mxu1 %v1482_v31 }
  0x40   : > { %761 = vmatprep.mubr.bf16.mxu0 %v1483_v32  ;;  %825 = vmatprep.mubr.bf16.mxu1 %v1485_v33 }
  0x47   : > { %762 = vmatmul.mubr.bf16.gmra.mrb[16].mxu0 %v1487_v34  ;;  %826 = vmatmul.mubr.bf16.gmra.mrb[16].mxu1 %v1488_v35 }
  0x48   : > { %769 = vmatprep.mubr.bf16.mxu0 %v1489_v36  ;;  %833 = vmatprep.mubr.bf16.mxu1 %v1491_v37 }
  0x4f   : > { %770 = vmatmul.mubr.bf16.gmra.mrb[20].mxu0 %v1493_v38  ;;  %834 = vmatmul.mubr.bf16.gmra.mrb[20].mxu1 %v1494_v39 }
  0x50   : > { %777 = vmatprep.mubr.bf16.mxu0 %v1495_v40  ;;  %841 = vmatprep.mubr.bf16.mxu1 %v1497_v41 }
  0x57   : > { %778 = vmatmul.mubr.bf16.gmra.mrb[24].mxu0 %v1499_v42  ;;  %842 = vmatmul.mubr.bf16.gmra.mrb[24].mxu1 %v1500_v43 }
  0x58   : > { %785 = vmatprep.mubr.bf16.mxu0 %v1501_v44  ;;  %849 = vmatprep.mubr.bf16.mxu1 %v1503_v45 }
  0x5f   : > { %786 = vmatmul.mubr.bf16.gmra.mrb[28].mxu0 %v1505_v46  ;;  %850 = vmatmul.mubr.bf16.gmra.mrb[28].mxu1 %v1506_v47 }
  0xfa   : > { %v1307_v48 = vpop.f32.mrb[0].mxu0  ;;  %v1355_v49 = vpop.f32.mrb[0].mxu1 }
  0xfb   : > { %v1308_v50 = vpop.f32.mrb[1].mxu0  ;;  %v1356_v52 = vpop.f32.mrb[1].mxu1 }
  0xfc   : > { %v1309_v53 = vadd.f32 %v1308_v50, %v1307_v48  ;;  %v1357_v54 = vadd.f32 %v1356_v52, %v1355_v49  ;;  %v1310_v55 = vpop.f32.mrb[2].mxu0  ;;  %v1358_v56 = vpop.f32.mrb[2].mxu1 }
  0xfd   : > { %v1311_v58 = vpop.f32.mrb[3].mxu0  ;;  %v1359_v59 = vpop.f32.mrb[3].mxu1 }
  0xfe   : > { %v964_v60 = vmul.f32 %v1309_v53, %v1667_v51  ;;  %v980_v61 = vmul.f32 %v1357_v54, %v1667_v51  ;;  %v1312_v62 = vadd.f32 %v1311_v58, %v1310_v55  ;;  %v1360_v63 = vadd.f32 %v1359_v59, %v1358_v56 }
 0x100   : > { %v1003_v0 = vadd.f32 %v1672_v57, %v964_v60  ;;  %v1019_v1 = vadd.f32 %v1672_v57, %v980_v61  ;;  %v965_v2 = vmul.f32 %v1312_v62, %v1667_v51  ;;  %v981_v3 = vmul.f32 %v1360_v63, %v1667_v51 }
 0x102   : > { %v1035_v4 = vmax.f32 %v1003_v0, 0.0  ;;  %v1051_v5 = vmax.f32 %v1019_v1, 0.0  ;;  %v1004_v6 = vadd.f32 %v1672_v57, %v965_v2  ;;  %v1020_v7 = vadd.f32 %v1672_v57, %v981_v3  ;;  %v1313_v8 = vpop.f32.mrb[4].mxu0  ;;  %v1361_v9 = vpop.f32.mrb[4].mxu1 }
 0x103   : > { %v1314_v10 = vpop.f32.mrb[5].mxu0  ;;  %v1362_v11 = vpop.f32.mrb[5].mxu1 }
 0x104   : > { %1067 = vst [vmem:[%s1685_s15] sm:$0xff] %v1035_v4  ;;  %1083 = vst [vmem:[%s1685_s15 + $0x80] sm:$0xff] %v1051_v5  ;;  %v1036_v12 = vmax.f32 %v1004_v6, 0.0  ;;  %v1052_v13 = vmax.f32 %v1020_v7, 0.0  ;;  %v1315_v14 = vadd.f32 %v1314_v10, %v1313_v8  ;;  %v1363_v15 = vadd.f32 %v1362_v11, %v1361_v9  ;;  %v1316_v16 = vpop.f32.mrb[6].mxu0  ;;  %v1364_v17 = vpop.f32.mrb[6].mxu1 }
 0x105   : > { %v1317_v18 = vpop.f32.mrb[7].mxu0  ;;  %v1365_v19 = vpop.f32.mrb[7].mxu1 }
 0x106   : > { %1068 = vst [vmem:[%s1685_s15 + $0x8] sm:$0xff] %v1036_v12  ;;  %1084 = vst [vmem:[%s1685_s15 + $0x88] sm:$0xff] %v1052_v13  ;;  %v966_v20 = vmul.f32 %v1315_v14, %v1667_v51  ;;  %v982_v21 = vmul.f32 %v1363_v15, %v1667_v51  ;;  %v1318_v22 = vadd.f32 %v1317_v18, %v1316_v16 }
 0x107   : > { %v1366_v23 = vadd.f32 %v1365_v19, %v1364_v17 }
 0x108   : > { %v1005_v24 = vadd.f32 %v1672_v57, %v966_v20  ;;  %v1021_v25 = vadd.f32 %v1672_v57, %v982_v21  ;;  %v967_v26 = vmul.f32 %v1318_v22, %v1667_v51 }
 0x109   : > { %v983_v27 = vmul.f32 %v1366_v23, %v1667_v51 }
 0x10a   : > { %v1037_v28 = vmax.f32 %v1005_v24, 0.0  ;;  %v1053_v29 = vmax.f32 %v1021_v25, 0.0  ;;  %v1006_v30 = vadd.f32 %v1672_v57, %v967_v26  ;;  %v1319_v32 = vpop.f32.mrb[8].mxu0  ;;  %v1367_v33 = vpop.f32.mrb[8].mxu1 }
 0x10b   : > { %v1022_v31 = vadd.f32 %v1672_v57, %v983_v27  ;;  %v1320_v34 = vpop.f32.mrb[9].mxu0  ;;  %v1368_v35 = vpop.f32.mrb[9].mxu1 }
 0x10c   : > { %1069 = vst [vmem:[%s1685_s15 + $0x10] sm:$0xff] %v1037_v28  ;;  %1085 = vst [vmem:[%s1685_s15 + $0x90] sm:$0xff] %v1053_v29  ;;  %v1038_v36 = vmax.f32 %v1006_v30, 0.0  ;;  %v1321_v38 = vadd.f32 %v1320_v34, %v1319_v32  ;;  %v1369_v39 = vadd.f32 %v1368_v35, %v1367_v33  ;;  %v1322_v40 = vpop.f32.mrb[10].mxu0  ;;  %v1370_v41 = vpop.f32.mrb[10].mxu1 }
 0x10d   : > { %v1054_v37 = vmax.f32 %v1022_v31, 0.0  ;;  %v1323_v42 = vpop.f32.mrb[11].mxu0  ;;  %v1371_v43 = vpop.f32.mrb[11].mxu1 }
 0x10e   : > { %1070 = vst [vmem:[%s1685_s15 + $0x18] sm:$0xff] %v1038_v36  ;;  %v968_v44 = vmul.f32 %v1321_v38, %v1667_v51  ;;  %v984_v45 = vmul.f32 %v1369_v39, %v1667_v51  ;;  %v1324_v46 = vadd.f32 %v1323_v42, %v1322_v40  ;;  %v1372_v47 = vadd.f32 %v1371_v43, %v1370_v41 }
 0x10f   : > { %1086 = vst [vmem:[%s1685_s15 + $0x98] sm:$0xff] %v1054_v37 }
 0x110   : > { %v1007_v48 = vadd.f32 %v1672_v57, %v968_v44  ;;  %v1023_v49 = vadd.f32 %v1672_v57, %v984_v45  ;;  %v969_v50 = vmul.f32 %v1324_v46, %v1667_v51  ;;  %v985_v52 = vmul.f32 %v1372_v47, %v1667_v51 }
 0x112   : > { %v1039_v53 = vmax.f32 %v1007_v48, 0.0  ;;  %v1055_v54 = vmax.f32 %v1023_v49, 0.0  ;;  %v1008_v55 = vadd.f32 %v1672_v57, %v969_v50  ;;  %v1024_v56 = vadd.f32 %v1672_v57, %v985_v52  ;;  %v1325_v58 = vpop.f32.mrb[12].mxu0  ;;  %v1373_v59 = vpop.f32.mrb[12].mxu1 }
 0x113   : > { %v1326_v60 = vpop.f32.mrb[13].mxu0  ;;  %v1374_v61 = vpop.f32.mrb[13].mxu1 }
 0x114   : > { %1071 = vst [vmem:[%s1685_s15 + $0x20] sm:$0xff] %v1039_v53  ;;  %1087 = vst [vmem:[%s1685_s15 + $0xa0] sm:$0xff] %v1055_v54  ;;  %v1040_v62 = vmax.f32 %v1008_v55, 0.0  ;;  %v1056_v63 = vmax.f32 %v1024_v56, 0.0  ;;  %v1327_v0 = vadd.f32 %v1326_v60, %v1325_v58  ;;  %v1375_v1 = vadd.f32 %v1374_v61, %v1373_v59  ;;  %v1328_v2 = vpop.f32.mrb[14].mxu0  ;;  %v1376_v3 = vpop.f32.mrb[14].mxu1 }
 0x115   : > { %v1329_v4 = vpop.f32.mrb[15].mxu0  ;;  %v1377_v5 = vpop.f32.mrb[15].mxu1 }
 0x116   : > { %1072 = vst [vmem:[%s1685_s15 + $0x28] sm:$0xff] %v1040_v62  ;;  %1088 = vst [vmem:[%s1685_s15 + $0xa8] sm:$0xff] %v1056_v63  ;;  %v970_v6 = vmul.f32 %v1327_v0, %v1667_v51  ;;  %v986_v7 = vmul.f32 %v1375_v1, %v1667_v51  ;;  %v1330_v8 = vadd.f32 %v1329_v4, %v1328_v2 }
 0x117   : > { %v1378_v9 = vadd.f32 %v1377_v5, %v1376_v3 }
 0x118   : > { %v1009_v10 = vadd.f32 %v1672_v57, %v970_v6  ;;  %v1025_v11 = vadd.f32 %v1672_v57, %v986_v7  ;;  %v971_v12 = vmul.f32 %v1330_v8, %v1667_v51 }
 0x119   : > { %v987_v13 = vmul.f32 %v1378_v9, %v1667_v51 }
 0x11a   : > { %v1041_v14 = vmax.f32 %v1009_v10, 0.0  ;;  %v1057_v15 = vmax.f32 %v1025_v11, 0.0  ;;  %v1010_v16 = vadd.f32 %v1672_v57, %v971_v12  ;;  %v1331_v18 = vpop.f32.mrb[16].mxu0  ;;  %v1379_v19 = vpop.f32.mrb[16].mxu1 }
 0x11b   : > { %v1026_v17 = vadd.f32 %v1672_v57, %v987_v13  ;;  %v1332_v20 = vpop.f32.mrb[17].mxu0  ;;  %v1380_v21 = vpop.f32.mrb[17].mxu1 }
 0x11c   : > { %1073 = vst [vmem:[%s1685_s15 + $0x30] sm:$0xff] %v1041_v14  ;;  %1089 = vst [vmem:[%s1685_s15 + $0xb0] sm:$0xff] %v1057_v15  ;;  %v1042_v22 = vmax.f32 %v1010_v16, 0.0  ;;  %v1333_v24 = vadd.f32 %v1332_v20, %v1331_v18  ;;  %v1381_v25 = vadd.f32 %v1380_v21, %v1379_v19  ;;  %v1334_v26 = vpop.f32.mrb[18].mxu0  ;;  %v1382_v27 = vpop.f32.mrb[18].mxu1 }
 0x11d   : > { %v1058_v23 = vmax.f32 %v1026_v17, 0.0  ;;  %v1335_v28 = vpop.f32.mrb[19].mxu0  ;;  %v1383_v29 = vpop.f32.mrb[19].mxu1 }
 0x11e   : > { %1074 = vst [vmem:[%s1685_s15 + $0x38] sm:$0xff] %v1042_v22  ;;  %v972_v30 = vmul.f32 %v1333_v24, %v1667_v51  ;;  %v988_v31 = vmul.f32 %v1381_v25, %v1667_v51  ;;  %v1336_v32 = vadd.f32 %v1335_v28, %v1334_v26  ;;  %v1384_v33 = vadd.f32 %v1383_v29, %v1382_v27 }
 0x11f   : > { %1090 = vst [vmem:[%s1685_s15 + $0xb8] sm:$0xff] %v1058_v23 }
 0x120   : > { %v1011_v34 = vadd.f32 %v1672_v57, %v972_v30  ;;  %v1027_v35 = vadd.f32 %v1672_v57, %v988_v31  ;;  %v973_v36 = vmul.f32 %v1336_v32, %v1667_v51  ;;  %v989_v37 = vmul.f32 %v1384_v33, %v1667_v51 }
 0x122   : > { %v1043_v38 = vmax.f32 %v1011_v34, 0.0  ;;  %v1059_v39 = vmax.f32 %v1027_v35, 0.0  ;;  %v1012_v40 = vadd.f32 %v1672_v57, %v973_v36  ;;  %v1028_v41 = vadd.f32 %v1672_v57, %v989_v37  ;;  %v1337_v42 = vpop.f32.mrb[20].mxu0  ;;  %v1385_v43 = vpop.f32.mrb[20].mxu1 }
 0x123   : > { %v1338_v44 = vpop.f32.mrb[21].mxu0  ;;  %v1386_v45 = vpop.f32.mrb[21].mxu1 }
 0x124   : > { %1075 = vst [vmem:[%s1685_s15 + $0x40] sm:$0xff] %v1043_v38  ;;  %1091 = vst [vmem:[%s1685_s15 + $0xc0] sm:$0xff] %v1059_v39  ;;  %v1044_v46 = vmax.f32 %v1012_v40, 0.0  ;;  %v1060_v47 = vmax.f32 %v1028_v41, 0.0  ;;  %v1339_v48 = vadd.f32 %v1338_v44, %v1337_v42  ;;  %v1387_v49 = vadd.f32 %v1386_v45, %v1385_v43  ;;  %v1340_v50 = vpop.f32.mrb[22].mxu0  ;;  %v1388_v52 = vpop.f32.mrb[22].mxu1 }
 0x125   : > { %v1341_v53 = vpop.f32.mrb[23].mxu0  ;;  %v1389_v54 = vpop.f32.mrb[23].mxu1 }
 0x126   : > { %1076 = vst [vmem:[%s1685_s15 + $0x48] sm:$0xff] %v1044_v46  ;;  %1092 = vst [vmem:[%s1685_s15 + $0xc8] sm:$0xff] %v1060_v47  ;;  %v974_v55 = vmul.f32 %v1339_v48, %v1667_v51  ;;  %v990_v56 = vmul.f32 %v1387_v49, %v1667_v51  ;;  %v1342_v58 = vadd.f32 %v1341_v53, %v1340_v50 }
 0x127   : > { %v1390_v59 = vadd.f32 %v1389_v54, %v1388_v52 }
 0x128   : > { %v1013_v60 = vadd.f32 %v1672_v57, %v974_v55  ;;  %v1029_v61 = vadd.f32 %v1672_v57, %v990_v56  ;;  %v975_v62 = vmul.f32 %v1342_v58, %v1667_v51 }
 0x129   : > { %v991_v63 = vmul.f32 %v1390_v59, %v1667_v51 }
 0x12a   : > { %v1045_v0 = vmax.f32 %v1013_v60, 0.0  ;;  %v1061_v1 = vmax.f32 %v1029_v61, 0.0  ;;  %v1014_v2 = vadd.f32 %v1672_v57, %v975_v62  ;;  %v1343_v4 = vpop.f32.mrb[24].mxu0  ;;  %v1391_v5 = vpop.f32.mrb[24].mxu1 }
 0x12b   : > { %v1030_v3 = vadd.f32 %v1672_v57, %v991_v63  ;;  %v1344_v6 = vpop.f32.mrb[25].mxu0  ;;  %v1392_v7 = vpop.f32.mrb[25].mxu1 }
 0x12c   : > { %1077 = vst [vmem:[%s1685_s15 + $0x50] sm:$0xff] %v1045_v0  ;;  %1093 = vst [vmem:[%s1685_s15 + $0xd0] sm:$0xff] %v1061_v1  ;;  %v1046_v8 = vmax.f32 %v1014_v2, 0.0  ;;  %v1345_v10 = vadd.f32 %v1344_v6, %v1343_v4  ;;  %v1393_v11 = vadd.f32 %v1392_v7, %v1391_v5  ;;  %v1346_v12 = vpop.f32.mrb[26].mxu0  ;;  %v1394_v13 = vpop.f32.mrb[26].mxu1 }
 0x12d   : > { %v1062_v9 = vmax.f32 %v1030_v3, 0.0  ;;  %v1347_v14 = vpop.f32.mrb[27].mxu0  ;;  %v1395_v15 = vpop.f32.mrb[27].mxu1 }
 0x12e   : > { %1078 = vst [vmem:[%s1685_s15 + $0x58] sm:$0xff] %v1046_v8  ;;  %v976_v16 = vmul.f32 %v1345_v10, %v1667_v51  ;;  %v992_v17 = vmul.f32 %v1393_v11, %v1667_v51  ;;  %v1348_v18 = vadd.f32 %v1347_v14, %v1346_v12  ;;  %v1396_v19 = vadd.f32 %v1395_v15, %v1394_v13 }
 0x12f   : > { %1094 = vst [vmem:[%s1685_s15 + $0xd8] sm:$0xff] %v1062_v9 }
 0x130   : > { %v1015_v20 = vadd.f32 %v1672_v57, %v976_v16  ;;  %v1031_v21 = vadd.f32 %v1672_v57, %v992_v17  ;;  %v977_v22 = vmul.f32 %v1348_v18, %v1667_v51  ;;  %v993_v23 = vmul.f32 %v1396_v19, %v1667_v51 }
 0x132   : > { %v1047_v24 = vmax.f32 %v1015_v20, 0.0  ;;  %v1063_v25 = vmax.f32 %v1031_v21, 0.0  ;;  %v1016_v26 = vadd.f32 %v1672_v57, %v977_v22  ;;  %v1032_v27 = vadd.f32 %v1672_v57, %v993_v23  ;;  %v1349_v28 = vpop.f32.mrb[28].mxu0  ;;  %v1397_v29 = vpop.f32.mrb[28].mxu1 }
 0x133   : > { %v1350_v30 = vpop.f32.mrb[29].mxu0  ;;  %v1398_v31 = vpop.f32.mrb[29].mxu1 }
 0x134   : > { %1079 = vst [vmem:[%s1685_s15 + $0x60] sm:$0xff] %v1047_v24  ;;  %1095 = vst [vmem:[%s1685_s15 + $0xe0] sm:$0xff] %v1063_v25  ;;  %v1048_v32 = vmax.f32 %v1016_v26, 0.0  ;;  %v1064_v33 = vmax.f32 %v1032_v27, 0.0  ;;  %v1351_v34 = vadd.f32 %v1350_v30, %v1349_v28  ;;  %v1399_v35 = vadd.f32 %v1398_v31, %v1397_v29  ;;  %v1352_v36 = vpop.f32.mrb[30].mxu0  ;;  %v1400_v37 = vpop.f32.mrb[30].mxu1 }
 0x135   : > { %v1353_v38 = vpop.f32.mrb[31].mxu0  ;;  %v1401_v39 = vpop.f32.mrb[31].mxu1 }
 0x136   : > { %1080 = vst [vmem:[%s1685_s15 + $0x68] sm:$0xff] %v1048_v32  ;;  %1096 = vst [vmem:[%s1685_s15 + $0xe8] sm:$0xff] %v1064_v33  ;;  %v978_v40 = vmul.f32 %v1351_v34, %v1667_v51  ;;  %v994_v41 = vmul.f32 %v1399_v35, %v1667_v51  ;;  %v1354_v42 = vadd.f32 %v1353_v38, %v1352_v36 }
 0x137   : > { %v1402_v43 = vadd.f32 %v1401_v39, %v1400_v37 }
 0x138   : > { %v1017_v44 = vadd.f32 %v1672_v57, %v978_v40  ;;  %v1033_v45 = vadd.f32 %v1672_v57, %v994_v41  ;;  %v979_v46 = vmul.f32 %v1354_v42, %v1667_v51 }
 0x139   : > { %v995_v47 = vmul.f32 %v1402_v43, %v1667_v51 }
 0x13a   : > { %v1049_v48 = vmax.f32 %v1017_v44, 0.0  ;;  %v1065_v49 = vmax.f32 %v1033_v45, 0.0  ;;  %v1018_v50 = vadd.f32 %v1672_v57, %v979_v46 }
 0x13b   : > { %v1034_v52 = vadd.f32 %v1672_v57, %v995_v47 }
 0x13c   : > { %1081 = vst [vmem:[%s1685_s15 + $0x70] sm:$0xff] %v1049_v48  ;;  %1097 = vst [vmem:[%s1685_s15 + $0xf0] sm:$0xff] %v1065_v49  ;;  %v1050_v53 = vmax.f32 %v1018_v50, 0.0 }
 0x13d   : > { %v1066_v54 = vmax.f32 %v1034_v52, 0.0 }
 0x13e   : > { %1082 = vst [vmem:[%s1685_s15 + $0x78] sm:$0xff] %v1050_v53 }
 0x13f   : > { %1098 = vst [vmem:[%s1685_s15 + $0xf8] sm:$0xff] %v1066_v54 }
 0x140 PF: > { %s14_s17 = sadd.s32 1, %s1529_s17   ;;  %s1791_s15 = smov %s1525_s16 }
 0x141   : > { %p11_p5 = scmp.ge.s32.totalorder %s14_s17, 4   ;;  %s1792_s16 = smov %s1794_s18 }
 0x143   :  { %13 = sbr.rel (!%p11_p5) target bundleno = 2 (0x2), region = 83 }

// kernel: resnet_forward.14
= control target key start
LH: loop header
LB: loop body
LE: loop exit
PB: predicated region body
PF: predicated region fallthrough
CT: control target
= control target key end

     0   :  { %s1130_s15 = smov 0   ;;  %s1132_s16 = smov 0   ;;  %s1307_s0 = inlined_call_operand.vmem [shape: bf16[128,1152], index: 0, kind: input, shape index: {}]   ;;  %s1308_s1 = inlined_call_operand.vmem [shape: bf16[1152,128], index: 1, kind: input, shape index: {}]   ;;  %s1309_s2 = inlined_call_operand.vmem [shape: f32[1,128], index: 2, kind: input, shape index: {}]   ;;  %s1310_s3 = inlined_call_operand.vmem [shape: f32[1,128], index: 3, kind: input, shape index: {}]   ;;  %s1311_s4 = inlined_call_operand.vmem [shape: f32[128,128], index: 4, kind: output, shape index: {}]  }
   0x1   :  { %s1134_s17 = smov 0   ;;  %s1136_s18 = smov 0  }
   0x2   :  { %s1138_s19 = smov 0  }
   0x3 LB: > { %s26_s20 = sadd.s32 1, %s1098_s18  ;;  %p49_p1 = scmp.ne.s32.totalorder %s1090_s16, %s1086_s15  ;;  %s1102_s19 = sphi %s1138_s19, %s14_s19   ;;  %s1098_s18 = sphi %s1136_s18, %s1315_s18   ;;  %s1094_s17 = sphi %s1134_s17, %s1314_s17   ;;  %s1090_s16 = sphi %s1132_s16, %s1313_s16   ;;  %s1086_s15 = sphi %s1130_s15, %s1312_s15  }
   0x4   : > { %p27_p0 = scmp.ge.s32.totalorder %s26_s20, 9  ;;  %p50_p2 = scmp.eq.s32.totalorder %s1102_s19, 0 }
   0x5   : > { %s42_s22 = sadd.s32 1, %s1090_s16  ;;  %p912_p5 = scmp.ge.s32.totalorder %s1102_s19, 9 }
   0x6   : > { %s1317_s20 = smov (%p27_p0, %s26_s20), 0  ;;  %p51_p3 = por %p50_p2, %p49_p1 }
   0x7   : > { %s38_s21 = ssub.s32 %s1098_s18, %s1317_s20  ;;  %195 = sbr.rel (%p912_p5) target bundleno = 28 (0x1c), region = 24 }
   0x8   : > { %p40_p4 = scmp.eq.s32.totalorder %s38_s21, 0 }
   0xa   : > { %s1165_s23 = scalar_select %p40_p4, %s1090_s16, %s42_s22  }
   0xe   : > { %198 = sbr.rel (!%p51_p3) target bundleno = 28 (0x1c), region = 28  ;;  %s200_s24 = sand.u32 (%p51_p3), 1, %s1090_s16  }
   0xf   : > { %s914_s25 = sshll.u32 (%p51_p3), %s1098_s18, 2  ;;  %s913_s26 = sshll.u32 (%p51_p3), %s200_s24, 6 }
  0x10   : > { %s1173_s29 = scalar_lea.vmem (%p51_p3), %s1307_s0, %s914_s25  ;;  %s202_s30 = scalar_lea.vmem (%p51_p3), [#allocation3], %s913_s26 }
  0x11   : > { %v223_v0 = vld [vmem:[%s1173_s29] sm:$0xf] (%p51_p3)  ;;  %v225_v1 = vld [vmem:[%s1173_s29 + $0x24] sm:$0xf] (%p51_p3)  ;;  %v227_v2 = vld [vmem:[%s1173_s29 + $0x48] sm:$0xf] (%p51_p3) }
  0x12   : > { %224 = vst [vmem:[%s202_s30] sm:$0xf] (%p51_p3), %v223_v0  ;;  %226 = vst [vmem:[%s202_s30 + $0x4] sm:$0xf] (%p51_p3), %v225_v1  ;;  %v229_v3 = vld [vmem:[%s1173_s29 + $0x6c] sm:$0xf] (%p51_p3) }
  0x13   : > { %v231_v4 = vld [vmem:[%s1173_s29 + $0x90] sm:$0xf] (%p51_p3)  ;;  %228 = vst [vmem:[%s202_s30 + $0x8] sm:$0xf] (%p51_p3), %v227_v2  ;;  %230 = vst [vmem:[%s202_s30 + $0xc] sm:$0xf] (%p51_p3), %v229_v3 }
  0x14   : > { %232 = vst [vmem:[%s202_s30 + $0x10] sm:$0xf] (%p51_p3), %v231_v4  ;;  %v233_v5 = vld [vmem:[%s1173_s29 + $0xb4] sm:$0xf] (%p51_p3)  ;;  %v235_v6 = vld [vmem:[%s1173_s29 + $0xd8] sm:$0xf] (%p51_p3) }
  0x15   : > { %v237_v7 = vld [vmem:[%s1173_s29 + $0xfc] sm:$0xf]  ;;  %234 = vst [vmem:[%s202_s30 + $0x14] sm:$0xf] %v233_v5  ;;  %236 = vst [vmem:[%s202_s30 + $0x18] sm:$0xf] %v235_v6 }
  0x16   : > { %238 = vst [vmem:[%s202_s30 + $0x1c] sm:$0xf] %v237_v7  ;;  %v239_v8 = vld [vmem:[%s1173_s29 + $0x120] sm:$0xf]  ;;  %v241_v9 = vld [vmem:[%s1173_s29 + $0x144] sm:$0xf] }
  0x17   : > { %v243_v10 = vld [vmem:[%s1173_s29 + $0x168] sm:$0xf]  ;;  %240 = vst [vmem:[%s202_s30 + $0x20] sm:$0xf] %v239_v8  ;;  %242 = vst [vmem:[%s202_s30 + $0x24] sm:$0xf] %v241_v9 }
  0x18   : > { %244 = vst [vmem:[%s202_s30 + $0x28] sm:$0xf] %v243_v10  ;;  %v245_v11 = vld [vmem:[%s1173_s29 + $0x18c] sm:$0xf]  ;;  %v247_v12 = vld [vmem:[%s1173_s29 + $0x1b0] sm:$0xf] }
  0x19   : > { %v249_v13 = vld [vmem:[%s1173_s29 + $0x1d4] sm:$0xf]  ;;  %246 = vst [vmem:[%s202_s30 + $0x2c] sm:$0xf] %v245_v11  ;;  %248 = vst [vmem:[%s202_s30 + $0x30] sm:$0xf] %v247_v12 }
  0x1a   : > { %250 = vst [vmem:[%s202_s30 + $0x34] sm:$0xf] %v249_v13  ;;  %v251_v14 = vld [vmem:[%s1173_s29 + $0x1f8] sm:$0xf]  ;;  %v253_v15 = vld [vmem:[%s1173_s29 + $0x21c] sm:$0xf] }
  0x1b   : > { %252 = vst [vmem:[%s202_s30 + $0x38] sm:$0xf] %v251_v14  ;;  %254 = vst [vmem:[%s202_s30 + $0x3c] sm:$0xf] %v253_v15 }
  0x1c PF: > { %p915_p6 = scmp.ge.s32.totalorder %s1102_s19, 1  ;;  %p320_p7 = scmp.lt.s32.totalorder %s1102_s19, 10 }
  0x1e   : > { %p321_p8 = pnand %p915_p6, %p320_p7 }
  0x1f   : > { %s327_s5 = sand.u32 (!%p321_p8), 1, %s1086_s15   ;;  %s917_s6 = sshll.u32 (!%p321_p8), %s1094_s17, 4 }
  0x20   : > { %324 = sbr.rel (%p321_p8) target bundleno = 323 (0x143), region = 73  ;;  %s916_s7 = sshll.u32 (!%p321_p8), %s327_s5, 6 }
  0x21   : > { %p371_p9 = scmp.lt.s32.totalorder (!%p321_p8), %s917_s6, 143  ;;  %s1200_s12 = scalar_lea.vmem (!%p321_p8), [#allocation3], %s916_s7 }
  0x22   : > { %p919_p10 = scmp.ne.s32.totalorder (!%p321_p8), %s1094_s17, 0 }
  0x27   : > { %s1319_s6 = smov (!%p371_p9, %s917_s6), 143  ;;  %398 = sbr.rel (%p919_p10) target bundleno = 49 (0x31), region = 81 }
  0x28   : > { %s918_s8 = sshll.u32 %s1319_s6, 2  ;;  %v1104_v16 = vmov (!%p919_p10), 0.0  }
  0x29   : > { %s1198_s11 = scalar_lea.vmem %s1308_s1, %s918_s8  ;;  %399 = vst [vmem:[#allocation2] sm:$0xff] (!%p919_p10), %v1104_v16  ;;  %400 = vst [vmem:[#allocation2 + $0x8] sm:$0xff] (!%p919_p10), %v1104_v16 }
  0x2a   : > { %401 = vst [vmem:[#allocation2 + $0x10] sm:$0xff] (!%p919_p10), %v1104_v16  ;;  %402 = vst [vmem:[#allocation2 + $0x18] sm:$0xff] (!%p919_p10), %v1104_v16 }
  0x2b   : > { %403 = vst [vmem:[#allocation2 + $0x20] sm:$0xff] (!%p919_p10), %v1104_v16  ;;  %404 = vst [vmem:[#allocation2 + $0x28] sm:$0xff] (!%p919_p10), %v1104_v16 }
  0x2c   : > { %405 = vst [vmem:[#allocation2 + $0x30] sm:$0xff] (!%p919_p10), %v1104_v16  ;;  %406 = vst [vmem:[#allocation2 + $0x38] sm:$0xff] (!%p919_p10), %v1104_v16 }
  0x2d   : > { %407 = vst [vmem:[#allocation2 + $0x40] sm:$0xff] (!%p919_p10), %v1104_v16  ;;  %408 = vst [vmem:[#allocation2 + $0x48] sm:$0xff] (!%p919_p10), %v1104_v16 }
  0x2e   : > { %409 = vst [vmem:[#allocation2 + $0x50] sm:$0xff] %v1104_v16  ;;  %410 = vst [vmem:[#allocation2 + $0x58] sm:$0xff] %v1104_v16 }
  0x2f   : > { %411 = vst [vmem:[#allocation2 + $0x60] sm:$0xff] %v1104_v16  ;;  %412 = vst [vmem:[#allocation2 + $0x68] sm:$0xff] %v1104_v16 }
  0x30   : > { %413 = vst [vmem:[#allocation2 + $0x70] sm:$0xff] %v1104_v16  ;;  %414 = vst [vmem:[#allocation2 + $0x78] sm:$0xff] %v1104_v16 }
  0x31 PF: > { %v1048_v17 = vld [vmem:[%s1198_s11] sm:$0xff]   ;;  %v1049_v18 = vld [vmem:[%s1198_s11 + $0x8] sm:$0xff]   ;;  %v1050_v19 = vld [vmem:[%s1198_s11 + $0x10] sm:$0xff]   ;;  %p936_p11 = scmp.ne.s32.totalorder %s1094_s17, 8 }
  0x32   : > { %959 = vmatprep.subr.bf16.mxu0 %v1048_v17  ;;  %991 = vmatprep.subr.bf16.mxu1 %v1048_v17  ;;  %v1051_v20 = vld [vmem:[%s1198_s11 + $0x18] sm:$0xff]   ;;  %v1056_v21 = vld [vmem:[%s1200_s12] sm:$0xff]   ;;  %v1053_v24 = vld [vmem:[%s1198_s11 + $0x28] sm:$0xff]  }
  0x33   : > { %960 = vmatpush3.bf16.msra.mxu0 %v1048_v17  ;;  %999 = vmatpush3.bf16.msra.mxu1 %v1048_v17  ;;  %v1057_v22 = vld [vmem:[%s1200_s12 + $0x20] sm:$0xff]   ;;  %v1054_v25 = vld [vmem:[%s1198_s11 + $0x30] sm:$0xff]   ;;  %v1055_v26 = vld [vmem:[%s1198_s11 + $0x38] sm:$0xff]  }
  0x34   : > { %961 = vmatprep.subr.bf16.mxu0 %v1049_v18  ;;  %992 = vmatprep.subr.bf16.mxu1 %v1049_v18  ;;  %v1052_v23 = vld [vmem:[%s1198_s11 + $0x20] sm:$0xff]   ;;  %v1058_v27 = vld [vmem:[%s1200_s12 + $0x8] sm:$0xff]   ;;  %v1060_v29 = vld [vmem:[%s1200_s12 + $0x10] sm:$0xff]  }
  0x35   : > { %975 = vmatprep.mubr.bf16.mxu0 %v1056_v21  ;;  %983 = vmatprep.mubr.bf16.mxu1 %v1057_v22  ;;  %v1059_v28 = vld [vmem:[%s1200_s12 + $0x28] sm:$0xff]   ;;  %v1061_v30 = vld [vmem:[%s1200_s12 + $0x30] sm:$0xff]   ;;  %v1062_v31 = vld [vmem:[%s1200_s12 + $0x18] sm:$0xff]  }
  0x36   : > { %v1063_v32 = vld [vmem:[%s1200_s12 + $0x38] sm:$0xff]   ;;  %v417_v33 = vld [vmem:[#allocation2 + $0x10] sm:$0xff]  ;;  %v415_v35 = vld [vmem:[#allocation2] sm:$0xff] }
  0x37   : > { %962 = vmatpush3.bf16.msra.mxu0 %v1049_v18  ;;  %1000 = vmatpush3.bf16.msra.mxu1 %v1049_v18  ;;  %v425_v34 = vld [vmem:[#allocation2 + $0x50] sm:$0xff]  ;;  %v423_v36 = vld [vmem:[#allocation2 + $0x40] sm:$0xff]  ;;  %v418_v39 = vld [vmem:[#allocation2 + $0x18] sm:$0xff] }
  0x38   : > { %963 = vmatprep.subr.bf16.mxu0 %v1050_v19  ;;  %993 = vmatprep.subr.bf16.mxu1 %v1050_v19  ;;  %v426_v40 = vld [vmem:[#allocation2 + $0x58] sm:$0xff]  ;;  %v416_v45 = vld [vmem:[#allocation2 + $0x8] sm:$0xff]  ;;  %v421_v57 = vld [vmem:[#allocation2 + $0x30] sm:$0xff] }
  0x39   : > { %v424_v46 = vld [vmem:[#allocation2 + $0x48] sm:$0xff]  ;;  %v429_v58 = vld [vmem:[#allocation2 + $0x70] sm:$0xff]  ;;  %v419_v59 = vld [vmem:[#allocation2 + $0x20] sm:$0xff] }
  0x3a   : > { %v427_v60 = vld [vmem:[#allocation2 + $0x60] sm:$0xff]  ;;  %v422_v63 = vld [vmem:[#allocation2 + $0x38] sm:$0xff]  ;;  %v420_v5 = vld [vmem:[#allocation2 + $0x28] sm:$0xff] }
  0x3b   : > { %964 = vmatpush3.bf16.msra.mxu0 %v1050_v19  ;;  %1001 = vmatpush3.bf16.msra.mxu1 %v1050_v19  ;;  %v430_v0 = vld [vmem:[#allocation2 + $0x78] sm:$0xff]  ;;  %v428_v6 = vld [vmem:[#allocation2 + $0x68] sm:$0xff]  ;;  %v937_v18 = vld [vmem:[%s1309_s2] ss:$0 sm:$0xff] (!%p936_p11) }
  0x3c   : > { %965 = vmatprep.subr.bf16.mxu0 %v1051_v20  ;;  %994 = vmatprep.subr.bf16.mxu1 %v1051_v20  ;;  %v1226_v19 = vld [vmem:[%s1310_s3] ss:$0 sm:$0xff] (!%p936_p11) }
  0x3f   : > { %966 = vmatpush3.bf16.msra.mxu0 %v1051_v20  ;;  %1002 = vmatpush3.bf16.msra.mxu1 %v1051_v20 }
  0x40   : > { %967 = vmatprep.subr.bf16.mxu0 %v1052_v23  ;;  %995 = vmatprep.subr.bf16.mxu1 %v1052_v23 }
  0x43   : > { %968 = vmatpush3.bf16.msra.mxu0 %v1052_v23  ;;  %1003 = vmatpush3.bf16.msra.mxu1 %v1052_v23 }
  0x44   : > { %969 = vmatprep.subr.bf16.mxu0 %v1053_v24  ;;  %996 = vmatprep.subr.bf16.mxu1 %v1053_v24 }
  0x47   : > { %970 = vmatpush3.bf16.msra.mxu0 %v1053_v24  ;;  %1004 = vmatpush3.bf16.msra.mxu1 %v1053_v24 }
  0x48   : > { %971 = vmatprep.subr.bf16.mxu0 %v1054_v25  ;;  %997 = vmatprep.subr.bf16.mxu1 %v1054_v25 }
  0x4b   : > { %972 = vmatpush3.bf16.msra.mxu0 %v1054_v25  ;;  %1005 = vmatpush3.bf16.msra.mxu1 %v1054_v25 }
  0x4c   : > { %973 = vmatprep.subr.bf16.mxu0 %v1055_v26  ;;  %998 = vmatprep.subr.bf16.mxu1 %v1055_v26 }
  0x4f   : > { %974 = vmatpush3.bf16.msra.mxu0 %v1055_v26  ;;  %1006 = vmatpush3.bf16.msra.mxu1 %v1055_v26 }
  0x52   : > { %976 = vmatmul.mubr.bf16.vlgmr.msra.gmra.mrb[0].mxu0 %v1058_v27  ;;  %984 = vmatmul.mubr.bf16.vlgmr.msra.gmra.mrb[0].mxu1 %v1059_v28 }
  0x53   : > { %979 = vmatprep.mubr.bf16.mxu0 %v1060_v29  ;;  %987 = vmatprep.mubr.bf16.mxu1 %v1061_v30 }
  0x5a   : > { %980 = vmatmul.mubr.bf16.gmra.mrb[4].mxu0 %v1062_v31  ;;  %988 = vmatmul.mubr.bf16.gmra.mrb[4].mxu1 %v1063_v32 }
 0x125   : > { %v977_v37 = vpop.f32.mrb[0].mxu0  ;;  %v985_v38 = vpop.f32.mrb[0].mxu1 }
 0x126   : > { %v658_v41 = vadd.f32 %v977_v37, %v417_v33  ;;  %v666_v42 = vadd.f32 %v985_v38, %v425_v34  ;;  %v593_v43 = vpop.f32.mrb[1].mxu0  ;;  %v625_v44 = vpop.f32.mrb[1].mxu1 }
 0x127   : > { %v656_v47 = vadd.f32 %v593_v43, %v415_v35  ;;  %v664_v48 = vadd.f32 %v625_v44, %v423_v36  ;;  %v978_v49 = vpop.f32.mrb[2].mxu0  ;;  %v986_v50 = vpop.f32.mrb[2].mxu1 }
 0x128   : > { %674 = vst [vmem:[#allocation2 + $0x10] sm:$0xff] %v658_v41  ;;  %682 = vst [vmem:[#allocation2 + $0x50] sm:$0xff] %v666_v42  ;;  %v659_v51 = vadd.f32 %v978_v49, %v418_v39  ;;  %v667_v52 = vadd.f32 %v986_v50, %v426_v40  ;;  %v596_v53 = vpop.f32.mrb[3].mxu0  ;;  %v628_v54 = vpop.f32.mrb[3].mxu1 }
 0x129   : > { %672 = vst [vmem:[#allocation2] sm:$0xff] %v656_v47  ;;  %680 = vst [vmem:[#allocation2 + $0x40] sm:$0xff] %v664_v48  ;;  %v657_v55 = vadd.f32 %v596_v53, %v416_v45  ;;  %v665_v56 = vadd.f32 %v628_v54, %v424_v46 }
 0x12a   : > { %675 = vst [vmem:[#allocation2 + $0x18] sm:$0xff] %v659_v51  ;;  %683 = vst [vmem:[#allocation2 + $0x58] sm:$0xff] %v667_v52 }
 0x12b   : > { %673 = vst [vmem:[#allocation2 + $0x8] sm:$0xff] %v657_v55  ;;  %681 = vst [vmem:[#allocation2 + $0x48] sm:$0xff] %v665_v56 }
 0x12d   : > { %v981_v61 = vpop.f32.mrb[4].mxu0  ;;  %v989_v62 = vpop.f32.mrb[4].mxu1  ;;  %691 = sbr.rel (%p936_p11) target bundleno = 323 (0x143), region = 85 }
 0x12e   : > { %v662_v1 = vadd.f32 %v981_v61, %v421_v57  ;;  %v670_v2 = vadd.f32 %v989_v62, %v429_v58  ;;  %v609_v3 = vpop.f32.mrb[5].mxu0  ;;  %v641_v4 = vpop.f32.mrb[5].mxu1 }
 0x12f   : > { %v660_v7 = vadd.f32 %v609_v3, %v419_v59  ;;  %v668_v8 = vadd.f32 %v641_v4, %v427_v60  ;;  %v982_v9 = vpop.f32.mrb[6].mxu0  ;;  %v990_v10 = vpop.f32.mrb[6].mxu1  ;;  %v694_v22 = vld [vmem:[#allocation2 + $0x10] sm:$0xff] (!%p936_p11) }
 0x130   : > { %678 = vst [vmem:[#allocation2 + $0x30] sm:$0xff] %v662_v1  ;;  %686 = vst [vmem:[#allocation2 + $0x70] sm:$0xff] %v670_v2  ;;  %v663_v11 = vadd.f32 %v982_v9, %v422_v63  ;;  %v671_v12 = vadd.f32 %v990_v10, %v430_v0  ;;  %v612_v13 = vpop.f32.mrb[7].mxu0  ;;  %v644_v14 = vpop.f32.mrb[7].mxu1  ;;  %v692_v17 = vld [vmem:[#allocation2] sm:$0xff] (!%p936_p11)  ;;  %v717_v25 = vmul.f32 (!%p936_p11), %v937_v18, %v694_v22  ;;  %v702_v45 = vld [vmem:[#allocation2 + $0x50] sm:$0xff] (!%p936_p11) }
 0x131   : > { %676 = vst [vmem:[#allocation2 + $0x20] sm:$0xff] %v660_v7  ;;  %684 = vst [vmem:[#allocation2 + $0x60] sm:$0xff] %v668_v8  ;;  %v661_v15 = vadd.f32 %v612_v13, %v420_v5  ;;  %v669_v16 = vadd.f32 %v644_v14, %v428_v6  ;;  %v715_v20 = vmul.f32 (!%p936_p11), %v937_v18, %v692_v17  ;;  %v695_v23 = vld [vmem:[#allocation2 + $0x18] sm:$0xff] (!%p936_p11)  ;;  %v700_v39 = vld [vmem:[#allocation2 + $0x40] sm:$0xff] (!%p936_p11) }
 0x132   : > { %679 = vst [vmem:[#allocation2 + $0x38] sm:$0xff] %v663_v11  ;;  %687 = vst [vmem:[#allocation2 + $0x78] sm:$0xff] %v671_v12  ;;  %v693_v21 = vld [vmem:[#allocation2 + $0x8] sm:$0xff] (!%p936_p11)  ;;  %v718_v26 = vmul.f32 (!%p936_p11), %v937_v18, %v695_v23  ;;  %v740_v36 = vadd.f32 (!%p936_p11), %v1226_v19, %v717_v25  ;;  %v703_v46 = vld [vmem:[#allocation2 + $0x58] sm:$0xff] (!%p936_p11)  ;;  %v723_v57 = vmul.f32 (!%p936_p11), %v937_v18, %v700_v39 }
 0x133   : > { %677 = vst [vmem:[#allocation2 + $0x28] sm:$0xff] %v661_v15  ;;  %685 = vst [vmem:[#allocation2 + $0x68] sm:$0xff] %v669_v16  ;;  %v716_v24 = vmul.f32 (!%p936_p11), %v937_v18, %v693_v21  ;;  %v738_v30 = vadd.f32 (!%p936_p11), %v1226_v19, %v715_v20  ;;  %v701_v44 = vld [vmem:[#allocation2 + $0x48] sm:$0xff] (!%p936_p11)  ;;  %v725_v61 = vmul.f32 (!%p936_p11), %v937_v18, %v702_v45 }
 0x134   : > { %v741_v37 = vadd.f32 %v1226_v19, %v718_v26  ;;  %v756_v48 = vmax.f32 %v740_v36, 0.0  ;;  %v724_v60 = vmul.f32 %v937_v18, %v701_v44  ;;  %v726_v62 = vmul.f32 %v937_v18, %v703_v46 }
 0x135   : > { %v739_v35 = vadd.f32 %v1226_v19, %v716_v24  ;;  %v754_v40 = vmax.f32 %v738_v30, 0.0  ;;  %v746_v63 = vadd.f32 %v1226_v19, %v723_v57  ;;  %v748_v4 = vadd.f32 %v1226_v19, %v725_v61 }
 0x136   : > { %v757_v49 = vmax.f32 %v741_v37, 0.0  ;;  %772 = vst [vmem:[%s1311_s4 + $0x10] sm:$0xff] %v756_v48  ;;  %v747_v3 = vadd.f32 %v1226_v19, %v724_v60  ;;  %v749_v5 = vadd.f32 %v1226_v19, %v726_v62 }
 0x137   : > { %v698_v29 = vld [vmem:[#allocation2 + $0x30] sm:$0xff]  ;;  %v755_v47 = vmax.f32 %v739_v35, 0.0  ;;  %770 = vst [vmem:[%s1311_s4] sm:$0xff] %v754_v40  ;;  %v762_v7 = vmax.f32 %v746_v63, 0.0  ;;  %v764_v12 = vmax.f32 %v748_v4, 0.0 }
 0x138   : > { %v696_v27 = vld [vmem:[#allocation2 + $0x20] sm:$0xff]  ;;  %v721_v33 = vmul.f32 %v937_v18, %v698_v29  ;;  %v706_v53 = vld [vmem:[#allocation2 + $0x70] sm:$0xff]  ;;  %773 = vst [vmem:[%s1311_s4 + $0x18] sm:$0xff] %v757_v49  ;;  %v763_v11 = vmax.f32 %v747_v3, 0.0  ;;  %v765_v13 = vmax.f32 %v749_v5, 0.0 }
 0x139   : > { %v719_v31 = vmul.f32 %v937_v18, %v696_v27  ;;  %v699_v34 = vld [vmem:[#allocation2 + $0x38] sm:$0xff]  ;;  %v704_v51 = vld [vmem:[#allocation2 + $0x60] sm:$0xff]  ;;  %771 = vst [vmem:[%s1311_s4 + $0x8] sm:$0xff] %v755_v47  ;;  %v729_v2 = vmul.f32 %v937_v18, %v706_v53  ;;  %778 = vst [vmem:[%s1311_s4 + $0x40] sm:$0xff] %v762_v7 }
 0x13a   : > { %v697_v28 = vld [vmem:[#allocation2 + $0x28] sm:$0xff]  ;;  %v722_v38 = vmul.f32 %v937_v18, %v699_v34  ;;  %v744_v43 = vadd.f32 %v1226_v19, %v721_v33  ;;  %v707_v58 = vld [vmem:[#allocation2 + $0x78] sm:$0xff]  ;;  %v727_v0 = vmul.f32 %v937_v18, %v704_v51  ;;  %779 = vst [vmem:[%s1311_s4 + $0x48] sm:$0xff] %v763_v11  ;;  %780 = vst [vmem:[%s1311_s4 + $0x50] sm:$0xff] %v764_v12 }
 0x13b   : > { %v720_v32 = vmul.f32 %v937_v18, %v697_v28  ;;  %v742_v41 = vadd.f32 %v1226_v19, %v719_v31  ;;  %v705_v52 = vld [vmem:[#allocation2 + $0x68] sm:$0xff]  ;;  %v730_v6 = vmul.f32 %v937_v18, %v707_v58  ;;  %v752_v10 = vadd.f32 %v1226_v19, %v729_v2  ;;  %781 = vst [vmem:[%s1311_s4 + $0x58] sm:$0xff] %v765_v13 }
 0x13c   : > { %v745_v50 = vadd.f32 %v1226_v19, %v722_v38  ;;  %v760_v56 = vmax.f32 %v744_v43, 0.0  ;;  %v728_v1 = vmul.f32 %v937_v18, %v705_v52  ;;  %v750_v8 = vadd.f32 %v1226_v19, %v727_v0 }
 0x13d   : > { %v743_v42 = vadd.f32 %v1226_v19, %v720_v32  ;;  %v758_v54 = vmax.f32 %v742_v41, 0.0  ;;  %v753_v14 = vadd.f32 %v1226_v19, %v730_v6  ;;  %v768_v17 = vmax.f32 %v752_v10, 0.0 }
 0x13e   : > { %v761_v59 = vmax.f32 %v745_v50, 0.0  ;;  %776 = vst [vmem:[%s1311_s4 + $0x30] sm:$0xff] %v760_v56  ;;  %v751_v9 = vadd.f32 %v1226_v19, %v728_v1  ;;  %v766_v15 = vmax.f32 %v750_v8, 0.0 }
 0x13f   : > { %v759_v55 = vmax.f32 %v743_v42, 0.0  ;;  %774 = vst [vmem:[%s1311_s4 + $0x20] sm:$0xff] %v758_v54  ;;  %v769_v18 = vmax.f32 %v753_v14, 0.0  ;;  %784 = vst [vmem:[%s1311_s4 + $0x70] sm:$0xff] %v768_v17 }
 0x140   : > { %777 = vst [vmem:[%s1311_s4 + $0x38] sm:$0xff] %v761_v59  ;;  %v767_v16 = vmax.f32 %v751_v9, 0.0  ;;  %782 = vst [vmem:[%s1311_s4 + $0x60] sm:$0xff] %v766_v15 }
 0x141   : > { %775 = vst [vmem:[%s1311_s4 + $0x28] sm:$0xff] %v759_v55  ;;  %785 = vst [vmem:[%s1311_s4 + $0x78] sm:$0xff] %v769_v18 }
 0x142   : > { %783 = vst [vmem:[%s1311_s4 + $0x68] sm:$0xff] %v767_v16 }
 0x143 PF: > { %s14_s19 = sadd.s32 1, %s1102_s19   ;;  %s1312_s15 = smov %s1090_s16 }
 0x144   : > { %p11_p12 = scmp.ge.s32.totalorder %s14_s19, 11   ;;  %s1313_s16 = smov %s1165_s23 }
 0x145   : > { %s1314_s17 = smov %s1098_s18  ;;  %s1315_s18 = smov %s1317_s20 }
 0x146   :  { %13 = sbr.rel (!%p11_p12) target bundleno = 3 (0x3), region = 129 }

// kernel: resnet_forward.15
= control target key start
LH: loop header
LB: loop body
LE: loop exit
PB: predicated region body
PF: predicated region fallthrough
CT: control target
= control target key end

     0   :  { %s1246_s18 = smov 0   ;;  %s1248_s19 = smov 0   ;;  %s1489_s0 = inlined_call_operand.vmem [shape: bf16[128,1152], index: 0, kind: input, shape index: {}]   ;;  %s1490_s1 = inlined_call_operand.vmem [shape: bf16[1152,128], index: 1, kind: input, shape index: {}]   ;;  %s1491_s2 = inlined_call_operand.vmem [shape: f32[1,128], index: 2, kind: input, shape index: {}]   ;;  %s1492_s3 = inlined_call_operand.vmem [shape: f32[1,128], index: 3, kind: input, shape index: {}]   ;;  %s1493_s4 = inlined_call_operand.vmem [shape: f32[128,128], index: 4, kind: input, shape index: {}]   ;;  %s1494_s5 = inlined_call_operand.vmem [shape: f32[128,128], index: 5, kind: output, shape index: {}]  }
   0x1   :  { %s1250_s20 = smov 0   ;;  %s1252_s21 = smov 0  }
   0x2   :  { %s1254_s22 = smov 0  }
   0x3 LB: > { %s27_s23 = sadd.s32 1, %s1209_s21  ;;  %p50_p1 = scmp.ne.s32.totalorder %s1201_s19, %s1197_s18  ;;  %s1213_s22 = sphi %s1254_s22, %s15_s22   ;;  %s1209_s21 = sphi %s1252_s21, %s1498_s21   ;;  %s1205_s20 = sphi %s1250_s20, %s1497_s20   ;;  %s1201_s19 = sphi %s1248_s19, %s1496_s19   ;;  %s1197_s18 = sphi %s1246_s18, %s1495_s18  }
   0x4   : > { %p28_p0 = scmp.ge.s32.totalorder %s27_s23, 9  ;;  %p51_p2 = scmp.eq.s32.totalorder %s1213_s22, 0 }
   0x5   : > { %s43_s25 = sadd.s32 1, %s1201_s19  ;;  %p1023_p5 = scmp.ge.s32.totalorder %s1213_s22, 9 }
   0x6   : > { %s1500_s23 = smov (%p28_p0, %s27_s23), 0  ;;  %p52_p3 = por %p51_p2, %p50_p1 }
   0x7   : > { %s39_s24 = ssub.s32 %s1209_s21, %s1500_s23  ;;  %236 = sbr.rel (%p1023_p5) target bundleno = 28 (0x1c), region = 28 }
   0x8   : > { %p41_p4 = scmp.eq.s32.totalorder %s39_s24, 0 }
   0xa   : > { %s1281_s26 = scalar_select %p41_p4, %s1201_s19, %s43_s25  }
   0xe   : > { %239 = sbr.rel (!%p52_p3) target bundleno = 28 (0x1c), region = 32  ;;  %s241_s27 = sand.u32 (%p52_p3), 1, %s1201_s19  }
   0xf   : > { %s1025_s28 = sshll.u32 (%p52_p3), %s1209_s21, 2  ;;  %s1024_s29 = sshll.u32 (%p52_p3), %s241_s27, 6 }
  0x10   : > { %s1289_s7 = scalar_lea.vmem (%p52_p3), %s1489_s0, %s1025_s28  ;;  %s243_s8 = scalar_lea.vmem (%p52_p3), [#allocation3], %s1024_s29 }
  0x11   : > { %v264_v0 = vld [vmem:[%s1289_s7] sm:$0xf] (%p52_p3)  ;;  %v266_v1 = vld [vmem:[%s1289_s7 + $0x24] sm:$0xf] (%p52_p3)  ;;  %v268_v2 = vld [vmem:[%s1289_s7 + $0x48] sm:$0xf] (%p52_p3) }
  0x12   : > { %265 = vst [vmem:[%s243_s8] sm:$0xf] (%p52_p3), %v264_v0  ;;  %267 = vst [vmem:[%s243_s8 + $0x4] sm:$0xf] (%p52_p3), %v266_v1  ;;  %v270_v3 = vld [vmem:[%s1289_s7 + $0x6c] sm:$0xf] (%p52_p3) }
  0x13   : > { %v272_v4 = vld [vmem:[%s1289_s7 + $0x90] sm:$0xf] (%p52_p3)  ;;  %269 = vst [vmem:[%s243_s8 + $0x8] sm:$0xf] (%p52_p3), %v268_v2  ;;  %271 = vst [vmem:[%s243_s8 + $0xc] sm:$0xf] (%p52_p3), %v270_v3 }
  0x14   : > { %273 = vst [vmem:[%s243_s8 + $0x10] sm:$0xf] (%p52_p3), %v272_v4  ;;  %v274_v5 = vld [vmem:[%s1289_s7 + $0xb4] sm:$0xf] (%p52_p3)  ;;  %v276_v6 = vld [vmem:[%s1289_s7 + $0xd8] sm:$0xf] (%p52_p3) }
  0x15   : > { %v278_v7 = vld [vmem:[%s1289_s7 + $0xfc] sm:$0xf]  ;;  %275 = vst [vmem:[%s243_s8 + $0x14] sm:$0xf] %v274_v5  ;;  %277 = vst [vmem:[%s243_s8 + $0x18] sm:$0xf] %v276_v6 }
  0x16   : > { %279 = vst [vmem:[%s243_s8 + $0x1c] sm:$0xf] %v278_v7  ;;  %v280_v8 = vld [vmem:[%s1289_s7 + $0x120] sm:$0xf]  ;;  %v282_v9 = vld [vmem:[%s1289_s7 + $0x144] sm:$0xf] }
  0x17   : > { %v284_v10 = vld [vmem:[%s1289_s7 + $0x168] sm:$0xf]  ;;  %281 = vst [vmem:[%s243_s8 + $0x20] sm:$0xf] %v280_v8  ;;  %283 = vst [vmem:[%s243_s8 + $0x24] sm:$0xf] %v282_v9 }
  0x18   : > { %285 = vst [vmem:[%s243_s8 + $0x28] sm:$0xf] %v284_v10  ;;  %v286_v11 = vld [vmem:[%s1289_s7 + $0x18c] sm:$0xf]  ;;  %v288_v12 = vld [vmem:[%s1289_s7 + $0x1b0] sm:$0xf] }
  0x19   : > { %v290_v13 = vld [vmem:[%s1289_s7 + $0x1d4] sm:$0xf]  ;;  %287 = vst [vmem:[%s243_s8 + $0x2c] sm:$0xf] %v286_v11  ;;  %289 = vst [vmem:[%s243_s8 + $0x30] sm:$0xf] %v288_v12 }
  0x1a   : > { %291 = vst [vmem:[%s243_s8 + $0x34] sm:$0xf] %v290_v13  ;;  %v292_v14 = vld [vmem:[%s1289_s7 + $0x1f8] sm:$0xf]  ;;  %v294_v15 = vld [vmem:[%s1289_s7 + $0x21c] sm:$0xf] }
  0x1b   : > { %293 = vst [vmem:[%s243_s8 + $0x38] sm:$0xf] %v292_v14  ;;  %295 = vst [vmem:[%s243_s8 + $0x3c] sm:$0xf] %v294_v15 }
  0x1c PF: > { %p1026_p6 = scmp.ge.s32.totalorder %s1213_s22, 1  ;;  %p361_p7 = scmp.lt.s32.totalorder %s1213_s22, 10 }
  0x1e   : > { %p362_p8 = pnand %p1026_p6, %p361_p7 }
  0x1f   : > { %s368_s9 = sand.u32 (!%p362_p8), 1, %s1197_s18   ;;  %s1028_s10 = sshll.u32 (!%p362_p8), %s1205_s20, 4 }
  0x20   : > { %365 = sbr.rel (%p362_p8) target bundleno = 326 (0x146), region = 77  ;;  %s1027_s11 = sshll.u32 (!%p362_p8), %s368_s9, 6 }
  0x21   : > { %p422_p9 = scmp.lt.s32.totalorder (!%p362_p8), %s1028_s10, 143  ;;  %s1316_s16 = scalar_lea.vmem (!%p362_p8), [#allocation3], %s1027_s11 }
  0x22   : > { %p1030_p10 = scmp.ne.s32.totalorder (!%p362_p8), %s1205_s20, 0 }
  0x27   : > { %s1502_s10 = smov (!%p422_p9, %s1028_s10), 143  ;;  %458 = sbr.rel (%p1030_p10) target bundleno = 49 (0x31), region = 85 }
  0x28   : > { %s1029_s12 = sshll.u32 %s1502_s10, 2  ;;  %v1215_v16 = vmov (!%p1030_p10), 0.0  }
  0x29   : > { %s1314_s15 = scalar_lea.vmem %s1490_s1, %s1029_s12  ;;  %459 = vst [vmem:[#allocation2] sm:$0xff] (!%p1030_p10), %v1215_v16  ;;  %460 = vst [vmem:[#allocation2 + $0x8] sm:$0xff] (!%p1030_p10), %v1215_v16 }
  0x2a   : > { %461 = vst [vmem:[#allocation2 + $0x10] sm:$0xff] (!%p1030_p10), %v1215_v16  ;;  %462 = vst [vmem:[#allocation2 + $0x18] sm:$0xff] (!%p1030_p10), %v1215_v16 }
  0x2b   : > { %463 = vst [vmem:[#allocation2 + $0x20] sm:$0xff] (!%p1030_p10), %v1215_v16  ;;  %464 = vst [vmem:[#allocation2 + $0x28] sm:$0xff] (!%p1030_p10), %v1215_v16 }
  0x2c   : > { %465 = vst [vmem:[#allocation2 + $0x30] sm:$0xff] (!%p1030_p10), %v1215_v16  ;;  %466 = vst [vmem:[#allocation2 + $0x38] sm:$0xff] (!%p1030_p10), %v1215_v16 }
  0x2d   : > { %467 = vst [vmem:[#allocation2 + $0x40] sm:$0xff] (!%p1030_p10), %v1215_v16  ;;  %468 = vst [vmem:[#allocation2 + $0x48] sm:$0xff] (!%p1030_p10), %v1215_v16 }
  0x2e   : > { %469 = vst [vmem:[#allocation2 + $0x50] sm:$0xff] %v1215_v16  ;;  %470 = vst [vmem:[#allocation2 + $0x58] sm:$0xff] %v1215_v16 }
  0x2f   : > { %471 = vst [vmem:[#allocation2 + $0x60] sm:$0xff] %v1215_v16  ;;  %472 = vst [vmem:[#allocation2 + $0x68] sm:$0xff] %v1215_v16 }
  0x30   : > { %473 = vst [vmem:[#allocation2 + $0x70] sm:$0xff] %v1215_v16  ;;  %474 = vst [vmem:[#allocation2 + $0x78] sm:$0xff] %v1215_v16 }
  0x31 PF: > { %v1159_v17 = vld [vmem:[%s1314_s15] sm:$0xff]   ;;  %v1160_v18 = vld [vmem:[%s1314_s15 + $0x8] sm:$0xff]   ;;  %v1161_v19 = vld [vmem:[%s1314_s15 + $0x10] sm:$0xff]   ;;  %p1047_p11 = scmp.ne.s32.totalorder %s1205_s20, 8 }
  0x32   : > { %1070 = vmatprep.subr.bf16.mxu0 %v1159_v17  ;;  %1102 = vmatprep.subr.bf16.mxu1 %v1159_v17  ;;  %v1162_v20 = vld [vmem:[%s1314_s15 + $0x18] sm:$0xff]   ;;  %v1167_v21 = vld [vmem:[%s1316_s16] sm:$0xff]   ;;  %v1164_v24 = vld [vmem:[%s1314_s15 + $0x28] sm:$0xff]  }
  0x33   : > { %1071 = vmatpush3.bf16.msra.mxu0 %v1159_v17  ;;  %1110 = vmatpush3.bf16.msra.mxu1 %v1159_v17  ;;  %v1168_v22 = vld [vmem:[%s1316_s16 + $0x20] sm:$0xff]   ;;  %v1165_v25 = vld [vmem:[%s1314_s15 + $0x30] sm:$0xff]   ;;  %v1166_v26 = vld [vmem:[%s1314_s15 + $0x38] sm:$0xff]  }
  0x34   : > { %1072 = vmatprep.subr.bf16.mxu0 %v1160_v18  ;;  %1103 = vmatprep.subr.bf16.mxu1 %v1160_v18  ;;  %v1163_v23 = vld [vmem:[%s1314_s15 + $0x20] sm:$0xff]   ;;  %v1169_v27 = vld [vmem:[%s1316_s16 + $0x8] sm:$0xff]   ;;  %v1171_v29 = vld [vmem:[%s1316_s16 + $0x10] sm:$0xff]  }
  0x35   : > { %1086 = vmatprep.mubr.bf16.mxu0 %v1167_v21  ;;  %1094 = vmatprep.mubr.bf16.mxu1 %v1168_v22  ;;  %v1170_v28 = vld [vmem:[%s1316_s16 + $0x28] sm:$0xff]   ;;  %v1172_v30 = vld [vmem:[%s1316_s16 + $0x30] sm:$0xff]   ;;  %v1173_v31 = vld [vmem:[%s1316_s16 + $0x18] sm:$0xff]  }
  0x36   : > { %v1174_v32 = vld [vmem:[%s1316_s16 + $0x38] sm:$0xff]   ;;  %v477_v33 = vld [vmem:[#allocation2 + $0x10] sm:$0xff]  ;;  %v475_v35 = vld [vmem:[#allocation2] sm:$0xff] }
  0x37   : > { %1073 = vmatpush3.bf16.msra.mxu0 %v1160_v18  ;;  %1111 = vmatpush3.bf16.msra.mxu1 %v1160_v18  ;;  %v485_v34 = vld [vmem:[#allocation2 + $0x50] sm:$0xff]  ;;  %v483_v36 = vld [vmem:[#allocation2 + $0x40] sm:$0xff]  ;;  %v478_v39 = vld [vmem:[#allocation2 + $0x18] sm:$0xff] }
  0x38   : > { %1074 = vmatprep.subr.bf16.mxu0 %v1161_v19  ;;  %1104 = vmatprep.subr.bf16.mxu1 %v1161_v19  ;;  %v486_v40 = vld [vmem:[#allocation2 + $0x58] sm:$0xff]  ;;  %v476_v45 = vld [vmem:[#allocation2 + $0x8] sm:$0xff]  ;;  %v481_v57 = vld [vmem:[#allocation2 + $0x30] sm:$0xff] }
  0x39   : > { %v484_v46 = vld [vmem:[#allocation2 + $0x48] sm:$0xff]  ;;  %v489_v58 = vld [vmem:[#allocation2 + $0x70] sm:$0xff]  ;;  %v479_v59 = vld [vmem:[#allocation2 + $0x20] sm:$0xff] }
  0x3a   : > { %v487_v60 = vld [vmem:[#allocation2 + $0x60] sm:$0xff]  ;;  %v482_v63 = vld [vmem:[#allocation2 + $0x38] sm:$0xff]  ;;  %v480_v5 = vld [vmem:[#allocation2 + $0x28] sm:$0xff] }
  0x3b   : > { %1075 = vmatpush3.bf16.msra.mxu0 %v1161_v19  ;;  %1112 = vmatpush3.bf16.msra.mxu1 %v1161_v19  ;;  %v490_v0 = vld [vmem:[#allocation2 + $0x78] sm:$0xff]  ;;  %v488_v6 = vld [vmem:[#allocation2 + $0x68] sm:$0xff]  ;;  %v1339_v18 = vld [vmem:[%s1491_s2] ss:$0 sm:$0xff] (!%p1047_p11) }
  0x3c   : > { %1076 = vmatprep.subr.bf16.mxu0 %v1162_v20  ;;  %1105 = vmatprep.subr.bf16.mxu1 %v1162_v20  ;;  %v1344_v19 = vld [vmem:[%s1492_s3] ss:$0 sm:$0xff] (!%p1047_p11) }
  0x3d   : > { %v814_v22 = vld [vmem:[%s1493_s4] sm:$0xff] (!%p1047_p11) }
  0x3f   : > { %1077 = vmatpush3.bf16.msra.mxu0 %v1162_v20  ;;  %1113 = vmatpush3.bf16.msra.mxu1 %v1162_v20 }
  0x40   : > { %1078 = vmatprep.subr.bf16.mxu0 %v1163_v23  ;;  %1106 = vmatprep.subr.bf16.mxu1 %v1163_v23 }
  0x43   : > { %1079 = vmatpush3.bf16.msra.mxu0 %v1163_v23  ;;  %1114 = vmatpush3.bf16.msra.mxu1 %v1163_v23 }
  0x44   : > { %1080 = vmatprep.subr.bf16.mxu0 %v1164_v24  ;;  %1107 = vmatprep.subr.bf16.mxu1 %v1164_v24 }
  0x47   : > { %1081 = vmatpush3.bf16.msra.mxu0 %v1164_v24  ;;  %1115 = vmatpush3.bf16.msra.mxu1 %v1164_v24 }
  0x48   : > { %1082 = vmatprep.subr.bf16.mxu0 %v1165_v25  ;;  %1108 = vmatprep.subr.bf16.mxu1 %v1165_v25 }
  0x4b   : > { %1083 = vmatpush3.bf16.msra.mxu0 %v1165_v25  ;;  %1116 = vmatpush3.bf16.msra.mxu1 %v1165_v25 }
  0x4c   : > { %1084 = vmatprep.subr.bf16.mxu0 %v1166_v26  ;;  %1109 = vmatprep.subr.bf16.mxu1 %v1166_v26 }
  0x4f   : > { %1085 = vmatpush3.bf16.msra.mxu0 %v1166_v26  ;;  %1117 = vmatpush3.bf16.msra.mxu1 %v1166_v26 }
  0x52   : > { %1087 = vmatmul.mubr.bf16.vlgmr.msra.gmra.mrb[0].mxu0 %v1169_v27  ;;  %1095 = vmatmul.mubr.bf16.vlgmr.msra.gmra.mrb[0].mxu1 %v1170_v28  ;;  %v815_v27 = vld [vmem:[%s1493_s4 + $0x8] sm:$0xff] (!%p1047_p11) }
  0x53   : > { %1090 = vmatprep.mubr.bf16.mxu0 %v1171_v29  ;;  %1098 = vmatprep.mubr.bf16.mxu1 %v1172_v30  ;;  %v816_v29 = vld [vmem:[%s1493_s4 + $0x10] sm:$0xff] (!%p1047_p11) }
  0x5a   : > { %1091 = vmatmul.mubr.bf16.gmra.mrb[4].mxu0 %v1173_v31  ;;  %1099 = vmatmul.mubr.bf16.gmra.mrb[4].mxu1 %v1174_v32 }
 0x125   : > { %v1088_v37 = vpop.f32.mrb[0].mxu0  ;;  %v1096_v38 = vpop.f32.mrb[0].mxu1 }
 0x126   : > { %v718_v41 = vadd.f32 %v1088_v37, %v477_v33  ;;  %v726_v42 = vadd.f32 %v1096_v38, %v485_v34  ;;  %v653_v43 = vpop.f32.mrb[1].mxu0  ;;  %v685_v44 = vpop.f32.mrb[1].mxu1  ;;  %v817_v33 = vld [vmem:[%s1493_s4 + $0x18] sm:$0xff] (!%p1047_p11) }
 0x127   : > { %v716_v47 = vadd.f32 %v653_v43, %v475_v35  ;;  %v724_v48 = vadd.f32 %v685_v44, %v483_v36  ;;  %v1089_v49 = vpop.f32.mrb[2].mxu0  ;;  %v1097_v50 = vpop.f32.mrb[2].mxu1 }
 0x128   : > { %734 = vst [vmem:[#allocation2 + $0x10] sm:$0xff] %v718_v41  ;;  %742 = vst [vmem:[#allocation2 + $0x50] sm:$0xff] %v726_v42  ;;  %v719_v51 = vadd.f32 %v1089_v49, %v478_v39  ;;  %v727_v52 = vadd.f32 %v1097_v50, %v486_v40  ;;  %v656_v53 = vpop.f32.mrb[3].mxu0  ;;  %v688_v54 = vpop.f32.mrb[3].mxu1  ;;  %v818_v40 = vld [vmem:[%s1493_s4 + $0x20] sm:$0xff] (!%p1047_p11) }
 0x129   : > { %732 = vst [vmem:[#allocation2] sm:$0xff] %v716_v47  ;;  %740 = vst [vmem:[#allocation2 + $0x40] sm:$0xff] %v724_v48  ;;  %v717_v55 = vadd.f32 %v656_v53, %v476_v45  ;;  %v725_v56 = vadd.f32 %v688_v54, %v484_v46  ;;  %v819_v45 = vld [vmem:[%s1493_s4 + $0x28] sm:$0xff] (!%p1047_p11)  ;;  %v820_v53 = vld [vmem:[%s1493_s4 + $0x30] sm:$0xff] (!%p1047_p11) }
 0x12a   : > { %735 = vst [vmem:[#allocation2 + $0x18] sm:$0xff] %v719_v51  ;;  %743 = vst [vmem:[#allocation2 + $0x58] sm:$0xff] %v727_v52  ;;  %v821_v54 = vld [vmem:[%s1493_s4 + $0x38] sm:$0xff] (!%p1047_p11) }
 0x12b   : > { %733 = vst [vmem:[#allocation2 + $0x8] sm:$0xff] %v717_v55  ;;  %741 = vst [vmem:[#allocation2 + $0x48] sm:$0xff] %v725_v56 }
 0x12d   : > { %v1092_v61 = vpop.f32.mrb[4].mxu0  ;;  %v1100_v62 = vpop.f32.mrb[4].mxu1  ;;  %751 = sbr.rel (%p1047_p11) target bundleno = 326 (0x146), region = 89 }
 0x12e   : > { %v722_v1 = vadd.f32 %v1092_v61, %v481_v57  ;;  %v730_v2 = vadd.f32 %v1100_v62, %v489_v58  ;;  %v669_v3 = vpop.f32.mrb[5].mxu0  ;;  %v701_v4 = vpop.f32.mrb[5].mxu1 }
 0x12f   : > { %v720_v7 = vadd.f32 %v669_v3, %v479_v59  ;;  %v728_v8 = vadd.f32 %v701_v4, %v487_v60  ;;  %v1093_v9 = vpop.f32.mrb[6].mxu0  ;;  %v1101_v10 = vpop.f32.mrb[6].mxu1  ;;  %v754_v24 = vld [vmem:[#allocation2 + $0x10] sm:$0xff] (!%p1047_p11) }
 0x130   : > { %738 = vst [vmem:[#allocation2 + $0x30] sm:$0xff] %v722_v1  ;;  %746 = vst [vmem:[#allocation2 + $0x70] sm:$0xff] %v730_v2  ;;  %v723_v11 = vadd.f32 %v1093_v9, %v482_v63  ;;  %v731_v12 = vadd.f32 %v1101_v10, %v490_v0  ;;  %v672_v13 = vpop.f32.mrb[7].mxu0  ;;  %v704_v14 = vpop.f32.mrb[7].mxu1  ;;  %v752_v17 = vld [vmem:[#allocation2] sm:$0xff] (!%p1047_p11)  ;;  %v777_v28 = vmul.f32 (!%p1047_p11), %v1339_v18, %v754_v24  ;;  %v762_v60 = vld [vmem:[#allocation2 + $0x50] sm:$0xff] (!%p1047_p11) }
 0x131   : > { %736 = vst [vmem:[#allocation2 + $0x20] sm:$0xff] %v720_v7  ;;  %744 = vst [vmem:[#allocation2 + $0x60] sm:$0xff] %v728_v8  ;;  %v721_v15 = vadd.f32 %v672_v13, %v480_v5  ;;  %v729_v16 = vadd.f32 %v704_v14, %v488_v6  ;;  %v775_v20 = vmul.f32 (!%p1047_p11), %v1339_v18, %v752_v17  ;;  %v755_v25 = vld [vmem:[#allocation2 + $0x18] sm:$0xff] (!%p1047_p11)  ;;  %v760_v48 = vld [vmem:[#allocation2 + $0x40] sm:$0xff] (!%p1047_p11) }
 0x132   : > { %739 = vst [vmem:[#allocation2 + $0x38] sm:$0xff] %v723_v11  ;;  %747 = vst [vmem:[#allocation2 + $0x78] sm:$0xff] %v731_v12  ;;  %v753_v21 = vld [vmem:[#allocation2 + $0x8] sm:$0xff] (!%p1047_p11)  ;;  %v778_v30 = vmul.f32 (!%p1047_p11), %v1339_v18, %v755_v25  ;;  %v800_v38 = vadd.f32 (!%p1047_p11), %v1344_v19, %v777_v28  ;;  %v763_v61 = vld [vmem:[#allocation2 + $0x58] sm:$0xff] (!%p1047_p11)  ;;  %v783_v1 = vmul.f32 (!%p1047_p11), %v1339_v18, %v760_v48 }
 0x133   : > { %737 = vst [vmem:[#allocation2 + $0x28] sm:$0xff] %v721_v15  ;;  %745 = vst [vmem:[#allocation2 + $0x68] sm:$0xff] %v729_v16  ;;  %v776_v23 = vmul.f32 (!%p1047_p11), %v1339_v18, %v753_v21  ;;  %v798_v26 = vadd.f32 (!%p1047_p11), %v1344_v19, %v775_v20  ;;  %v761_v55 = vld [vmem:[#allocation2 + $0x48] sm:$0xff] (!%p1047_p11)  ;;  %v822_v6 = vld [vmem:[%s1493_s4 + $0x40] sm:$0xff] (!%p1047_p11)  ;;  %v785_v12 = vmul.f32 (!%p1047_p11), %v1339_v18, %v762_v60 }
 0x134   : > { %v801_v39 = vadd.f32 %v1344_v19, %v778_v30  ;;  %v832_v50 = vadd.f32 %v816_v29, %v800_v38  ;;  %v784_v7 = vmul.f32 %v1339_v18, %v761_v55  ;;  %v806_v10 = vadd.f32 %v1344_v19, %v783_v1  ;;  %v823_v11 = vld [vmem:[%s1493_s4 + $0x48] sm:$0xff]  ;;  %v824_v21 = vld [vmem:[%s1493_s4 + $0x50] sm:$0xff] }
 0x135   : > { %v799_v32 = vadd.f32 %v1344_v19, %v776_v23  ;;  %v830_v37 = vadd.f32 %v814_v22, %v798_v26  ;;  %v786_v13 = vmul.f32 %v1339_v18, %v763_v61  ;;  %v825_v22 = vld [vmem:[%s1493_s4 + $0x58] sm:$0xff]  ;;  %v808_v25 = vadd.f32 %v1344_v19, %v785_v12  ;;  %v828_v38 = vld [vmem:[%s1493_s4 + $0x70] sm:$0xff] }
 0x136   : > { %v833_v51 = vadd.f32 %v817_v33, %v801_v39  ;;  %v848_v62 = vmax.f32 %v832_v50, 0.0  ;;  %v807_v20 = vadd.f32 %v1344_v19, %v784_v7  ;;  %v838_v24 = vadd.f32 %v822_v6, %v806_v10  ;;  %v829_v39 = vld [vmem:[%s1493_s4 + $0x78] sm:$0xff] }
 0x137   : > { %v758_v36 = vld [vmem:[#allocation2 + $0x30] sm:$0xff]  ;;  %v831_v43 = vadd.f32 %v815_v27, %v799_v32  ;;  %v846_v49 = vmax.f32 %v830_v37, 0.0  ;;  %v809_v26 = vadd.f32 %v1344_v19, %v786_v13  ;;  %v826_v27 = vld [vmem:[%s1493_s4 + $0x60] sm:$0xff] }
 0x138   : > { %v756_v31 = vld [vmem:[#allocation2 + $0x20] sm:$0xff]  ;;  %v781_v46 = vmul.f32 %v1339_v18, %v758_v36  ;;  %v849_v63 = vmax.f32 %v833_v51, 0.0  ;;  %864 = vst [vmem:[%s1494_s5 + $0x10] sm:$0xff] %v848_v62  ;;  %v766_v14 = vld [vmem:[#allocation2 + $0x70] sm:$0xff]  ;;  %v839_v29 = vadd.f32 %v823_v11, %v807_v20 }
 0x139   : > { %v779_v34 = vmul.f32 %v1339_v18, %v756_v31  ;;  %v759_v42 = vld [vmem:[#allocation2 + $0x38] sm:$0xff]  ;;  %v847_v56 = vmax.f32 %v831_v43, 0.0  ;;  %862 = vst [vmem:[%s1494_s5] sm:$0xff] %v846_v49  ;;  %v764_v2 = vld [vmem:[#allocation2 + $0x60] sm:$0xff]  ;;  %v827_v31 = vld [vmem:[%s1493_s4 + $0x68] sm:$0xff]  ;;  %v789_v32 = vmul.f32 %v1339_v18, %v766_v14  ;;  %v841_v36 = vadd.f32 %v825_v22, %v809_v26 }
 0x13a   : > { %v757_v35 = vld [vmem:[#allocation2 + $0x28] sm:$0xff]  ;;  %v782_v47 = vmul.f32 %v1339_v18, %v759_v42  ;;  %v804_v58 = vadd.f32 %v1344_v19, %v781_v46  ;;  %865 = vst [vmem:[%s1494_s5 + $0x18] sm:$0xff] %v849_v63  ;;  %v767_v15 = vld [vmem:[#allocation2 + $0x78] sm:$0xff]  ;;  %v787_v23 = vmul.f32 %v1339_v18, %v764_v2 }
 0x13b   : > { %v780_v41 = vmul.f32 %v1339_v18, %v757_v35  ;;  %v802_v44 = vadd.f32 %v1344_v19, %v779_v34  ;;  %863 = vst [vmem:[%s1494_s5 + $0x8] sm:$0xff] %v847_v56  ;;  %v765_v8 = vld [vmem:[#allocation2 + $0x68] sm:$0xff]  ;;  %v790_v33 = vmul.f32 %v1339_v18, %v767_v15  ;;  %v854_v34 = vmax.f32 %v838_v24, 0.0 }
 0x13c   : > { %v805_v59 = vadd.f32 %v1344_v19, %v782_v47  ;;  %v836_v4 = vadd.f32 %v820_v53, %v804_v58  ;;  %v788_v28 = vmul.f32 %v1339_v18, %v765_v8  ;;  %v810_v30 = vadd.f32 %v1344_v19, %v787_v23 }
 0x13d   : > { %v803_v52 = vadd.f32 %v1344_v19, %v780_v41  ;;  %v834_v57 = vadd.f32 %v818_v40, %v802_v44  ;;  %v840_v35 = vadd.f32 %v824_v21, %v808_v25  ;;  %v855_v40 = vmax.f32 %v839_v29, 0.0  ;;  %870 = vst [vmem:[%s1494_s5 + $0x40] sm:$0xff] %v854_v34 }
 0x13e   : > { %v837_v5 = vadd.f32 %v821_v54, %v805_v59  ;;  %v852_v16 = vmax.f32 %v836_v4, 0.0  ;;  %v811_v37 = vadd.f32 %v1344_v19, %v788_v28  ;;  %v842_v41 = vadd.f32 %v826_v27, %v810_v30 }
 0x13f   : > { %v835_v0 = vadd.f32 %v819_v45, %v803_v52  ;;  %v850_v3 = vmax.f32 %v834_v57, 0.0  ;;  %v812_v42 = vadd.f32 %v1344_v19, %v789_v32  ;;  %v813_v43 = vadd.f32 %v1344_v19, %v790_v33  ;;  %871 = vst [vmem:[%s1494_s5 + $0x48] sm:$0xff] %v855_v40 }
 0x140   : > { %v853_v17 = vmax.f32 %v837_v5, 0.0  ;;  %868 = vst [vmem:[%s1494_s5 + $0x30] sm:$0xff] %v852_v16  ;;  %v856_v18 = vmax.f32 %v840_v35, 0.0  ;;  %v857_v44 = vmax.f32 %v841_v36, 0.0  ;;  %v843_v45 = vadd.f32 %v827_v31, %v811_v37 }
 0x141   : > { %v851_v9 = vmax.f32 %v835_v0, 0.0  ;;  %866 = vst [vmem:[%s1494_s5 + $0x20] sm:$0xff] %v850_v3  ;;  %v858_v46 = vmax.f32 %v842_v41, 0.0  ;;  %v844_v47 = vadd.f32 %v828_v38, %v812_v42  ;;  %v845_v48 = vadd.f32 %v829_v39, %v813_v43 }
 0x142   : > { %869 = vst [vmem:[%s1494_s5 + $0x38] sm:$0xff] %v853_v17  ;;  %872 = vst [vmem:[%s1494_s5 + $0x50] sm:$0xff] %v856_v18  ;;  %v859_v19 = vmax.f32 %v843_v45, 0.0 }
 0x143   : > { %867 = vst [vmem:[%s1494_s5 + $0x28] sm:$0xff] %v851_v9  ;;  %873 = vst [vmem:[%s1494_s5 + $0x58] sm:$0xff] %v857_v44  ;;  %v860_v49 = vmax.f32 %v844_v47, 0.0  ;;  %v861_v50 = vmax.f32 %v845_v48, 0.0 }
 0x144   : > { %874 = vst [vmem:[%s1494_s5 + $0x60] sm:$0xff] %v858_v46  ;;  %875 = vst [vmem:[%s1494_s5 + $0x68] sm:$0xff] %v859_v19 }
 0x145   : > { %876 = vst [vmem:[%s1494_s5 + $0x70] sm:$0xff] %v860_v49  ;;  %877 = vst [vmem:[%s1494_s5 + $0x78] sm:$0xff] %v861_v50 }
 0x146 PF: > { %s15_s22 = sadd.s32 1, %s1213_s22   ;;  %s1495_s18 = smov %s1201_s19 }
 0x147   : > { %p12_p12 = scmp.ge.s32.totalorder %s15_s22, 11   ;;  %s1496_s19 = smov %s1281_s26 }
 0x148   : > { %s1497_s20 = smov %s1209_s21  ;;  %s1498_s21 = smov %s1500_s23 }
 0x149   :  { %14 = sbr.rel (!%p12_p12) target bundleno = 3 (0x3), region = 136 }

// kernel: resnet_forward.16
= control target key start
LH: loop header
LB: loop body
LE: loop exit
PB: predicated region body
PF: predicated region fallthrough
CT: control target
= control target key end

     0   :  { %s832_s15 = smov 0   ;;  %s834_s16 = smov 0   ;;  %s934_s0 = inlined_call_operand.vmem [shape: bf16[32,1152], index: 0, kind: input, shape index: {}]   ;;  %s935_s1 = inlined_call_operand.vmem [shape: bf16[1152,128], index: 1, kind: input, shape index: {}]   ;;  %s936_s2 = inlined_call_operand.vmem [shape: f32[1,128], index: 2, kind: input, shape index: {}]   ;;  %s937_s3 = inlined_call_operand.vmem [shape: f32[1,128], index: 3, kind: input, shape index: {}]   ;;  %s938_s4 = inlined_call_operand.vmem [shape: f32[32,128], index: 4, kind: output, shape index: {}]  }
   0x1   :  { %s836_s17 = smov 0   ;;  %s838_s18 = smov 0  }
   0x2   :  { %s840_s19 = smov 0  }
   0x3 LB: > { %s26_s20 = sadd.s32 1, %s800_s18  ;;  %p49_p1 = scmp.ne.s32.totalorder %s792_s16, %s788_s15  ;;  %s804_s19 = sphi %s840_s19, %s14_s19   ;;  %s800_s18 = sphi %s838_s18, %s942_s18   ;;  %s796_s17 = sphi %s836_s17, %s941_s17   ;;  %s792_s16 = sphi %s834_s16, %s940_s16   ;;  %s788_s15 = sphi %s832_s15, %s939_s15  }
   0x4   : > { %p27_p0 = scmp.ge.s32.totalorder %s26_s20, 9  ;;  %p50_p2 = scmp.eq.s32.totalorder %s804_s19, 0 }
   0x5   : > { %s42_s22 = sadd.s32 1, %s792_s16  ;;  %p660_p5 = scmp.ge.s32.totalorder %s804_s19, 9 }
   0x6   : > { %s944_s20 = smov (%p27_p0, %s26_s20), 0  ;;  %p51_p3 = por %p50_p2, %p49_p1 }
   0x7   : > { %s38_s21 = ssub.s32 %s800_s18, %s944_s20  ;;  %195 = sbr.rel (%p660_p5) target bundleno = 21 (0x15), region = 24 }
   0x8   : > { %p40_p4 = scmp.eq.s32.totalorder %s38_s21, 0 }
   0xa   : > { %s867_s23 = scalar_select %p40_p4, %s792_s16, %s42_s22  }
   0xe   : > { %198 = sbr.rel (!%p51_p3) target bundleno = 21 (0x15), region = 28  ;;  %s200_s24 = sand.u32 (%p51_p3), 1, %s792_s16  }
   0xf   : > { %s662_s25 = sshll.u32 (%p51_p3), %s800_s18, 2  ;;  %s661_s26 = sshll.u32 (%p51_p3), %s200_s24, 4 }
  0x10   : > { %s207_s29 = scalar_lea.vmem (%p51_p3), %s934_s0, %s662_s25  ;;  %s202_s30 = scalar_lea.vmem (%p51_p3), [#allocation3], %s661_s26 }
  0x11   : > { %v223_v0 = vld [vmem:[%s207_s29] sm:$0xf] (%p51_p3)  ;;  %v225_v1 = vld [vmem:[%s207_s29 + $0x24] sm:$0xf] (%p51_p3)  ;;  %v227_v2 = vld [vmem:[%s207_s29 + $0x48] sm:$0xf] (%p51_p3) }
  0x12   : > { %224 = vst [vmem:[%s202_s30] sm:$0xf] (%p51_p3), %v223_v0  ;;  %226 = vst [vmem:[%s202_s30 + $0x4] sm:$0xf] (%p51_p3), %v225_v1  ;;  %v229_v3 = vld [vmem:[%s207_s29 + $0x6c] sm:$0xf] (%p51_p3) }
  0x13   : > { %228 = vst [vmem:[%s202_s30 + $0x8] sm:$0xf] (%p51_p3), %v227_v2  ;;  %230 = vst [vmem:[%s202_s30 + $0xc] sm:$0xf] (%p51_p3), %v229_v3 }
  0x15 PF: > { %p663_p6 = scmp.ge.s32.totalorder %s804_s19, 1  ;;  %p272_p7 = scmp.lt.s32.totalorder %s804_s19, 10 }
  0x17   : > { %p273_p8 = pnand %p663_p6, %p272_p7 }
  0x18   : > { %s279_s5 = sand.u32 (!%p273_p8), 1, %s788_s15   ;;  %s665_s6 = sshll.u32 (!%p273_p8), %s796_s17, 4 }
  0x19   : > { %276 = sbr.rel (%p273_p8) target bundleno = 304 (0x130), region = 73  ;;  %s879_s7 = sshll.u32 (!%p273_p8), %s279_s5, 4 }
  0x1a   : > { %p323_p9 = scmp.lt.s32.totalorder (!%p273_p8), %s665_s6, 143  ;;  %s281_s12 = scalar_lea.vmem (!%p273_p8), [#allocation3], %s879_s7 }
  0x1b   : > { %p667_p10 = scmp.ne.s32.totalorder (!%p273_p8), %s796_s17, 0 }
  0x20   : > { %s946_s6 = smov (!%p323_p9, %s665_s6), 143  ;;  %350 = sbr.rel (%p667_p10) target bundleno = 39 (0x27), region = 81 }
  0x21   : > { %s666_s8 = sshll.u32 %s946_s6, 2  ;;  %v806_v4 = vmov (!%p667_p10), 0.0  }
  0x22   : > { %s884_s11 = scalar_lea.vmem %s935_s1, %s666_s8  ;;  %351 = vst [vmem:[#allocation2] sm:$0xff] (!%p667_p10), %v806_v4  ;;  %352 = vst [vmem:[#allocation2 + $0x8] sm:$0xff] (!%p667_p10), %v806_v4 }
  0x23   : > { %353 = vst [vmem:[#allocation2 + $0x10] sm:$0xff] (!%p667_p10), %v806_v4  ;;  %354 = vst [vmem:[#allocation2 + $0x18] sm:$0xff] (!%p667_p10), %v806_v4 }
  0x27 PF: > { %v756_v5 = vld [vmem:[%s884_s11] sm:$0xff]   ;;  %v757_v6 = vld [vmem:[%s884_s11 + $0x8] sm:$0xff]   ;;  %v758_v7 = vld [vmem:[%s884_s11 + $0x10] sm:$0xff]   ;;  %p678_p11 = scmp.ne.s32.totalorder %s796_s17, 8 }
  0x28   : > { %695 = vmatprep.subr.bf16.mxu0 %v756_v5  ;;  %v759_v8 = vld [vmem:[%s884_s11 + $0x18] sm:$0xff]   ;;  %v764_v9 = vld [vmem:[%s281_s12] sm:$0xff]   ;;  %v761_v11 = vld [vmem:[%s884_s11 + $0x28] sm:$0xff]  }
  0x29   : > { %696 = vmatpush3.bf16.msra.mxu0 %v756_v5  ;;  %711 = vmatprep.mubr.bf16.mxu0 %v764_v9  ;;  %v760_v10 = vld [vmem:[%s884_s11 + $0x20] sm:$0xff]   ;;  %v762_v12 = vld [vmem:[%s884_s11 + $0x30] sm:$0xff]   ;;  %v763_v13 = vld [vmem:[%s884_s11 + $0x38] sm:$0xff]  }
  0x2a   : > { %697 = vmatprep.subr.bf16.mxu0 %v757_v6  ;;  %v765_v14 = vld [vmem:[%s281_s12 + $0x8] sm:$0xff]   ;;  %v357_v15 = vld [vmem:[#allocation2 + $0x10] sm:$0xff]  ;;  %v355_v16 = vld [vmem:[#allocation2] sm:$0xff] }
  0x2b   : > { %v358_v18 = vld [vmem:[#allocation2 + $0x18] sm:$0xff]  ;;  %v356_v21 = vld [vmem:[#allocation2 + $0x8] sm:$0xff]  ;;  %v679_v28 = vld [vmem:[%s936_s2] ss:$0 sm:$0xff] (!%p678_p11) }
  0x2c   : > { %v680_v29 = vld [vmem:[%s937_s3] ss:$0 sm:$0xff] (!%p678_p11) }
  0x2d   : > { %698 = vmatpush3.bf16.msra.mxu0 %v757_v6 }
  0x2e   : > { %699 = vmatprep.subr.bf16.mxu0 %v758_v7 }
  0x31   : > { %700 = vmatpush3.bf16.msra.mxu0 %v758_v7 }
  0x32   : > { %701 = vmatprep.subr.bf16.mxu0 %v759_v8 }
  0x35   : > { %702 = vmatpush3.bf16.msra.mxu0 %v759_v8 }
  0x36   : > { %703 = vmatprep.subr.bf16.mxu0 %v760_v10 }
  0x39   : > { %704 = vmatpush3.bf16.msra.mxu0 %v760_v10 }
  0x3a   : > { %705 = vmatprep.subr.bf16.mxu0 %v761_v11 }
  0x3d   : > { %706 = vmatpush3.bf16.msra.mxu0 %v761_v11 }
  0x3e   : > { %707 = vmatprep.subr.bf16.mxu0 %v762_v12 }
  0x41   : > { %708 = vmatpush3.bf16.msra.mxu0 %v762_v12 }
  0x42   : > { %709 = vmatprep.subr.bf16.mxu0 %v763_v13 }
  0x45   : > { %710 = vmatpush3.bf16.msra.mxu0 %v763_v13 }
  0x48   : > { %712 = vmatmul.mubr.bf16.vlgmr.msra.gmra.mrb[0].mxu0 %v765_v14 }
 0x11b   : > { %v713_v17 = vpop.f32.mrb[0].mxu0  ;;  %499 = sbr.rel (%p678_p11) target bundleno = 304 (0x130), region = 85 }
 0x11c   : > { %v490_v19 = vadd.f32 %v713_v17, %v357_v15  ;;  %v473_v20 = vpop.f32.mrb[1].mxu0 }
 0x11d   : > { %v488_v22 = vadd.f32 %v473_v20, %v355_v16  ;;  %v714_v23 = vpop.f32.mrb[2].mxu0 }
 0x11e   : > { %494 = vst [vmem:[#allocation2 + $0x10] sm:$0xff] %v490_v19  ;;  %v491_v24 = vadd.f32 %v714_v23, %v358_v18  ;;  %v476_v25 = vpop.f32.mrb[3].mxu0 }
 0x11f   : > { %492 = vst [vmem:[#allocation2] sm:$0xff] %v488_v22  ;;  %v489_v26 = vadd.f32 %v476_v25, %v356_v21 }
 0x120   : > { %495 = vst [vmem:[#allocation2 + $0x18] sm:$0xff] %v491_v24 }
 0x121   : > { %493 = vst [vmem:[#allocation2 + $0x8] sm:$0xff] %v489_v26 }
 0x125   : > { %v502_v32 = vld [vmem:[#allocation2 + $0x10] sm:$0xff] }
 0x126   : > { %v500_v27 = vld [vmem:[#allocation2] sm:$0xff]  ;;  %v513_v35 = vmul.f32 %v679_v28, %v502_v32 }
 0x127   : > { %v511_v30 = vmul.f32 %v679_v28, %v500_v27  ;;  %v503_v33 = vld [vmem:[#allocation2 + $0x18] sm:$0xff] }
 0x128   : > { %v501_v31 = vld [vmem:[#allocation2 + $0x8] sm:$0xff]  ;;  %v514_v36 = vmul.f32 %v679_v28, %v503_v33  ;;  %v524_v39 = vadd.f32 %v680_v29, %v513_v35 }
 0x129   : > { %v512_v34 = vmul.f32 %v679_v28, %v501_v31  ;;  %v522_v37 = vadd.f32 %v680_v29, %v511_v30 }
 0x12a   : > { %v525_v40 = vadd.f32 %v680_v29, %v514_v36  ;;  %v528_v43 = vmax.f32 %v524_v39, 0.0 }
 0x12b   : > { %v523_v38 = vadd.f32 %v680_v29, %v512_v34  ;;  %v526_v41 = vmax.f32 %v522_v37, 0.0 }
 0x12c   : > { %v529_v44 = vmax.f32 %v525_v40, 0.0  ;;  %532 = vst [vmem:[%s938_s4 + $0x10] sm:$0xff] %v528_v43 }
 0x12d   : > { %v527_v42 = vmax.f32 %v523_v38, 0.0  ;;  %530 = vst [vmem:[%s938_s4] sm:$0xff] %v526_v41 }
 0x12e   : > { %533 = vst [vmem:[%s938_s4 + $0x18] sm:$0xff] %v529_v44 }
 0x12f   : > { %531 = vst [vmem:[%s938_s4 + $0x8] sm:$0xff] %v527_v42 }
 0x130 PF: > { %s14_s19 = sadd.s32 1, %s804_s19   ;;  %s939_s15 = smov %s792_s16 }
 0x131   : > { %p11_p12 = scmp.ge.s32.totalorder %s14_s19, 11   ;;  %s940_s16 = smov %s867_s23 }
 0x132   : > { %s941_s17 = smov %s800_s18  ;;  %s942_s18 = smov %s944_s20 }
 0x133   :  { %13 = sbr.rel (!%p11_p12) target bundleno = 3 (0x3), region = 129 }

// kernel: resnet_forward.17
= control target key start
LH: loop header
LB: loop body
LE: loop exit
PB: predicated region body
PF: predicated region fallthrough
CT: control target
= control target key end

     0   :  { %s329_s1 = inlined_call_operand.vmem [shape: bf16[128,128], index: 1, kind: input, shape index: {}]   ;;  %s330_s0 = inlined_call_operand.vmem [shape: bf16[32,128], index: 0, kind: input, shape index: {}]   ;;  %s331_s2 = inlined_call_operand.vmem [shape: f32[1,128], index: 2, kind: input, shape index: {}]   ;;  %s332_s3 = inlined_call_operand.vmem [shape: f32[1,128], index: 3, kind: input, shape index: {}]   ;;  %s333_s4 = inlined_call_operand.vmem [shape: f32[32,128], index: 4, kind: output, shape index: {}]  }
   0x1   :  { %v246_v0 = vld [vmem:[%s329_s1] sm:$0xff]   ;;  %v247_v1 = vld [vmem:[%s329_s1 + $0x8] sm:$0xff]   ;;  %v248_v2 = vld [vmem:[%s329_s1 + $0x10] sm:$0xff]  }
   0x2   :  { %226 = vmatprep.subr.bf16.mxu0 %v246_v0  ;;  %v249_v3 = vld [vmem:[%s329_s1 + $0x18] sm:$0xff]   ;;  %v254_v4 = vld [vmem:[%s330_s0] sm:$0xff]   ;;  %v251_v6 = vld [vmem:[%s329_s1 + $0x28] sm:$0xff]  }
   0x3   :  { %227 = vmatpush3.bf16.msra.mxu0 %v246_v0  ;;  %242 = vmatprep.mubr.bf16.mxu0 %v254_v4  ;;  %v250_v5 = vld [vmem:[%s329_s1 + $0x20] sm:$0xff]   ;;  %v252_v7 = vld [vmem:[%s329_s1 + $0x30] sm:$0xff]   ;;  %v253_v8 = vld [vmem:[%s329_s1 + $0x38] sm:$0xff]  }
   0x4   :  { %228 = vmatprep.subr.bf16.mxu0 %v247_v1  ;;  %v255_v9 = vld [vmem:[%s330_s0 + $0x8] sm:$0xff]   ;;  %v214_v10 = vld [vmem:[%s331_s2] ss:$0 sm:$0xff] }
   0x5   :  { %v215_v12 = vld [vmem:[%s332_s3] ss:$0 sm:$0xff] }
   0x7   :  { %229 = vmatpush3.bf16.msra.mxu0 %v247_v1 }
   0x8   :  { %230 = vmatprep.subr.bf16.mxu0 %v248_v2 }
   0xb   :  { %231 = vmatpush3.bf16.msra.mxu0 %v248_v2 }
   0xc   :  { %232 = vmatprep.subr.bf16.mxu0 %v249_v3 }
   0xf   :  { %233 = vmatpush3.bf16.msra.mxu0 %v249_v3 }
  0x10   :  { %234 = vmatprep.subr.bf16.mxu0 %v250_v5 }
  0x13   :  { %235 = vmatpush3.bf16.msra.mxu0 %v250_v5 }
  0x14   :  { %236 = vmatprep.subr.bf16.mxu0 %v251_v6 }
  0x17   :  { %237 = vmatpush3.bf16.msra.mxu0 %v251_v6 }
  0x18   :  { %238 = vmatprep.subr.bf16.mxu0 %v252_v7 }
  0x1b   :  { %239 = vmatpush3.bf16.msra.mxu0 %v252_v7 }
  0x1c   :  { %240 = vmatprep.subr.bf16.mxu0 %v253_v8 }
  0x1f   :  { %241 = vmatpush3.bf16.msra.mxu0 %v253_v8 }
  0x22   :  { %243 = vmatmul.mubr.bf16.vlgmr.msra.gmra.mrb[0].mxu0 %v255_v9 }
  0xf5   :  { %v244_v11 = vpop.f32.mrb[0].mxu0 }
  0xf6   :  { %v183_v13 = vmul.f32 %v244_v11, %v214_v10  ;;  %v144_v14 = vpop.f32.mrb[1].mxu0 }
  0xf7   :  { %v181_v15 = vmul.f32 %v214_v10, %v144_v14  ;;  %v245_v16 = vpop.f32.mrb[2].mxu0 }
  0xf8   :  { %v194_v17 = vadd.f32 %v215_v12, %v183_v13  ;;  %v184_v18 = vmul.f32 %v245_v16, %v214_v10  ;;  %v147_v19 = vpop.f32.mrb[3].mxu0 }
  0xf9   :  { %v192_v20 = vadd.f32 %v215_v12, %v181_v15  ;;  %v182_v21 = vmul.f32 %v214_v10, %v147_v19 }
  0xfa   :  { %198 = vst [vmem:[%s333_s4 + $0x10] sm:$0xff] %v194_v17  ;;  %v195_v22 = vadd.f32 %v215_v12, %v184_v18 }
  0xfb   :  { %196 = vst [vmem:[%s333_s4] sm:$0xff] %v192_v20  ;;  %v193_v23 = vadd.f32 %v215_v12, %v182_v21 }
  0xfc   :  { %199 = vst [vmem:[%s333_s4 + $0x18] sm:$0xff] %v195_v22 }
  0xfd   :  { %197 = vst [vmem:[%s333_s4 + $0x8] sm:$0xff] %v193_v23 }

// kernel: resnet_forward.18
= control target key start
LH: loop header
LB: loop body
LE: loop exit
PB: predicated region body
PF: predicated region fallthrough
CT: control target
= control target key end

     0   :  { %s924_s18 = smov 0   ;;  %s926_s19 = smov 0   ;;  %s1038_s0 = inlined_call_operand.vmem [shape: bf16[32,1152], index: 0, kind: input, shape index: {}]   ;;  %s1039_s1 = inlined_call_operand.vmem [shape: bf16[1152,128], index: 1, kind: input, shape index: {}]   ;;  %s1040_s2 = inlined_call_operand.vmem [shape: f32[1,128], index: 2, kind: input, shape index: {}]   ;;  %s1041_s3 = inlined_call_operand.vmem [shape: f32[1,128], index: 3, kind: input, shape index: {}]   ;;  %s1042_s4 = inlined_call_operand.vmem [shape: f32[32,128], index: 4, kind: input, shape index: {}]   ;;  %s1043_s5 = inlined_call_operand.vmem [shape: f32[32,128], index: 5, kind: output, shape index: {}]  }
   0x1   :  { %s928_s20 = smov 0   ;;  %s930_s21 = smov 0  }
   0x2   :  { %s932_s22 = smov 0  }
   0x3 LB: > { %s27_s23 = sadd.s32 1, %s887_s21  ;;  %p50_p1 = scmp.ne.s32.totalorder %s879_s19, %s875_s18  ;;  %s891_s22 = sphi %s932_s22, %s15_s22   ;;  %s887_s21 = sphi %s930_s21, %s1047_s21   ;;  %s883_s20 = sphi %s928_s20, %s1046_s20   ;;  %s879_s19 = sphi %s926_s19, %s1045_s19   ;;  %s875_s18 = sphi %s924_s18, %s1044_s18  }
   0x4   : > { %p28_p0 = scmp.ge.s32.totalorder %s27_s23, 9  ;;  %p51_p2 = scmp.eq.s32.totalorder %s891_s22, 0 }
   0x5   : > { %s43_s25 = sadd.s32 1, %s879_s19  ;;  %p747_p5 = scmp.ge.s32.totalorder %s891_s22, 9 }
   0x6   : > { %s1049_s23 = smov (%p28_p0, %s27_s23), 0  ;;  %p52_p3 = por %p51_p2, %p50_p1 }
   0x7   : > { %s39_s24 = ssub.s32 %s887_s21, %s1049_s23  ;;  %236 = sbr.rel (%p747_p5) target bundleno = 21 (0x15), region = 28 }
   0x8   : > { %p41_p4 = scmp.eq.s32.totalorder %s39_s24, 0 }
   0xa   : > { %s959_s26 = scalar_select %p41_p4, %s879_s19, %s43_s25  }
   0xe   : > { %239 = sbr.rel (!%p52_p3) target bundleno = 21 (0x15), region = 32  ;;  %s241_s27 = sand.u32 (%p52_p3), 1, %s879_s19  }
   0xf   : > { %s749_s28 = sshll.u32 (%p52_p3), %s887_s21, 2  ;;  %s748_s29 = sshll.u32 (%p52_p3), %s241_s27, 4 }
  0x10   : > { %s248_s7 = scalar_lea.vmem (%p52_p3), %s1038_s0, %s749_s28  ;;  %s243_s8 = scalar_lea.vmem (%p52_p3), [#allocation3], %s748_s29 }
  0x11   : > { %v264_v0 = vld [vmem:[%s248_s7] sm:$0xf] (%p52_p3)  ;;  %v266_v1 = vld [vmem:[%s248_s7 + $0x24] sm:$0xf] (%p52_p3)  ;;  %v268_v2 = vld [vmem:[%s248_s7 + $0x48] sm:$0xf] (%p52_p3) }
  0x12   : > { %265 = vst [vmem:[%s243_s8] sm:$0xf] (%p52_p3), %v264_v0  ;;  %267 = vst [vmem:[%s243_s8 + $0x4] sm:$0xf] (%p52_p3), %v266_v1  ;;  %v270_v3 = vld [vmem:[%s248_s7 + $0x6c] sm:$0xf] (%p52_p3) }
  0x13   : > { %269 = vst [vmem:[%s243_s8 + $0x8] sm:$0xf] (%p52_p3), %v268_v2  ;;  %271 = vst [vmem:[%s243_s8 + $0xc] sm:$0xf] (%p52_p3), %v270_v3 }
  0x15 PF: > { %p750_p6 = scmp.ge.s32.totalorder %s891_s22, 1  ;;  %p313_p7 = scmp.lt.s32.totalorder %s891_s22, 10 }
  0x17   : > { %p314_p8 = pnand %p750_p6, %p313_p7 }
  0x18   : > { %s320_s9 = sand.u32 (!%p314_p8), 1, %s875_s18   ;;  %s752_s10 = sshll.u32 (!%p314_p8), %s883_s20, 4 }
  0x19   : > { %317 = sbr.rel (%p314_p8) target bundleno = 306 (0x132), region = 77  ;;  %s971_s11 = sshll.u32 (!%p314_p8), %s320_s9, 4 }
  0x1a   : > { %p374_p9 = scmp.lt.s32.totalorder (!%p314_p8), %s752_s10, 143  ;;  %s322_s16 = scalar_lea.vmem (!%p314_p8), [#allocation3], %s971_s11 }
  0x1b   : > { %p754_p10 = scmp.ne.s32.totalorder (!%p314_p8), %s883_s20, 0 }
  0x20   : > { %s1051_s10 = smov (!%p374_p9, %s752_s10), 143  ;;  %410 = sbr.rel (%p754_p10) target bundleno = 39 (0x27), region = 85 }
  0x21   : > { %s753_s12 = sshll.u32 %s1051_s10, 2  ;;  %v893_v4 = vmov (!%p754_p10), 0.0  }
  0x22   : > { %s976_s15 = scalar_lea.vmem %s1039_s1, %s753_s12  ;;  %411 = vst [vmem:[#allocation2] sm:$0xff] (!%p754_p10), %v893_v4  ;;  %412 = vst [vmem:[#allocation2 + $0x8] sm:$0xff] (!%p754_p10), %v893_v4 }
  0x23   : > { %413 = vst [vmem:[#allocation2 + $0x10] sm:$0xff] (!%p754_p10), %v893_v4  ;;  %414 = vst [vmem:[#allocation2 + $0x18] sm:$0xff] (!%p754_p10), %v893_v4 }
  0x27 PF: > { %v843_v5 = vld [vmem:[%s976_s15] sm:$0xff]   ;;  %v844_v6 = vld [vmem:[%s976_s15 + $0x8] sm:$0xff]   ;;  %v845_v7 = vld [vmem:[%s976_s15 + $0x10] sm:$0xff]   ;;  %p765_p11 = scmp.ne.s32.totalorder %s883_s20, 8 }
  0x28   : > { %782 = vmatprep.subr.bf16.mxu0 %v843_v5  ;;  %v846_v8 = vld [vmem:[%s976_s15 + $0x18] sm:$0xff]   ;;  %v851_v9 = vld [vmem:[%s322_s16] sm:$0xff]   ;;  %v848_v11 = vld [vmem:[%s976_s15 + $0x28] sm:$0xff]  }
  0x29   : > { %783 = vmatpush3.bf16.msra.mxu0 %v843_v5  ;;  %798 = vmatprep.mubr.bf16.mxu0 %v851_v9  ;;  %v847_v10 = vld [vmem:[%s976_s15 + $0x20] sm:$0xff]   ;;  %v849_v12 = vld [vmem:[%s976_s15 + $0x30] sm:$0xff]   ;;  %v850_v13 = vld [vmem:[%s976_s15 + $0x38] sm:$0xff]  }
  0x2a   : > { %784 = vmatprep.subr.bf16.mxu0 %v844_v6  ;;  %v852_v14 = vld [vmem:[%s322_s16 + $0x8] sm:$0xff]   ;;  %v417_v15 = vld [vmem:[#allocation2 + $0x10] sm:$0xff]  ;;  %v415_v16 = vld [vmem:[#allocation2] sm:$0xff] }
  0x2b   : > { %v418_v18 = vld [vmem:[#allocation2 + $0x18] sm:$0xff]  ;;  %v416_v21 = vld [vmem:[#allocation2 + $0x8] sm:$0xff]  ;;  %v766_v28 = vld [vmem:[%s1040_s2] ss:$0 sm:$0xff] (!%p765_p11) }
  0x2c   : > { %v767_v29 = vld [vmem:[%s1041_s3] ss:$0 sm:$0xff] (!%p765_p11)  ;;  %v587_v37 = vld [vmem:[%s1042_s4 + $0x8] sm:$0xff] (!%p765_p11)  ;;  %v588_v41 = vld [vmem:[%s1042_s4 + $0x10] sm:$0xff] (!%p765_p11) }
  0x2d   : > { %785 = vmatpush3.bf16.msra.mxu0 %v844_v6  ;;  %v586_v32 = vld [vmem:[%s1042_s4] sm:$0xff] (!%p765_p11)  ;;  %v589_v42 = vld [vmem:[%s1042_s4 + $0x18] sm:$0xff] (!%p765_p11) }
  0x2e   : > { %786 = vmatprep.subr.bf16.mxu0 %v845_v7 }
  0x31   : > { %787 = vmatpush3.bf16.msra.mxu0 %v845_v7 }
  0x32   : > { %788 = vmatprep.subr.bf16.mxu0 %v846_v8 }
  0x35   : > { %789 = vmatpush3.bf16.msra.mxu0 %v846_v8 }
  0x36   : > { %790 = vmatprep.subr.bf16.mxu0 %v847_v10 }
  0x39   : > { %791 = vmatpush3.bf16.msra.mxu0 %v847_v10 }
  0x3a   : > { %792 = vmatprep.subr.bf16.mxu0 %v848_v11 }
  0x3d   : > { %793 = vmatpush3.bf16.msra.mxu0 %v848_v11 }
  0x3e   : > { %794 = vmatprep.subr.bf16.mxu0 %v849_v12 }
  0x41   : > { %795 = vmatpush3.bf16.msra.mxu0 %v849_v12 }
  0x42   : > { %796 = vmatprep.subr.bf16.mxu0 %v850_v13 }
  0x45   : > { %797 = vmatpush3.bf16.msra.mxu0 %v850_v13 }
  0x48   : > { %799 = vmatmul.mubr.bf16.vlgmr.msra.gmra.mrb[0].mxu0 %v852_v14 }
 0x11b   : > { %v800_v17 = vpop.f32.mrb[0].mxu0  ;;  %559 = sbr.rel (%p765_p11) target bundleno = 306 (0x132), region = 89 }
 0x11c   : > { %v550_v19 = vadd.f32 %v800_v17, %v417_v15  ;;  %v533_v20 = vpop.f32.mrb[1].mxu0 }
 0x11d   : > { %v548_v22 = vadd.f32 %v533_v20, %v415_v16  ;;  %v801_v23 = vpop.f32.mrb[2].mxu0 }
 0x11e   : > { %554 = vst [vmem:[#allocation2 + $0x10] sm:$0xff] %v550_v19  ;;  %v551_v24 = vadd.f32 %v801_v23, %v418_v18  ;;  %v536_v25 = vpop.f32.mrb[3].mxu0 }
 0x11f   : > { %552 = vst [vmem:[#allocation2] sm:$0xff] %v548_v22  ;;  %v549_v26 = vadd.f32 %v536_v25, %v416_v21 }
 0x120   : > { %555 = vst [vmem:[#allocation2 + $0x18] sm:$0xff] %v551_v24 }
 0x121   : > { %553 = vst [vmem:[#allocation2 + $0x8] sm:$0xff] %v549_v26 }
 0x125   : > { %v562_v34 = vld [vmem:[#allocation2 + $0x10] sm:$0xff] }
 0x126   : > { %v560_v27 = vld [vmem:[#allocation2] sm:$0xff]  ;;  %v573_v38 = vmul.f32 %v766_v28, %v562_v34 }
 0x127   : > { %v571_v30 = vmul.f32 %v766_v28, %v560_v27  ;;  %v563_v35 = vld [vmem:[#allocation2 + $0x18] sm:$0xff] }
 0x128   : > { %v561_v31 = vld [vmem:[#allocation2 + $0x8] sm:$0xff]  ;;  %v574_v39 = vmul.f32 %v766_v28, %v563_v35  ;;  %v584_v44 = vadd.f32 %v767_v29, %v573_v38 }
 0x129   : > { %v572_v33 = vmul.f32 %v766_v28, %v561_v31  ;;  %v582_v36 = vadd.f32 %v767_v29, %v571_v30 }
 0x12a   : > { %v585_v45 = vadd.f32 %v767_v29, %v574_v39  ;;  %v592_v48 = vadd.f32 %v588_v41, %v584_v44 }
 0x12b   : > { %v583_v40 = vadd.f32 %v767_v29, %v572_v33  ;;  %v590_v43 = vadd.f32 %v586_v32, %v582_v36 }
 0x12c   : > { %v593_v49 = vadd.f32 %v589_v42, %v585_v45  ;;  %v596_v51 = vmax.f32 %v592_v48, 0.0 }
 0x12d   : > { %v591_v46 = vadd.f32 %v587_v37, %v583_v40  ;;  %v594_v47 = vmax.f32 %v590_v43, 0.0 }
 0x12e   : > { %v597_v52 = vmax.f32 %v593_v49, 0.0  ;;  %600 = vst [vmem:[%s1043_s5 + $0x10] sm:$0xff] %v596_v51 }
 0x12f   : > { %v595_v50 = vmax.f32 %v591_v46, 0.0  ;;  %598 = vst [vmem:[%s1043_s5] sm:$0xff] %v594_v47 }
 0x130   : > { %601 = vst [vmem:[%s1043_s5 + $0x18] sm:$0xff] %v597_v52 }
 0x131   : > { %599 = vst [vmem:[%s1043_s5 + $0x8] sm:$0xff] %v595_v50 }
 0x132 PF: > { %s15_s22 = sadd.s32 1, %s891_s22   ;;  %s1044_s18 = smov %s879_s19 }
 0x133   : > { %p12_p12 = scmp.ge.s32.totalorder %s15_s22, 11   ;;  %s1045_s19 = smov %s959_s26 }
 0x134   : > { %s1046_s20 = smov %s887_s21  ;;  %s1047_s21 = smov %s1049_s23 }
 0x135   :  { %14 = sbr.rel (!%p12_p12) target bundleno = 3 (0x3), region = 136 }

// kernel: resnet_forward.19
= control target key start
LH: loop header
LB: loop body
LE: loop exit
PB: predicated region body
PF: predicated region fallthrough
CT: control target
= control target key end

     0   :  { %s881_s15 = smov 0   ;;  %s883_s16 = smov 0   ;;  %s989_s0 = inlined_call_operand.vmem [shape: bf16[16,1152], index: 0, kind: input, shape index: {}]   ;;  %s990_s1 = inlined_call_operand.vmem [shape: bf16[1152,256], index: 1, kind: input, shape index: {}]   ;;  %s991_s2 = inlined_call_operand.vmem [shape: f32[1,256], index: 2, kind: input, shape index: {}]   ;;  %s992_s3 = inlined_call_operand.vmem [shape: f32[1,256], index: 3, kind: input, shape index: {}]   ;;  %s993_s4 = inlined_call_operand.vmem [shape: f32[16,256], index: 4, kind: output, shape index: {}]  }
   0x1   :  { %s885_s17 = smov 0   ;;  %s887_s18 = smov 0  }
   0x2   :  { %s889_s19 = smov 0  }
   0x3 LB: > { %s26_s20 = sadd.s32 1, %s848_s18  ;;  %p49_p1 = scmp.ne.s32.totalorder %s840_s16, %s836_s15  ;;  %s852_s19 = sphi %s889_s19, %s14_s19   ;;  %s848_s18 = sphi %s887_s18, %s997_s18   ;;  %s844_s17 = sphi %s885_s17, %s996_s17   ;;  %s840_s16 = sphi %s883_s16, %s995_s16   ;;  %s836_s15 = sphi %s881_s15, %s994_s15  }
   0x4   : > { %p27_p0 = scmp.ge.s32.totalorder %s26_s20, 9  ;;  %p50_p2 = scmp.eq.s32.totalorder %s852_s19, 0 }
   0x5   : > { %s42_s22 = sadd.s32 1, %s840_s16  ;;  %p715_p5 = scmp.ge.s32.totalorder %s852_s19, 9 }
   0x6   : > { %s999_s20 = smov (%p27_p0, %s26_s20), 0  ;;  %p51_p3 = por %p50_p2, %p49_p1 }
   0x7   : > { %s38_s21 = ssub.s32 %s848_s18, %s999_s20  ;;  %199 = sbr.rel (%p715_p5) target bundleno = 21 (0x15), region = 24 }
   0x8   : > { %p40_p4 = scmp.eq.s32.totalorder %s38_s21, 0 }
   0xa   : > { %s916_s23 = scalar_select %p40_p4, %s840_s16, %s42_s22  }
   0xe   : > { %202 = sbr.rel (!%p51_p3) target bundleno = 21 (0x15), region = 28  ;;  %s204_s24 = sand.u32 (%p51_p3), 1, %s840_s16  }
   0xf   : > { %s717_s25 = sshll.u32 (%p51_p3), %s848_s18, 2  ;;  %s716_s26 = sshll.u32 (%p51_p3), %s204_s24, 3 }
  0x10   : > { %s211_s29 = scalar_lea.vmem (%p51_p3), %s989_s0, %s717_s25  ;;  %s206_s30 = scalar_lea.vmem (%p51_p3), [#allocation3], %s716_s26 }
  0x11   : > { %v227_v0 = vld [vmem:[%s211_s29] sm:$0xf] (%p51_p3)  ;;  %v229_v1 = vld [vmem:[%s211_s29 + $0x24] sm:$0xf] (%p51_p3) }
  0x12   : > { %228 = vst [vmem:[%s206_s30] sm:$0xf] (%p51_p3), %v227_v0  ;;  %230 = vst [vmem:[%s206_s30 + $0x4] sm:$0xf] (%p51_p3), %v229_v1 }
  0x15 PF: > { %p718_p6 = scmp.ge.s32.totalorder %s852_s19, 1  ;;  %p271_p7 = scmp.lt.s32.totalorder %s852_s19, 10 }
  0x17   : > { %p272_p8 = pnand %p718_p6, %p271_p7 }
  0x18   : > { %s278_s5 = sand.u32 (!%p272_p8), 1, %s836_s15   ;;  %s720_s6 = sshll.u32 (!%p272_p8), %s844_s17, 4 }
  0x19   : > { %275 = sbr.rel (%p272_p8) target bundleno = 304 (0x130), region = 73  ;;  %s928_s7 = sshll.u32 (!%p272_p8), %s278_s5, 3 }
  0x1a   : > { %p329_p9 = scmp.lt.s32.totalorder (!%p272_p8), %s720_s6, 143  ;;  %s280_s12 = scalar_lea.vmem (!%p272_p8), [#allocation3], %s928_s7 }
  0x1b   : > { %p723_p10 = scmp.ne.s32.totalorder (!%p272_p8), %s844_s17, 0 }
  0x20   : > { %s1001_s6 = smov (!%p329_p9, %s720_s6), 143  ;;  %365 = sbr.rel (%p723_p10) target bundleno = 39 (0x27), region = 81 }
  0x21   : > { %s746_s8 = sshll.u32 %s1001_s6, 3  ;;  %v854_v2 = vmov (!%p723_p10), 0.0  }
  0x22   : > { %s933_s11 = scalar_lea.vmem %s990_s1, %s746_s8  ;;  %366 = vst [vmem:[#allocation2] sm:$0xff] (!%p723_p10), %v854_v2  ;;  %367 = vst [vmem:[#allocation2 + $0x8] sm:$0xff] (!%p723_p10), %v854_v2 }
  0x23   : > { %368 = vst [vmem:[#allocation2 + $0x10] sm:$0xff] (!%p723_p10), %v854_v2  ;;  %369 = vst [vmem:[#allocation2 + $0x18] sm:$0xff] (!%p723_p10), %v854_v2 }
  0x27 PF: > { %v789_v3 = vld [vmem:[%s933_s11 + $0x4] ss:$8 sps:$4 sm:$0xff]   ;;  %v791_v4 = vld [vmem:[%s933_s11] ss:$8 sps:$4 sm:$0xff]   ;;  %v855_v5 = vmov 0   ;;  %p741_p11 = scmp.ne.s32.totalorder %s844_s17, 8 }
  0x28   : > { %510 = vmatprep.mubr.bf16.mxu0 %v855_v5  ;;  %478 = vmatprep.subr.bf16.mxu0 %v789_v3  ;;  %v792_v6 = vld [vmem:[%s933_s11 + $0x14] ss:$8 sps:$4 sm:$0xff]   ;;  %v794_v7 = vld [vmem:[%s933_s11 + $0x10] ss:$8 sps:$4 sm:$0xff]   ;;  %v795_v8 = vld [vmem:[%s933_s11 + $0x24] ss:$8 sps:$4 sm:$0xff]   ;;  %v539_v33 = vlaneseq (!%p741_p11) }
  0x29   : > { %479 = vmatpush1.bf16.msra.mxu0 %v791_v4  ;;  %v797_v9 = vld [vmem:[%s933_s11 + $0x20] ss:$8 sps:$4 sm:$0xff]   ;;  %v798_v10 = vld [vmem:[%s933_s11 + $0x34] ss:$8 sps:$4 sm:$0xff]   ;;  %v800_v11 = vld [vmem:[%s933_s11 + $0x30] ss:$8 sps:$4 sm:$0xff]  }
  0x2a   : > { %480 = vmatprep.subr.bf16.mxu0 %v792_v6  ;;  %v801_v12 = vld [vmem:[%s933_s11 + $0x44] ss:$8 sps:$4 sm:$0xff]   ;;  %v803_v13 = vld [vmem:[%s933_s11 + $0x40] ss:$8 sps:$4 sm:$0xff]   ;;  %v804_v14 = vld [vmem:[%s933_s11 + $0x54] ss:$8 sps:$4 sm:$0xff]  }
  0x2b   : > { %v806_v15 = vld [vmem:[%s933_s11 + $0x50] ss:$8 sps:$4 sm:$0xff]   ;;  %v807_v16 = vld [vmem:[%s933_s11 + $0x64] ss:$8 sps:$4 sm:$0xff]   ;;  %v809_v17 = vld [vmem:[%s933_s11 + $0x60] ss:$8 sps:$4 sm:$0xff]  }
  0x2c   : > { %v810_v18 = vld [vmem:[%s933_s11 + $0x74] ss:$8 sps:$4 sm:$0xff]   ;;  %v812_v19 = vld [vmem:[%s933_s11 + $0x70] ss:$8 sps:$4 sm:$0xff]   ;;  %v813_v20 = vld [vmem:[%s280_s12] sm:$0xff]   ;;  %v540_v34 = vshrl.u32 (!%p741_p11), %v539_v33, 7 }
  0x2d   : > { %481 = vmatpush1.bf16.msra.mxu0 %v794_v7  ;;  %v370_v21 = vld [vmem:[#allocation2] sm:$0xff]  ;;  %v371_v22 = vld [vmem:[#allocation2 + $0x8] sm:$0xff]  ;;  %v372_v24 = vld [vmem:[#allocation2 + $0x10] sm:$0xff] }
  0x2e   : > { %482 = vmatprep.subr.bf16.mxu0 %v795_v8  ;;  %v373_v27 = vld [vmem:[#allocation2 + $0x18] sm:$0xff]  ;;  %v537_v35 = vld [vmem:[%s991_s2] sm:$0x3] (!%p741_p11)  ;;  %v541_v38 = vsub.s32 (!%p741_p11), 0, %v540_v34  ;;  %v545_v39 = vsub.s32 (!%p741_p11), 1, %v540_v34 }
  0x2f   : > { %v553_v36 = vld [vmem:[%s992_s3] sm:$0x3] (!%p741_p11) }
  0x30   : > { %v542_v43 = vrot.slane (!%p741_p11), %v537_v35, %v541_v38  ;;  %v558_v44 = vrot.slane (!%p741_p11), %v553_v36, %v541_v38  ;;  %v546_v45 = vrot.slane (!%p741_p11), %v537_v35, %v545_v39  ;;  %v562_v46 = vrot.slane (!%p741_p11), %v553_v36, %v545_v39 }
  0x31   : > { %483 = vmatpush1.bf16.msra.mxu0 %v797_v9 }
  0x32   : > { %484 = vmatprep.subr.bf16.mxu0 %v798_v10 }
  0x35   : > { %485 = vmatpush1.bf16.msra.mxu0 %v800_v11 }
  0x36   : > { %486 = vmatprep.subr.bf16.mxu0 %v801_v12 }
  0x39   : > { %487 = vmatpush1.bf16.msra.mxu0 %v803_v13 }
  0x3a   : > { %488 = vmatprep.subr.bf16.mxu0 %v804_v14 }
  0x3d   : > { %489 = vmatpush1.bf16.msra.mxu0 %v806_v15 }
  0x3e   : > { %490 = vmatprep.subr.bf16.mxu0 %v807_v16 }
  0x41   : > { %491 = vmatpush1.bf16.msra.mxu0 %v809_v17 }
  0x42   : > { %492 = vmatprep.subr.bf16.mxu0 %v810_v18 }
  0x45   : > { %493 = vmatpush1.bf16.msra.mxu0 %v812_v19 }
  0x48   : > { %511 = vmatmul.mubr.bf16.vlgmr.msra.gmra.mrb[0].mxu0 %v813_v20 }
 0x11b   : > { %v512_v23 = vpop.f32.mrb[0].mxu0  ;;  %532 = sbr.rel (%p741_p11) target bundleno = 304 (0x130), region = 85 }
 0x11c   : > { %v521_v25 = vadd.f32 %v512_v23, %v370_v21  ;;  %v514_v26 = vpop.f32.mrb[1].mxu0 }
 0x11d   : > { %v522_v28 = vadd.f32 %v514_v26, %v371_v22  ;;  %v516_v29 = vpop.f32.mrb[2].mxu0 }
 0x11e   : > { %525 = vst [vmem:[#allocation2] sm:$0xff] %v521_v25  ;;  %v523_v30 = vadd.f32 %v516_v29, %v372_v24  ;;  %v518_v31 = vpop.f32.mrb[3].mxu0 }
 0x11f   : > { %526 = vst [vmem:[#allocation2 + $0x8] sm:$0xff] %v522_v28  ;;  %v524_v32 = vadd.f32 %v518_v31, %v373_v27 }
 0x120   : > { %527 = vst [vmem:[#allocation2 + $0x10] sm:$0xff] %v523_v30 }
 0x121   : > { %528 = vst [vmem:[#allocation2 + $0x18] sm:$0xff] %v524_v32 }
 0x125   : > { %v533_v37 = vld [vmem:[#allocation2] sm:$0xff] }
 0x126   : > { %v534_v40 = vld [vmem:[#allocation2 + $0x8] sm:$0xff]  ;;  %v549_v47 = vmul.f32 %v542_v43, %v533_v37 }
 0x127   : > { %v535_v41 = vld [vmem:[#allocation2 + $0x10] sm:$0xff]  ;;  %v550_v48 = vmul.f32 %v546_v45, %v534_v40 }
 0x128   : > { %v536_v42 = vld [vmem:[#allocation2 + $0x18] sm:$0xff]  ;;  %v551_v49 = vmul.f32 %v542_v43, %v535_v41  ;;  %v565_v51 = vadd.f32 %v558_v44, %v549_v47 }
 0x129   : > { %v552_v50 = vmul.f32 %v546_v45, %v536_v42  ;;  %v566_v52 = vadd.f32 %v562_v46, %v550_v48 }
 0x12a   : > { %v567_v53 = vadd.f32 %v558_v44, %v551_v49  ;;  %v569_v55 = vmax.f32 %v565_v51, 0.0 }
 0x12b   : > { %v568_v54 = vadd.f32 %v562_v46, %v552_v50  ;;  %v570_v56 = vmax.f32 %v566_v52, 0.0 }
 0x12c   : > { %v571_v57 = vmax.f32 %v567_v53, 0.0  ;;  %573 = vst [vmem:[%s993_s4] sm:$0xff] %v569_v55 }
 0x12d   : > { %v572_v58 = vmax.f32 %v568_v54, 0.0  ;;  %574 = vst [vmem:[%s993_s4 + $0x8] sm:$0xff] %v570_v56 }
 0x12e   : > { %575 = vst [vmem:[%s993_s4 + $0x10] sm:$0xff] %v571_v57 }
 0x12f   : > { %576 = vst [vmem:[%s993_s4 + $0x18] sm:$0xff] %v572_v58 }
 0x130 PF: > { %s14_s19 = sadd.s32 1, %s852_s19   ;;  %s994_s15 = smov %s840_s16 }
 0x131   : > { %p11_p12 = scmp.ge.s32.totalorder %s14_s19, 11   ;;  %s995_s16 = smov %s916_s23 }
 0x132   : > { %s996_s17 = smov %s848_s18  ;;  %s997_s18 = smov %s999_s20 }
 0x133   :  { %13 = sbr.rel (!%p11_p12) target bundleno = 3 (0x3), region = 129 }

// kernel: resnet_forward.20
= control target key start
LH: loop header
LB: loop body
LE: loop exit
PB: predicated region body
PF: predicated region fallthrough
CT: control target
= control target key end

     0   :  { %v275_v1 = vmov 0   ;;  %v194_v18 = vlaneseq  ;;  %s370_s1 = inlined_call_operand.vmem [shape: bf16[128,256], index: 1, kind: input, shape index: {}]   ;;  %s371_s0 = inlined_call_operand.vmem [shape: bf16[16,128], index: 0, kind: input, shape index: {}]   ;;  %s372_s2 = inlined_call_operand.vmem [shape: f32[1,256], index: 2, kind: input, shape index: {}]   ;;  %s373_s3 = inlined_call_operand.vmem [shape: f32[1,256], index: 3, kind: input, shape index: {}]   ;;  %s374_s4 = inlined_call_operand.vmem [shape: f32[16,256], index: 4, kind: output, shape index: {}]  }
   0x1   :  { %v250_v0 = vld [vmem:[%s370_s1 + $0x4] ss:$8 sps:$4 sm:$0xff]   ;;  %166 = vmatprep.mubr.bf16.mxu0 %v275_v1  ;;  %v252_v2 = vld [vmem:[%s370_s1] ss:$8 sps:$4 sm:$0xff]   ;;  %v253_v3 = vld [vmem:[%s370_s1 + $0x14] ss:$8 sps:$4 sm:$0xff]  }
   0x2   :  { %134 = vmatprep.subr.bf16.mxu0 %v250_v0  ;;  %v255_v4 = vld [vmem:[%s370_s1 + $0x10] ss:$8 sps:$4 sm:$0xff]   ;;  %v256_v5 = vld [vmem:[%s370_s1 + $0x24] ss:$8 sps:$4 sm:$0xff]   ;;  %v258_v6 = vld [vmem:[%s370_s1 + $0x20] ss:$8 sps:$4 sm:$0xff]  }
   0x3   :  { %135 = vmatpush1.bf16.msra.mxu0 %v252_v2  ;;  %v259_v7 = vld [vmem:[%s370_s1 + $0x34] ss:$8 sps:$4 sm:$0xff]   ;;  %v261_v8 = vld [vmem:[%s370_s1 + $0x30] ss:$8 sps:$4 sm:$0xff]   ;;  %v262_v9 = vld [vmem:[%s370_s1 + $0x44] ss:$8 sps:$4 sm:$0xff]  }
   0x4   :  { %136 = vmatprep.subr.bf16.mxu0 %v253_v3  ;;  %v264_v10 = vld [vmem:[%s370_s1 + $0x40] ss:$8 sps:$4 sm:$0xff]   ;;  %v265_v11 = vld [vmem:[%s370_s1 + $0x54] ss:$8 sps:$4 sm:$0xff]   ;;  %v267_v12 = vld [vmem:[%s370_s1 + $0x50] ss:$8 sps:$4 sm:$0xff]  }
   0x5   :  { %v268_v13 = vld [vmem:[%s370_s1 + $0x64] ss:$8 sps:$4 sm:$0xff]   ;;  %v270_v14 = vld [vmem:[%s370_s1 + $0x60] ss:$8 sps:$4 sm:$0xff]   ;;  %v271_v15 = vld [vmem:[%s370_s1 + $0x74] ss:$8 sps:$4 sm:$0xff]  }
   0x6   :  { %v273_v16 = vld [vmem:[%s370_s1 + $0x70] ss:$8 sps:$4 sm:$0xff]   ;;  %v274_v17 = vld [vmem:[%s371_s0] sm:$0xff]   ;;  %v195_v19 = vshrl.u32 %v194_v18, 7 }
   0x7   :  { %137 = vmatpush1.bf16.msra.mxu0 %v255_v4  ;;  %v192_v21 = vld [vmem:[%s372_s2] sm:$0x3] }
   0x8   :  { %138 = vmatprep.subr.bf16.mxu0 %v256_v5  ;;  %v196_v20 = vsub.s32 0, %v195_v19  ;;  %v200_v22 = vsub.s32 1, %v195_v19  ;;  %v208_v23 = vld [vmem:[%s373_s3] sm:$0x3] }
   0xa   :  { %v197_v24 = vrot.slane %v192_v21, %v196_v20  ;;  %v201_v25 = vrot.slane %v192_v21, %v200_v22  ;;  %v213_v26 = vrot.slane %v208_v23, %v196_v20  ;;  %v217_v28 = vrot.slane %v208_v23, %v200_v22 }
   0xb   :  { %139 = vmatpush1.bf16.msra.mxu0 %v258_v6 }
   0xc   :  { %140 = vmatprep.subr.bf16.mxu0 %v259_v7 }
   0xf   :  { %141 = vmatpush1.bf16.msra.mxu0 %v261_v8 }
  0x10   :  { %142 = vmatprep.subr.bf16.mxu0 %v262_v9 }
  0x13   :  { %143 = vmatpush1.bf16.msra.mxu0 %v264_v10 }
  0x14   :  { %144 = vmatprep.subr.bf16.mxu0 %v265_v11 }
  0x17   :  { %145 = vmatpush1.bf16.msra.mxu0 %v267_v12 }
  0x18   :  { %146 = vmatprep.subr.bf16.mxu0 %v268_v13 }
  0x1b   :  { %147 = vmatpush1.bf16.msra.mxu0 %v270_v14 }
  0x1c   :  { %148 = vmatprep.subr.bf16.mxu0 %v271_v15 }
  0x1f   :  { %149 = vmatpush1.bf16.msra.mxu0 %v273_v16 }
  0x22   :  { %167 = vmatmul.mubr.bf16.vlgmr.msra.gmra.mrb[0].mxu0 %v274_v17 }
  0xf5   :  { %v168_v27 = vpop.f32.mrb[0].mxu0 }
  0xf6   :  { %v204_v29 = vmul.f32 %v197_v24, %v168_v27  ;;  %v170_v30 = vpop.f32.mrb[1].mxu0 }
  0xf7   :  { %v205_v31 = vmul.f32 %v201_v25, %v170_v30  ;;  %v172_v32 = vpop.f32.mrb[2].mxu0 }
  0xf8   :  { %v220_v33 = vadd.f32 %v213_v26, %v204_v29  ;;  %v206_v34 = vmul.f32 %v197_v24, %v172_v32  ;;  %v174_v35 = vpop.f32.mrb[3].mxu0 }
  0xf9   :  { %v221_v36 = vadd.f32 %v217_v28, %v205_v31  ;;  %v207_v37 = vmul.f32 %v201_v25, %v174_v35 }
  0xfa   :  { %224 = vst [vmem:[%s374_s4] sm:$0xff] %v220_v33  ;;  %v222_v38 = vadd.f32 %v213_v26, %v206_v34 }
  0xfb   :  { %225 = vst [vmem:[%s374_s4 + $0x8] sm:$0xff] %v221_v36  ;;  %v223_v39 = vadd.f32 %v217_v28, %v207_v37 }
  0xfc   :  { %226 = vst [vmem:[%s374_s4 + $0x10] sm:$0xff] %v222_v38 }
  0xfd   :  { %227 = vst [vmem:[%s374_s4 + $0x18] sm:$0xff] %v223_v39 }

// kernel: resnet_forward.21
= control target key start
LH: loop header
LB: loop body
LE: loop exit
PB: predicated region body
PF: predicated region fallthrough
CT: control target
= control target key end

     0   :  { %s1122_s18 = smov 0   ;;  %s1124_s19 = smov 0   ;;  %s1260_s0 = inlined_call_operand.vmem [shape: bf16[16,2304], index: 0, kind: input, shape index: {}]   ;;  %s1261_s1 = inlined_call_operand.vmem [shape: bf16[2304,256], index: 1, kind: input, shape index: {}]   ;;  %s1262_s2 = inlined_call_operand.vmem [shape: f32[1,256], index: 2, kind: input, shape index: {}]   ;;  %s1263_s3 = inlined_call_operand.vmem [shape: f32[1,256], index: 3, kind: input, shape index: {}]   ;;  %s1264_s4 = inlined_call_operand.vmem [shape: f32[16,256], index: 4, kind: input, shape index: {}]   ;;  %s1265_s5 = inlined_call_operand.vmem [shape: f32[16,256], index: 5, kind: output, shape index: {}]  }
   0x1   :  { %s1126_s20 = smov 0   ;;  %s1128_s21 = smov 0  }
   0x2   :  { %s1130_s22 = smov 0  }
   0x3 LB: > { %s27_s23 = sadd.s32 1, %s1085_s21  ;;  %p50_p1 = scmp.ne.s32.totalorder %s1077_s19, %s1073_s18  ;;  %s1089_s22 = sphi %s1130_s22, %s15_s22   ;;  %s1085_s21 = sphi %s1128_s21, %s1269_s21   ;;  %s1081_s20 = sphi %s1126_s20, %s1268_s20   ;;  %s1077_s19 = sphi %s1124_s19, %s1267_s19   ;;  %s1073_s18 = sphi %s1122_s18, %s1266_s18  }
   0x4   : > { %p28_p0 = scmp.ge.s32.totalorder %s27_s23, 9  ;;  %p51_p2 = scmp.eq.s32.totalorder %s1089_s22, 0 }
   0x5   : > { %s43_s25 = sadd.s32 1, %s1077_s19  ;;  %p908_p5 = scmp.ge.s32.totalorder %s1089_s22, 9 }
   0x6   : > { %s1271_s23 = smov (%p28_p0, %s27_s23), 0  ;;  %p52_p3 = por %p51_p2, %p50_p1 }
   0x7   : > { %s39_s24 = ssub.s32 %s1085_s21, %s1271_s23  ;;  %243 = sbr.rel (%p908_p5) target bundleno = 21 (0x15), region = 28 }
   0x8   : > { %p41_p4 = scmp.eq.s32.totalorder %s39_s24, 0 }
   0xa   : > { %s1157_s26 = scalar_select %p41_p4, %s1077_s19, %s43_s25  }
   0xe   : > { %246 = sbr.rel (!%p52_p3) target bundleno = 21 (0x15), region = 32  ;;  %s248_s27 = sand.u32 (%p52_p3), 1, %s1077_s19  }
   0xf   : > { %s957_s28 = sshll.u32 (%p52_p3), %s1085_s21, 3  ;;  %s909_s29 = sshll.u32 (%p52_p3), %s248_s27, 4 }
  0x10   : > { %s256_s7 = scalar_lea.vmem (%p52_p3), %s1260_s0, %s957_s28  ;;  %s250_s8 = scalar_lea.vmem (%p52_p3), [#allocation3], %s909_s29 }
  0x11   : > { %v286_v0 = vld [vmem:[%s256_s7] sm:$0xff] (%p52_p3)  ;;  %v288_v1 = vld [vmem:[%s256_s7 + $0x48] sm:$0xff] (%p52_p3) }
  0x12   : > { %287 = vst [vmem:[%s250_s8] sm:$0xff] (%p52_p3), %v286_v0  ;;  %289 = vst [vmem:[%s250_s8 + $0x8] sm:$0xff] (%p52_p3), %v288_v1 }
  0x15 PF: > { %p912_p6 = scmp.ge.s32.totalorder %s1089_s22, 1  ;;  %p309_p7 = scmp.lt.s32.totalorder %s1089_s22, 10 }
  0x17   : > { %p310_p8 = pnand %p912_p6, %p309_p7 }
  0x18   : > { %s316_s9 = sand.u32 (!%p310_p8), 1, %s1073_s18   ;;  %s914_s10 = sshll.u32 (!%p310_p8), %s1081_s20, 5 }
  0x19   : > { %313 = sbr.rel (%p310_p8) target bundleno = 338 (0x152), region = 74  ;;  %s1169_s11 = sshll.u32 (!%p310_p8), %s316_s9, 4 }
  0x1a   : > { %p380_p9 = scmp.lt.s32.totalorder (!%p310_p8), %s914_s10, 287  ;;  %s318_s16 = scalar_lea.vmem (!%p310_p8), [#allocation3], %s1169_s11 }
  0x1b   : > { %p917_p10 = scmp.ne.s32.totalorder (!%p310_p8), %s1081_s20, 0 }
  0x20   : > { %s1273_s10 = smov (!%p380_p9, %s914_s10), 287  ;;  %427 = sbr.rel (%p917_p10) target bundleno = 39 (0x27), region = 82 }
  0x21   : > { %s958_s12 = sshll.u32 %s1273_s10, 3  ;;  %v1091_v2 = vmov (!%p917_p10), 0.0  }
  0x22   : > { %s1174_s15 = scalar_lea.vmem %s1261_s1, %s958_s12  ;;  %428 = vst [vmem:[#allocation2] sm:$0xff] (!%p917_p10), %v1091_v2  ;;  %429 = vst [vmem:[#allocation2 + $0x8] sm:$0xff] (!%p917_p10), %v1091_v2 }
  0x23   : > { %430 = vst [vmem:[#allocation2 + $0x10] sm:$0xff] (!%p917_p10), %v1091_v2  ;;  %431 = vst [vmem:[#allocation2 + $0x18] sm:$0xff] (!%p917_p10), %v1091_v2 }
  0x27 PF: > { %v1000_v3 = vld [vmem:[%s1174_s15 + $0x4] ss:$8 sps:$4 sm:$0xff]   ;;  %v1002_v4 = vld [vmem:[%s1174_s15] ss:$8 sps:$4 sm:$0xff]   ;;  %v1003_v5 = vld [vmem:[%s1174_s15 + $0x14] ss:$8 sps:$4 sm:$0xff]  }
  0x28   : > { %640 = vmatprep.subr.bf16.mxu0 %v1000_v3  ;;  %v1005_v6 = vld [vmem:[%s1174_s15 + $0x10] ss:$8 sps:$4 sm:$0xff]   ;;  %v1006_v7 = vld [vmem:[%s1174_s15 + $0x24] ss:$8 sps:$4 sm:$0xff]   ;;  %v1008_v8 = vld [vmem:[%s1174_s15 + $0x20] ss:$8 sps:$4 sm:$0xff]  }
  0x29   : > { %641 = vmatpush1.bf16.msra.mxu0 %v1002_v4  ;;  %v1009_v9 = vld [vmem:[%s1174_s15 + $0x34] ss:$8 sps:$4 sm:$0xff]   ;;  %v1011_v10 = vld [vmem:[%s1174_s15 + $0x30] ss:$8 sps:$4 sm:$0xff]   ;;  %v1012_v11 = vld [vmem:[%s1174_s15 + $0x44] ss:$8 sps:$4 sm:$0xff]  }
  0x2a   : > { %642 = vmatprep.subr.bf16.mxu0 %v1003_v5  ;;  %v1014_v12 = vld [vmem:[%s1174_s15 + $0x40] ss:$8 sps:$4 sm:$0xff]   ;;  %v1015_v13 = vld [vmem:[%s1174_s15 + $0x54] ss:$8 sps:$4 sm:$0xff]   ;;  %v1017_v14 = vld [vmem:[%s1174_s15 + $0x50] ss:$8 sps:$4 sm:$0xff]  }
  0x2b   : > { %v1018_v15 = vld [vmem:[%s1174_s15 + $0x64] ss:$8 sps:$4 sm:$0xff]   ;;  %v1020_v17 = vld [vmem:[%s1174_s15 + $0x60] ss:$8 sps:$4 sm:$0xff]   ;;  %v1021_v18 = vld [vmem:[%s1174_s15 + $0x74] ss:$8 sps:$4 sm:$0xff]  }
  0x2c   : > { %v1050_v16 = vld [vmem:[%s318_s16 + $0x4] ss:$8 sps:$4 sm:$0xff]   ;;  %v1023_v19 = vld [vmem:[%s1174_s15 + $0x70] ss:$8 sps:$4 sm:$0xff]   ;;  %v1026_v21 = vld [vmem:[%s1174_s15 + $0x80] ss:$8 sps:$4 sm:$0xff]  }
  0x2d   : > { %643 = vmatpush1.bf16.msra.mxu0 %v1005_v6  ;;  %672 = vmatprep.mubr.bf16.mxu0 %v1050_v16  ;;  %v1024_v20 = vld [vmem:[%s1174_s15 + $0x84] ss:$8 sps:$4 sm:$0xff]   ;;  %v1027_v22 = vld [vmem:[%s1174_s15 + $0x94] ss:$8 sps:$4 sm:$0xff]   ;;  %v1029_v23 = vld [vmem:[%s1174_s15 + $0x90] ss:$8 sps:$4 sm:$0xff]  }
  0x2e   : > { %644 = vmatprep.subr.bf16.mxu0 %v1006_v7  ;;  %v1030_v24 = vld [vmem:[%s1174_s15 + $0xa4] ss:$8 sps:$4 sm:$0xff]   ;;  %v1032_v25 = vld [vmem:[%s1174_s15 + $0xa0] ss:$8 sps:$4 sm:$0xff]   ;;  %v1033_v26 = vld [vmem:[%s1174_s15 + $0xb4] ss:$8 sps:$4 sm:$0xff]  }
  0x2f   : > { %v1035_v27 = vld [vmem:[%s1174_s15 + $0xb0] ss:$8 sps:$4 sm:$0xff]   ;;  %v1036_v28 = vld [vmem:[%s1174_s15 + $0xc4] ss:$8 sps:$4 sm:$0xff]   ;;  %v1038_v29 = vld [vmem:[%s1174_s15 + $0xc0] ss:$8 sps:$4 sm:$0xff]  }
  0x30   : > { %v1039_v30 = vld [vmem:[%s1174_s15 + $0xd4] ss:$8 sps:$4 sm:$0xff]   ;;  %v1041_v31 = vld [vmem:[%s1174_s15 + $0xd0] ss:$8 sps:$4 sm:$0xff]   ;;  %v1042_v32 = vld [vmem:[%s1174_s15 + $0xe4] ss:$8 sps:$4 sm:$0xff]  }
  0x31   : > { %645 = vmatpush1.bf16.msra.mxu0 %v1008_v8  ;;  %v1044_v33 = vld [vmem:[%s1174_s15 + $0xe0] ss:$8 sps:$4 sm:$0xff]   ;;  %v1045_v34 = vld [vmem:[%s1174_s15 + $0xf4] ss:$8 sps:$4 sm:$0xff]   ;;  %v1047_v35 = vld [vmem:[%s1174_s15 + $0xf0] ss:$8 sps:$4 sm:$0xff]  }
  0x32   : > { %646 = vmatprep.subr.bf16.mxu0 %v1009_v9  ;;  %v1048_v36 = vld [vmem:[%s318_s16] ss:$8 sps:$4 sm:$0xff]   ;;  %p952_p11 = scmp.ne.s32.totalorder %s1081_s20, 8 }
  0x33   : > { %v432_v37 = vld [vmem:[#allocation2] sm:$0xff]  ;;  %v433_v38 = vld [vmem:[#allocation2 + $0x8] sm:$0xff]  ;;  %v434_v40 = vld [vmem:[#allocation2 + $0x10] sm:$0xff]  ;;  %v701_v49 = vlaneseq (!%p952_p11) }
  0x34   : > { %v435_v43 = vld [vmem:[#allocation2 + $0x18] sm:$0xff]  ;;  %v699_v51 = vld [vmem:[%s1262_s2] sm:$0x3] (!%p952_p11)  ;;  %v732_v4 = vld [vmem:[%s1264_s4 + $0x8] sm:$0xff] (!%p952_p11) }
  0x35   : > { %647 = vmatpush1.bf16.msra.mxu0 %v1011_v10  ;;  %v702_v50 = vshrl.u32 (!%p952_p11), %v701_v49, 7  ;;  %v715_v52 = vld [vmem:[%s1263_s3] sm:$0x3] (!%p952_p11)  ;;  %v733_v5 = vld [vmem:[%s1264_s4 + $0x10] sm:$0xff] (!%p952_p11)  ;;  %v734_v6 = vld [vmem:[%s1264_s4 + $0x18] sm:$0xff] (!%p952_p11) }
  0x36   : > { %648 = vmatprep.subr.bf16.mxu0 %v1012_v11  ;;  %v731_v0 = vld [vmem:[%s1264_s4] sm:$0xff] (!%p952_p11) }
  0x37   : > { %v703_v54 = vsub.s32 (!%p952_p11), 0, %v702_v50  ;;  %v707_v55 = vsub.s32 (!%p952_p11), 1, %v702_v50 }
  0x39   : > { %649 = vmatpush1.bf16.msra.mxu0 %v1014_v12  ;;  %v704_v59 = vrot.slane (!%p952_p11), %v699_v51, %v703_v54  ;;  %v720_v60 = vrot.slane (!%p952_p11), %v715_v52, %v703_v54  ;;  %v708_v61 = vrot.slane (!%p952_p11), %v699_v51, %v707_v55  ;;  %v724_v62 = vrot.slane (!%p952_p11), %v715_v52, %v707_v55 }
  0x3a   : > { %650 = vmatprep.subr.bf16.mxu0 %v1015_v13 }
  0x3d   : > { %651 = vmatpush1.bf16.msra.mxu0 %v1017_v14 }
  0x3e   : > { %652 = vmatprep.subr.bf16.mxu0 %v1018_v15 }
  0x41   : > { %653 = vmatpush1.bf16.msra.mxu0 %v1020_v17 }
  0x42   : > { %654 = vmatprep.subr.bf16.mxu0 %v1021_v18 }
  0x45   : > { %655 = vmatpush1.bf16.msra.mxu0 %v1023_v19 }
  0x46   : > { %656 = vmatprep.subr.bf16.mxu0 %v1024_v20 }
  0x49   : > { %657 = vmatpush1.bf16.msra.mxu0 %v1026_v21 }
  0x4a   : > { %658 = vmatprep.subr.bf16.mxu0 %v1027_v22 }
  0x4d   : > { %659 = vmatpush1.bf16.msra.mxu0 %v1029_v23 }
  0x4e   : > { %660 = vmatprep.subr.bf16.mxu0 %v1030_v24 }
  0x51   : > { %661 = vmatpush1.bf16.msra.mxu0 %v1032_v25 }
  0x52   : > { %662 = vmatprep.subr.bf16.mxu0 %v1033_v26 }
  0x55   : > { %663 = vmatpush1.bf16.msra.mxu0 %v1035_v27 }
  0x56   : > { %664 = vmatprep.subr.bf16.mxu0 %v1036_v28 }
  0x59   : > { %665 = vmatpush1.bf16.msra.mxu0 %v1038_v29 }
  0x5a   : > { %666 = vmatprep.subr.bf16.mxu0 %v1039_v30 }
  0x5d   : > { %667 = vmatpush1.bf16.msra.mxu0 %v1041_v31 }
  0x5e   : > { %668 = vmatprep.subr.bf16.mxu0 %v1042_v32 }
  0x61   : > { %669 = vmatpush1.bf16.msra.mxu0 %v1044_v33 }
  0x62   : > { %670 = vmatprep.subr.bf16.mxu0 %v1045_v34 }
  0x65   : > { %671 = vmatpush1.bf16.msra.mxu0 %v1047_v35 }
  0x68   : > { %673 = vmatmul.mubr.bf16.vlgmr.msra.gmra.mrb[0].mxu0 %v1048_v36 }
 0x13b   : > { %v674_v39 = vpop.f32.mrb[0].mxu0  ;;  %694 = sbr.rel (%p952_p11) target bundleno = 338 (0x152), region = 86 }
 0x13c   : > { %v683_v41 = vadd.f32 %v674_v39, %v432_v37  ;;  %v676_v42 = vpop.f32.mrb[1].mxu0 }
 0x13d   : > { %v684_v44 = vadd.f32 %v676_v42, %v433_v38  ;;  %v678_v45 = vpop.f32.mrb[2].mxu0 }
 0x13e   : > { %687 = vst [vmem:[#allocation2] sm:$0xff] %v683_v41  ;;  %v685_v46 = vadd.f32 %v678_v45, %v434_v40  ;;  %v680_v47 = vpop.f32.mrb[3].mxu0 }
 0x13f   : > { %688 = vst [vmem:[#allocation2 + $0x8] sm:$0xff] %v684_v44  ;;  %v686_v48 = vadd.f32 %v680_v47, %v435_v43 }
 0x140   : > { %689 = vst [vmem:[#allocation2 + $0x10] sm:$0xff] %v685_v46 }
 0x141   : > { %690 = vst [vmem:[#allocation2 + $0x18] sm:$0xff] %v686_v48 }
 0x145   : > { %v695_v53 = vld [vmem:[#allocation2] sm:$0xff] }
 0x146   : > { %v696_v56 = vld [vmem:[#allocation2 + $0x8] sm:$0xff]  ;;  %v711_v63 = vmul.f32 %v704_v59, %v695_v53 }
 0x147   : > { %v697_v57 = vld [vmem:[#allocation2 + $0x10] sm:$0xff]  ;;  %v712_v1 = vmul.f32 %v708_v61, %v696_v56 }
 0x148   : > { %v698_v58 = vld [vmem:[#allocation2 + $0x18] sm:$0xff]  ;;  %v713_v2 = vmul.f32 %v704_v59, %v697_v57  ;;  %v727_v7 = vadd.f32 %v720_v60, %v711_v63 }
 0x149   : > { %v714_v3 = vmul.f32 %v708_v61, %v698_v58  ;;  %v728_v8 = vadd.f32 %v724_v62, %v712_v1 }
 0x14a   : > { %v729_v9 = vadd.f32 %v720_v60, %v713_v2  ;;  %v735_v11 = vadd.f32 %v731_v0, %v727_v7 }
 0x14b   : > { %v730_v10 = vadd.f32 %v724_v62, %v714_v3  ;;  %v736_v12 = vadd.f32 %v732_v4, %v728_v8 }
 0x14c   : > { %v737_v13 = vadd.f32 %v733_v5, %v729_v9  ;;  %v739_v15 = vmax.f32 %v735_v11, 0.0 }
 0x14d   : > { %v738_v14 = vadd.f32 %v734_v6, %v730_v10  ;;  %v740_v16 = vmax.f32 %v736_v12, 0.0 }
 0x14e   : > { %v741_v17 = vmax.f32 %v737_v13, 0.0  ;;  %743 = vst [vmem:[%s1265_s5] sm:$0xff] %v739_v15 }
 0x14f   : > { %v742_v18 = vmax.f32 %v738_v14, 0.0  ;;  %744 = vst [vmem:[%s1265_s5 + $0x8] sm:$0xff] %v740_v16 }
 0x150   : > { %745 = vst [vmem:[%s1265_s5 + $0x10] sm:$0xff] %v741_v17 }
 0x151   : > { %746 = vst [vmem:[%s1265_s5 + $0x18] sm:$0xff] %v742_v18 }
 0x152 PF: > { %s15_s22 = sadd.s32 1, %s1089_s22   ;;  %s1266_s18 = smov %s1077_s19 }
 0x153   : > { %p12_p12 = scmp.ge.s32.totalorder %s15_s22, 11   ;;  %s1267_s19 = smov %s1157_s26 }
 0x154   : > { %s1268_s20 = smov %s1085_s21  ;;  %s1269_s21 = smov %s1271_s23 }
 0x155   :  { %14 = sbr.rel (!%p12_p12) target bundleno = 3 (0x3), region = 133 }

// kernel: resnet_forward.22
= control target key start
LH: loop header
LB: loop body
LE: loop exit
PB: predicated region body
PF: predicated region fallthrough
CT: control target
= control target key end

     0   :  { %s1268_s15 = smov 0   ;;  %s1270_s16 = smov 0   ;;  %s1568_s0 = inlined_call_operand.vmem [shape: bf16[16,2304], index: 0, kind: input, shape index: {}]   ;;  %s1569_s1 = inlined_call_operand.vmem [shape: bf16[2304,512], index: 1, kind: input, shape index: {}]   ;;  %s1570_s2 = inlined_call_operand.vmem [shape: f32[1,512], index: 2, kind: input, shape index: {}]   ;;  %s1571_s3 = inlined_call_operand.vmem [shape: f32[1,512], index: 3, kind: input, shape index: {}]   ;;  %s1572_s4 = inlined_call_operand.vmem [shape: f32[16,512], index: 4, kind: output, shape index: {}]  }
   0x1   :  { %s1272_s17 = smov 0   ;;  %s1274_s18 = smov 0  }
   0x2   :  { %s1276_s19 = smov 0   ;;  %s1278_s20 = smov 0  }
   0x3   :  { %s1280_s21 = smov 0   ;;  %s1282_s22 = smov 0  }
   0x4   :  { %s1284_s23 = smov 0   ;;  %s1286_s24 = smov 0  }
   0x5   :  { %s1288_s25 = smov 0  }
   0x6 LB: > { %1576 = sst [smem:[#allocation6_spill]] %s1220_s20  ;;  %s952_s26 = sadd.s32 4294967295, %s1240_s25   ;;  %s1240_s25 = sphi %s1288_s25, %s14_s25   ;;  %s1236_s24 = sphi %s1286_s24, %s1594_s24   ;;  %s1232_s23 = sphi %s1284_s23, %s1593_s23   ;;  %s1228_s22 = sphi %s1282_s22, %s1592_s22   ;;  %s1224_s21 = sphi %s1280_s21, %s1591_s21   ;;  %s1220_s20 = sphi %s1278_s20, %s1584_s20   ;;  %s1216_s19 = sphi %s1276_s19, %s1583_s19   ;;  %s1212_s18 = sphi %s1274_s18, %s1590_s18   ;;  %s1208_s17 = sphi %s1272_s17, %s1589_s17   ;;  %s1204_s16 = sphi %s1270_s16, %s1588_s16   ;;  %s1200_s15 = sphi %s1268_s15, %s1587_s15  }
   0x7   : > { %s26_s27 = sadd.s32 1, %s1232_s23  ;;  %s29_s28 = sadd.s32 1, %s1236_s24 }
   0x8   : > { %p27_p0 = scmp.ge.s32.totalorder %s26_s27, 9  ;;  %s42_s29 = sadd.s32 1, %s1220_s20 }
   0x9   : > { %p49_p1 = scmp.ne.s32.totalorder %s1220_s20, %s1216_s19  ;;  %p50_p2 = scmp.eq.s32.totalorder %s1240_s25, 0 }
   0xa   : > { %s1596_s27 = smov (%p27_p0, %s26_s27), 0  ;;  %s1598_s28 = smov (!%p27_p0, %s29_s28), %s1236_s24 }
   0xb   : > { %1577 = sst [smem:[#allocation7_spill]] %s1596_s27  ;;  %s38_s30 = ssub.s32 %s1232_s23, %s1596_s27 }
   0xc   : > { %p31_p3 = scmp.ge.s32.totalorder %s1598_s28, 2  ;;  %p40_p4 = scmp.eq.s32.totalorder %s38_s30, 0 }
   0xd   : > { %p1335_p5 = por %p50_p2, %p49_p1  ;;  %s70_s6 = sadd.s32 1, %s1212_s18 }
   0xe   : > { %s1600_s28 = smov (%p31_p3, %s1598_s28), 0  ;;  %p77_p6 = scmp.ne.s32.totalorder %s1212_s18, %s1208_s17 }
   0xf   : > { %1579 = sst [smem:[#allocation8_spill]] %s1600_s28  ;;  %s66_s8 = ssub.s32 %s1236_s24, %s1600_s28 }
  0x10   : > { %s1343_s7 = scalar_select %p40_p4, %s1220_s20, %s42_s29  }
  0x11   : > { %s67_s9 = sor.u32 %s66_s8, %s38_s30  ;;  %p148_p7 = scmp.eq.s32.totalorder %s66_s8, 0 }
  0x12   : > { %1580 = sst [smem:[#allocation9_spill]] %s1343_s7  ;;  %p68_p8 = scmp.eq.s32.totalorder %s67_s9, 0 }
  0x13   : > { %p1349_p9 = por %p77_p6, %p50_p2  ;;  %s150_s11 = sadd.s32 1, %s1204_s16 }
  0x14   : > { %p160_p10 = scmp.ne.s32.totalorder %s1204_s16, %s1200_s15  ;;  %p161_p11 = scmp.eq.s32.totalorder %s952_s26, 17 }
  0x15   : > { %s1357_s12 = scalar_select %p68_p8, %s1212_s18, %s70_s6  }
  0x16   : > { %s1360_s13 = scalar_select %p148_p7, %s1204_s16, %s150_s11  }
  0x17   : > { %p1362_p12 = por %p161_p11, %p160_p10  ;;  %p955_p13 = scmp.ge.s32.totalorder %s1240_s25, 18 }
  0x19   : > { %183 = sbr.rel (%p955_p13) target bundleno = 62 (0x3e), region = 16 }
  0x20   : > { %186 = sbr.rel (!%p1335_p5) target bundleno = 39 (0x27), region = 20  ;;  %s188_s29 = sand.u32 (%p1335_p5), 1, %s1220_s20  }
  0x21   : > { %s1011_s30 = sshll.u32 (%p1335_p5), %s1232_s23, 3  ;;  %s956_s8 = sshll.u32 (%p1335_p5), %s188_s29, 4 }
  0x22   : > { %s196_s11 = scalar_lea.vmem (%p1335_p5), %s1568_s0, %s1011_s30  ;;  %s190_s26 = scalar_lea.vmem (%p1335_p5), [#allocation3], %s956_s8 }
  0x23   : > { %v226_v0 = vld [vmem:[%s196_s11] sm:$0xff] (%p1335_p5)  ;;  %v228_v1 = vld [vmem:[%s196_s11 + $0x48] sm:$0xff] (%p1335_p5) }
  0x24   : > { %227 = vst [vmem:[%s190_s26] sm:$0xff] (%p1335_p5), %v226_v0  ;;  %229 = vst [vmem:[%s190_s26 + $0x8] sm:$0xff] (%p1335_p5), %v228_v1 }
  0x27 PF: > { %235 = sbr.rel (!%p1349_p9) target bundleno = 62 (0x3e), region = 58  ;;  %s237_s5 = sand.u32 (%p1349_p9), 1, %s1212_s18  }
  0x28   : > { %s961_s28 = sshll.u32 (%p1349_p9), %s1236_s24, 1  ;;  %s959_s27 = sshll.u32 (%p1349_p9), %s237_s5, 8 }
  0x29   : > { %s1012_s29 = sshll.u32 (%p1349_p9), %s1232_s23, 7  ;;  %s1387_s10 = scalar_lea.vmem (%p1349_p9), [#allocation4], %s959_s27 }
  0x2a   : > { %s243_s7 = sadd.s32 (%p1349_p9), %s1012_s29, %s961_s28 }
  0x2b   : > { %s963_s20 = sshll.u32 (%p1349_p9), %s243_s7, 2 }
  0x2c   : > { %s1382_s9 = scalar_lea.vmem (%p1349_p9), %s1569_s1, %s963_s20 }
  0x2d   : > { %v335_v2 = vld [vmem:[%s1382_s9] sm:$0xff] (%p1349_p9)  ;;  %v337_v3 = vld [vmem:[%s1382_s9 + $0x10] sm:$0xff] (%p1349_p9) }
  0x2e   : > { %v339_v4 = vld [vmem:[%s1382_s9 + $0x20] sm:$0xff]  ;;  %336 = vst [vmem:[%s1387_s10] sm:$0xff] %v335_v2  ;;  %338 = vst [vmem:[%s1387_s10 + $0x8] sm:$0xff] %v337_v3  ;;  %v341_v5 = vld [vmem:[%s1382_s9 + $0x30] sm:$0xff] }
  0x2f   : > { %340 = vst [vmem:[%s1387_s10 + $0x10] sm:$0xff] %v339_v4  ;;  %v343_v6 = vld [vmem:[%s1382_s9 + $0x40] sm:$0xff]  ;;  %v345_v7 = vld [vmem:[%s1382_s9 + $0x50] sm:$0xff]  ;;  %342 = vst [vmem:[%s1387_s10 + $0x18] sm:$0xff] %v341_v5 }
  0x30   : > { %344 = vst [vmem:[%s1387_s10 + $0x20] sm:$0xff] %v343_v6  ;;  %346 = vst [vmem:[%s1387_s10 + $0x28] sm:$0xff] %v345_v7  ;;  %v347_v8 = vld [vmem:[%s1382_s9 + $0x60] sm:$0xff]  ;;  %v349_v9 = vld [vmem:[%s1382_s9 + $0x70] sm:$0xff] }
  0x31   : > { %v351_v10 = vld [vmem:[%s1382_s9 + $0x80] sm:$0xff]  ;;  %348 = vst [vmem:[%s1387_s10 + $0x30] sm:$0xff] %v347_v8  ;;  %350 = vst [vmem:[%s1387_s10 + $0x38] sm:$0xff] %v349_v9  ;;  %v353_v11 = vld [vmem:[%s1382_s9 + $0x90] sm:$0xff] }
  0x32   : > { %352 = vst [vmem:[%s1387_s10 + $0x40] sm:$0xff] %v351_v10  ;;  %v355_v12 = vld [vmem:[%s1382_s9 + $0xa0] sm:$0xff]  ;;  %v357_v13 = vld [vmem:[%s1382_s9 + $0xb0] sm:$0xff]  ;;  %354 = vst [vmem:[%s1387_s10 + $0x48] sm:$0xff] %v353_v11 }
  0x33   : > { %356 = vst [vmem:[%s1387_s10 + $0x50] sm:$0xff] %v355_v12  ;;  %358 = vst [vmem:[%s1387_s10 + $0x58] sm:$0xff] %v357_v13  ;;  %v359_v14 = vld [vmem:[%s1382_s9 + $0xc0] sm:$0xff]  ;;  %v361_v15 = vld [vmem:[%s1382_s9 + $0xd0] sm:$0xff] }
  0x34   : > { %v363_v16 = vld [vmem:[%s1382_s9 + $0xe0] sm:$0xff]  ;;  %360 = vst [vmem:[%s1387_s10 + $0x60] sm:$0xff] %v359_v14  ;;  %362 = vst [vmem:[%s1387_s10 + $0x68] sm:$0xff] %v361_v15  ;;  %v365_v17 = vld [vmem:[%s1382_s9 + $0xf0] sm:$0xff] }
  0x35   : > { %364 = vst [vmem:[%s1387_s10 + $0x70] sm:$0xff] %v363_v16  ;;  %v367_v18 = vld [vmem:[%s1382_s9 + $0x100] sm:$0xff]  ;;  %v369_v19 = vld [vmem:[%s1382_s9 + $0x110] sm:$0xff]  ;;  %366 = vst [vmem:[%s1387_s10 + $0x78] sm:$0xff] %v365_v17 }
  0x36   : > { %368 = vst [vmem:[%s1387_s10 + $0x80] sm:$0xff] %v367_v18  ;;  %370 = vst [vmem:[%s1387_s10 + $0x88] sm:$0xff] %v369_v19  ;;  %v371_v20 = vld [vmem:[%s1382_s9 + $0x120] sm:$0xff]  ;;  %v373_v21 = vld [vmem:[%s1382_s9 + $0x130] sm:$0xff] }
  0x37   : > { %v375_v22 = vld [vmem:[%s1382_s9 + $0x140] sm:$0xff]  ;;  %372 = vst [vmem:[%s1387_s10 + $0x90] sm:$0xff] %v371_v20  ;;  %374 = vst [vmem:[%s1387_s10 + $0x98] sm:$0xff] %v373_v21  ;;  %v377_v23 = vld [vmem:[%s1382_s9 + $0x150] sm:$0xff] }
  0x38   : > { %376 = vst [vmem:[%s1387_s10 + $0xa0] sm:$0xff] %v375_v22  ;;  %v379_v24 = vld [vmem:[%s1382_s9 + $0x160] sm:$0xff]  ;;  %v381_v25 = vld [vmem:[%s1382_s9 + $0x170] sm:$0xff]  ;;  %378 = vst [vmem:[%s1387_s10 + $0xa8] sm:$0xff] %v377_v23 }
  0x39   : > { %380 = vst [vmem:[%s1387_s10 + $0xb0] sm:$0xff] %v379_v24  ;;  %382 = vst [vmem:[%s1387_s10 + $0xb8] sm:$0xff] %v381_v25  ;;  %v383_v26 = vld [vmem:[%s1382_s9 + $0x180] sm:$0xff]  ;;  %v385_v27 = vld [vmem:[%s1382_s9 + $0x190] sm:$0xff] }
  0x3a   : > { %v387_v28 = vld [vmem:[%s1382_s9 + $0x1a0] sm:$0xff]  ;;  %384 = vst [vmem:[%s1387_s10 + $0xc0] sm:$0xff] %v383_v26  ;;  %386 = vst [vmem:[%s1387_s10 + $0xc8] sm:$0xff] %v385_v27  ;;  %v389_v29 = vld [vmem:[%s1382_s9 + $0x1b0] sm:$0xff] }
  0x3b   : > { %388 = vst [vmem:[%s1387_s10 + $0xd0] sm:$0xff] %v387_v28  ;;  %v391_v30 = vld [vmem:[%s1382_s9 + $0x1c0] sm:$0xff]  ;;  %v393_v31 = vld [vmem:[%s1382_s9 + $0x1d0] sm:$0xff]  ;;  %390 = vst [vmem:[%s1387_s10 + $0xd8] sm:$0xff] %v389_v29 }
  0x3c   : > { %392 = vst [vmem:[%s1387_s10 + $0xe0] sm:$0xff] %v391_v30  ;;  %394 = vst [vmem:[%s1387_s10 + $0xe8] sm:$0xff] %v393_v31  ;;  %v395_v32 = vld [vmem:[%s1382_s9 + $0x1e0] sm:$0xff]  ;;  %v397_v33 = vld [vmem:[%s1382_s9 + $0x1f0] sm:$0xff] }
  0x3d   : > { %396 = vst [vmem:[%s1387_s10 + $0xf0] sm:$0xff] %v395_v32  ;;  %398 = vst [vmem:[%s1387_s10 + $0xf8] sm:$0xff] %v397_v33 }
  0x3e PF: > { %p964_p0 = scmp.ge.s32.totalorder %s1240_s25, 1  ;;  %p419_p1 = scmp.lt.s32.totalorder %s1240_s25, 19 }
  0x40   : > { %p420_p2 = pnand %p964_p0, %p419_p1 }
  0x41   : > { %s426_s20 = sand.u32 (!%p420_p2), 1, %s1216_s19   ;;  %s433_s27 = sand.u32 (!%p420_p2), 1, %s1208_s17  }
  0x42   : > { %423 = sbr.rel (%p420_p2) target bundleno = 385 (0x181), region = 104  ;;  %s1454_s28 = sshll.u32 (!%p420_p2), %s426_s20, 4 }
  0x43   : > { %s966_s7 = sshll.u32 (!%p420_p2), %s433_s27, 8  ;;  %s466_s8 = sand.u32 (!%p420_p2), 1, %s1200_s15  }
  0x44   : > { %s968_s11 = sshll.u32 (!%p420_p2), %s1228_s22, 1  ;;  %s967_s26 = sshll.u32 (!%p420_p2), %s466_s8, 5 }
  0x45   : > { %p474_p3 = scmp.lt.s32.totalorder (!%p420_p2), %s968_s11, 3  ;;  %s428_s19 = scalar_lea.vmem (!%p420_p2), [#allocation3], %s1454_s28 }
  0x46   : > { %s1469_s10 = scalar_lea.vmem (!%p420_p2), [#allocation4], %s966_s7  ;;  %s1471_s20 = scalar_lea.vmem (!%p420_p2), [#allocation5], %s967_s26 }
  0x47   : > { %p970_p4 = scmp.ne.s32.totalorder (!%p420_p2), %s1224_s21, 0 }
  0x49   : > { %s1602_s11 = smov (!%p474_p3, %s968_s11), 3  ;;  %488 = sbr.rel (%p970_p4) target bundleno = 80 (0x50), region = 116 }
  0x4a   : > { %s476_s6 = scalar_lea.vmem %s1570_s2, %s1602_s11  ;;  %s481_s17 = scalar_lea.vmem %s1571_s3, %s1602_s11  ;;  %v1242_v34 = vmov (!%p970_p4), 0.0  }
  0x4b   : > { %489 = vst [vmem:[#allocation2] sm:$0xff] (!%p970_p4), %v1242_v34  ;;  %490 = vst [vmem:[#allocation2 + $0x8] sm:$0xff] (!%p970_p4), %v1242_v34 }
  0x4c   : > { %491 = vst [vmem:[#allocation2 + $0x10] sm:$0xff] (!%p970_p4), %v1242_v34  ;;  %492 = vst [vmem:[#allocation2 + $0x18] sm:$0xff] (!%p970_p4), %v1242_v34 }
  0x50 PF: > { %v1103_v35 = vld [vmem:[%s1469_s10 + $0x4] ss:$8 sps:$4 sm:$0xff]   ;;  %v1105_v36 = vld [vmem:[%s1469_s10] ss:$8 sps:$4 sm:$0xff]   ;;  %v1106_v37 = vld [vmem:[%s1469_s10 + $0x14] ss:$8 sps:$4 sm:$0xff]  }
  0x51   : > { %701 = vmatprep.subr.bf16.mxu0 %v1103_v35  ;;  %v1108_v38 = vld [vmem:[%s1469_s10 + $0x10] ss:$8 sps:$4 sm:$0xff]   ;;  %v1109_v39 = vld [vmem:[%s1469_s10 + $0x24] ss:$8 sps:$4 sm:$0xff]   ;;  %v1111_v40 = vld [vmem:[%s1469_s10 + $0x20] ss:$8 sps:$4 sm:$0xff]  }
  0x52   : > { %702 = vmatpush1.bf16.msra.mxu0 %v1105_v36  ;;  %v1112_v41 = vld [vmem:[%s1469_s10 + $0x34] ss:$8 sps:$4 sm:$0xff]   ;;  %v1114_v42 = vld [vmem:[%s1469_s10 + $0x30] ss:$8 sps:$4 sm:$0xff]   ;;  %v1115_v43 = vld [vmem:[%s1469_s10 + $0x44] ss:$8 sps:$4 sm:$0xff]  }
  0x53   : > { %703 = vmatprep.subr.bf16.mxu0 %v1106_v37  ;;  %v1117_v44 = vld [vmem:[%s1469_s10 + $0x40] ss:$8 sps:$4 sm:$0xff]   ;;  %v1118_v45 = vld [vmem:[%s1469_s10 + $0x54] ss:$8 sps:$4 sm:$0xff]   ;;  %v1120_v46 = vld [vmem:[%s1469_s10 + $0x50] ss:$8 sps:$4 sm:$0xff]  }
  0x54   : > { %v1121_v47 = vld [vmem:[%s1469_s10 + $0x64] ss:$8 sps:$4 sm:$0xff]   ;;  %v1123_v49 = vld [vmem:[%s1469_s10 + $0x60] ss:$8 sps:$4 sm:$0xff]   ;;  %v1124_v50 = vld [vmem:[%s1469_s10 + $0x74] ss:$8 sps:$4 sm:$0xff]  }
  0x55   : > { %v1153_v48 = vld [vmem:[%s428_s19 + $0x4] ss:$8 sps:$4 sm:$0xff]   ;;  %v1126_v51 = vld [vmem:[%s1469_s10 + $0x70] ss:$8 sps:$4 sm:$0xff]   ;;  %v1129_v53 = vld [vmem:[%s1469_s10 + $0x80] ss:$8 sps:$4 sm:$0xff]  }
  0x56   : > { %704 = vmatpush1.bf16.msra.mxu0 %v1108_v38  ;;  %733 = vmatprep.mubr.bf16.mxu0 %v1153_v48  ;;  %v1127_v52 = vld [vmem:[%s1469_s10 + $0x84] ss:$8 sps:$4 sm:$0xff]   ;;  %v1130_v54 = vld [vmem:[%s1469_s10 + $0x94] ss:$8 sps:$4 sm:$0xff]   ;;  %v1132_v55 = vld [vmem:[%s1469_s10 + $0x90] ss:$8 sps:$4 sm:$0xff]  }
  0x57   : > { %705 = vmatprep.subr.bf16.mxu0 %v1109_v39  ;;  %v1133_v56 = vld [vmem:[%s1469_s10 + $0xa4] ss:$8 sps:$4 sm:$0xff]   ;;  %v1135_v57 = vld [vmem:[%s1469_s10 + $0xa0] ss:$8 sps:$4 sm:$0xff]   ;;  %v1136_v58 = vld [vmem:[%s1469_s10 + $0xb4] ss:$8 sps:$4 sm:$0xff]  }
  0x58   : > { %v1138_v59 = vld [vmem:[%s1469_s10 + $0xb0] ss:$8 sps:$4 sm:$0xff]   ;;  %v1139_v60 = vld [vmem:[%s1469_s10 + $0xc4] ss:$8 sps:$4 sm:$0xff]   ;;  %v1141_v61 = vld [vmem:[%s1469_s10 + $0xc0] ss:$8 sps:$4 sm:$0xff]  }
  0x59   : > { %v1142_v62 = vld [vmem:[%s1469_s10 + $0xd4] ss:$8 sps:$4 sm:$0xff]   ;;  %v1144_v63 = vld [vmem:[%s1469_s10 + $0xd0] ss:$8 sps:$4 sm:$0xff]   ;;  %v1145_v0 = vld [vmem:[%s1469_s10 + $0xe4] ss:$8 sps:$4 sm:$0xff]  }
  0x5a   : > { %706 = vmatpush1.bf16.msra.mxu0 %v1111_v40  ;;  %v1147_v1 = vld [vmem:[%s1469_s10 + $0xe0] ss:$8 sps:$4 sm:$0xff]   ;;  %v1148_v2 = vld [vmem:[%s1469_s10 + $0xf4] ss:$8 sps:$4 sm:$0xff]   ;;  %v1150_v3 = vld [vmem:[%s1469_s10 + $0xf0] ss:$8 sps:$4 sm:$0xff]  }
  0x5b   : > { %707 = vmatprep.subr.bf16.mxu0 %v1112_v41  ;;  %v1151_v4 = vld [vmem:[%s428_s19] ss:$8 sps:$4 sm:$0xff]   ;;  %p1005_p5 = scmp.ne.s32.totalorder %s1224_s21, 8 }
  0x5c   : > { %v493_v5 = vld [vmem:[#allocation2] sm:$0xff]  ;;  %v494_v6 = vld [vmem:[#allocation2 + $0x8] sm:$0xff]  ;;  %v495_v8 = vld [vmem:[#allocation2 + $0x10] sm:$0xff]  ;;  %v762_v17 = vlaneseq (!%p1005_p5) }
  0x5d   : > { %v496_v11 = vld [vmem:[#allocation2 + $0x18] sm:$0xff]  ;;  %v760_v19 = vld [vmem:[%s476_s6] sm:$0x3] (!%p1005_p5) }
  0x5e   : > { %708 = vmatpush1.bf16.msra.mxu0 %v1114_v42  ;;  %v763_v18 = vshrl.u32 (!%p1005_p5), %v762_v17, 7  ;;  %v776_v20 = vld [vmem:[%s481_s17] sm:$0x3] (!%p1005_p5) }
  0x5f   : > { %709 = vmatprep.subr.bf16.mxu0 %v1115_v43 }
  0x60   : > { %v764_v22 = vsub.s32 (!%p1005_p5), 0, %v763_v18  ;;  %v768_v23 = vsub.s32 (!%p1005_p5), 1, %v763_v18 }
  0x62   : > { %710 = vmatpush1.bf16.msra.mxu0 %v1117_v44  ;;  %v765_v27 = vrot.slane (!%p1005_p5), %v760_v19, %v764_v22  ;;  %v781_v28 = vrot.slane (!%p1005_p5), %v776_v20, %v764_v22  ;;  %v769_v29 = vrot.slane (!%p1005_p5), %v760_v19, %v768_v23  ;;  %v785_v30 = vrot.slane (!%p1005_p5), %v776_v20, %v768_v23 }
  0x63   : > { %711 = vmatprep.subr.bf16.mxu0 %v1118_v45 }
  0x66   : > { %712 = vmatpush1.bf16.msra.mxu0 %v1120_v46 }
  0x67   : > { %713 = vmatprep.subr.bf16.mxu0 %v1121_v47 }
  0x6a   : > { %714 = vmatpush1.bf16.msra.mxu0 %v1123_v49 }
  0x6b   : > { %715 = vmatprep.subr.bf16.mxu0 %v1124_v50 }
  0x6e   : > { %716 = vmatpush1.bf16.msra.mxu0 %v1126_v51 }
  0x6f   : > { %717 = vmatprep.subr.bf16.mxu0 %v1127_v52 }
  0x72   : > { %718 = vmatpush1.bf16.msra.mxu0 %v1129_v53 }
  0x73   : > { %719 = vmatprep.subr.bf16.mxu0 %v1130_v54 }
  0x76   : > { %720 = vmatpush1.bf16.msra.mxu0 %v1132_v55 }
  0x77   : > { %721 = vmatprep.subr.bf16.mxu0 %v1133_v56 }
  0x7a   : > { %722 = vmatpush1.bf16.msra.mxu0 %v1135_v57 }
  0x7b   : > { %723 = vmatprep.subr.bf16.mxu0 %v1136_v58 }
  0x7e   : > { %724 = vmatpush1.bf16.msra.mxu0 %v1138_v59 }
  0x7f   : > { %725 = vmatprep.subr.bf16.mxu0 %v1139_v60 }
  0x82   : > { %726 = vmatpush1.bf16.msra.mxu0 %v1141_v61 }
  0x83   : > { %727 = vmatprep.subr.bf16.mxu0 %v1142_v62 }
  0x86   : > { %728 = vmatpush1.bf16.msra.mxu0 %v1144_v63 }
  0x87   : > { %729 = vmatprep.subr.bf16.mxu0 %v1145_v0 }
  0x8a   : > { %730 = vmatpush1.bf16.msra.mxu0 %v1147_v1 }
  0x8b   : > { %731 = vmatprep.subr.bf16.mxu0 %v1148_v2 }
  0x8e   : > { %732 = vmatpush1.bf16.msra.mxu0 %v1150_v3 }
  0x91   : > { %734 = vmatmul.mubr.bf16.vlgmr.msra.gmra.mrb[0].mxu0 %v1151_v4 }
 0x164   : > { %v735_v7 = vpop.f32.mrb[0].mxu0  ;;  %755 = sbr.rel (%p1005_p5) target bundleno = 377 (0x179), region = 120 }
 0x165   : > { %v744_v9 = vadd.f32 %v735_v7, %v493_v5  ;;  %v737_v10 = vpop.f32.mrb[1].mxu0 }
 0x166   : > { %v745_v12 = vadd.f32 %v737_v10, %v494_v6  ;;  %v739_v13 = vpop.f32.mrb[2].mxu0 }
 0x167   : > { %748 = vst [vmem:[#allocation2] sm:$0xff] %v744_v9  ;;  %v746_v14 = vadd.f32 %v739_v13, %v495_v8  ;;  %v741_v15 = vpop.f32.mrb[3].mxu0 }
 0x168   : > { %749 = vst [vmem:[#allocation2 + $0x8] sm:$0xff] %v745_v12  ;;  %v747_v16 = vadd.f32 %v741_v15, %v496_v11 }
 0x169   : > { %750 = vst [vmem:[#allocation2 + $0x10] sm:$0xff] %v746_v14 }
 0x16a   : > { %751 = vst [vmem:[#allocation2 + $0x18] sm:$0xff] %v747_v16 }
 0x16e   : > { %v756_v21 = vld [vmem:[#allocation2] sm:$0xff] }
 0x16f   : > { %v757_v24 = vld [vmem:[#allocation2 + $0x8] sm:$0xff]  ;;  %v772_v31 = vmul.f32 %v765_v27, %v756_v21 }
 0x170   : > { %v758_v25 = vld [vmem:[#allocation2 + $0x10] sm:$0xff]  ;;  %v773_v32 = vmul.f32 %v769_v29, %v757_v24 }
 0x171   : > { %v759_v26 = vld [vmem:[#allocation2 + $0x18] sm:$0xff]  ;;  %v774_v33 = vmul.f32 %v765_v27, %v758_v25  ;;  %v788_v35 = vadd.f32 %v781_v28, %v772_v31 }
 0x172   : > { %v775_v34 = vmul.f32 %v769_v29, %v759_v26  ;;  %v789_v36 = vadd.f32 %v785_v30, %v773_v32 }
 0x173   : > { %v790_v37 = vadd.f32 %v781_v28, %v774_v33  ;;  %v792_v39 = vmax.f32 %v788_v35, 0.0 }
 0x174   : > { %v791_v38 = vadd.f32 %v785_v30, %v775_v34  ;;  %v793_v40 = vmax.f32 %v789_v36, 0.0 }
 0x175   : > { %v794_v41 = vmax.f32 %v790_v37, 0.0  ;;  %796 = vst [vmem:[%s1471_s20] sm:$0xff] %v792_v39 }
 0x176   : > { %v795_v42 = vmax.f32 %v791_v38, 0.0  ;;  %797 = vst [vmem:[%s1471_s20 + $0x8] sm:$0xff] %v793_v40 }
 0x177   : > { %798 = vst [vmem:[%s1471_s20 + $0x10] sm:$0xff] %v794_v41 }
 0x178   : > { %799 = vst [vmem:[%s1471_s20 + $0x18] sm:$0xff] %v795_v42 }
 0x179 PF: > { %806 = sbr.rel (!%p1362_p12) target bundleno = 385 (0x181), region = 124  ;;  %s1013_s21 = sshll.u32 (%p1362_p12), %s1228_s22, 4 }
 0x17a   : > { %s812_s26 = scalar_lea.vmem (%p1362_p12), %s1572_s4, %s1013_s21 }
 0x17c   : > { %v825_v43 = vld [vmem:[%s1471_s20] sm:$0xff] (%p1362_p12) }
 0x17d   : > { %v827_v44 = vld [vmem:[%s1471_s20 + $0x8] sm:$0xff] (%p1362_p12)  ;;  %826 = vst [vmem:[%s812_s26] sm:$0xff] (%p1362_p12), %v825_v43 }
 0x17e   : > { %v829_v45 = vld [vmem:[%s1471_s20 + $0x10] sm:$0xff] (%p1362_p12)  ;;  %828 = vst [vmem:[%s812_s26 + $0x8] sm:$0xff] (%p1362_p12), %v827_v44 }
 0x17f   : > { %v831_v46 = vld [vmem:[%s1471_s20 + $0x18] sm:$0xff] (%p1362_p12)  ;;  %830 = vst [vmem:[%s812_s26 + $0x20] sm:$0xff] (%p1362_p12), %v829_v45 }
 0x180   : > { %832 = vst [vmem:[%s812_s26 + $0x28] sm:$0xff] %v831_v46 }
 0x181 PF: > { %s14_s25 = sadd.s32 1, %s1240_s25   ;;  %s1583_s19 = sld [smem:[#allocation6_spill]] }
 0x182   : > { %p11_p6 = scmp.ge.s32.totalorder %s14_s25, 20   ;;  %s1584_s20 = sld [smem:[#allocation9_spill]] }
 0x183   : > { %s1585_s14 = sld [smem:[#allocation7_spill]]  ;;  %s1586_s5 = sld [smem:[#allocation8_spill]] }
 0x184   : > { %s1587_s15 = smov %s1204_s16  ;;  %s1588_s16 = smov %s1360_s13 }
 0x185   : > { %s1589_s17 = smov %s1212_s18  ;;  %s1590_s18 = smov %s1357_s12 }
 0x186   : > { %s1591_s21 = smov %s1232_s23  ;;  %s1592_s22 = smov %s1236_s24 }
 0x187   :  { %13 = sbr.rel (!%p11_p6) target bundleno = 6 (0x6), region = 192 }
 0x189   : > { %s1593_s23 = smov %s1585_s14  ;;  %s1594_s24 = smov %s1586_s5 }

// kernel: resnet_forward.23
= control target key start
LH: loop header
LB: loop body
LE: loop exit
PB: predicated region body
PF: predicated region fallthrough
CT: control target
= control target key end

     0   :  { %s1129_s15 = smov 0   ;;  %s1131_s16 = smov 0   ;;  %s1320_s0 = inlined_call_operand.vmem [shape: bf16[16,256], index: 0, kind: input, shape index: {}]   ;;  %s1321_s1 = inlined_call_operand.vmem [shape: bf16[256,512], index: 1, kind: input, shape index: {}]   ;;  %s1322_s2 = inlined_call_operand.vmem [shape: f32[1,512], index: 2, kind: input, shape index: {}]   ;;  %s1323_s3 = inlined_call_operand.vmem [shape: f32[1,512], index: 3, kind: input, shape index: {}]   ;;  %s1324_s4 = inlined_call_operand.vmem [shape: f32[16,512], index: 4, kind: output, shape index: {}]  }
   0x1   :  { %s1133_s17 = smov 0   ;;  %s1135_s18 = smov 0  }
   0x2   :  { %s1137_s19 = smov 0  }
   0x3 LB: > { %s29_s20 = sadd.s32 1, %s1098_s18  ;;  %s919_s21 = sadd.s32 4294967295, %s1102_s19   ;;  %s1102_s19 = sphi %s1137_s19, %s14_s19   ;;  %s1098_s18 = sphi %s1135_s18, %s1329_s18   ;;  %s1094_s17 = sphi %s1133_s17, %s1328_s17   ;;  %s1090_s16 = sphi %s1131_s16, %s1327_s16   ;;  %s1086_s15 = sphi %s1129_s15, %s1326_s15  }
   0x4   : > { %p31_p0 = scmp.ge.s32.totalorder %s29_s20, 2  ;;  %p77_p1 = scmp.ne.s32.totalorder %s1090_s16, %s1086_s15 }
   0x5   : > { %p78_p2 = scmp.eq.s32.totalorder %s1102_s19, 0  ;;  %p161_p4 = scmp.eq.s32.totalorder %s919_s21, 1 }
   0x6   : > { %s1331_s20 = smov (%p31_p0, %s29_s20), 0  ;;  %s70_s23 = sadd.s32 1, %s1090_s16 }
   0x7   : > { %p79_p3 = por %p78_p2, %p77_p1  ;;  %s66_s22 = ssub.s32 %s1098_s18, %s1331_s20 }
   0x8   : > { %p68_p5 = scmp.eq.s32.totalorder %s66_s22, 0  ;;  %p1164_p6 = por %p161_p4, %p77_p1 }
   0x9   : > { %p923_p7 = scmp.ge.s32.totalorder %s1102_s19, 2 }
   0xa   : > { %s1169_s25 = scalar_select %p68_p5, %s1090_s16, %s70_s23  }
   0xb   : > { %198 = sbr.rel (%p923_p7) target bundleno = 38 (0x26), region = 20 }
  0x12   : > { %201 = sbr.rel (!%p79_p3) target bundleno = 38 (0x26), region = 24  ;;  %s203_s26 = sand.u32 (%p79_p3), 1, %s1090_s16  }
  0x13   : > { %s971_s27 = sshll.u32 (%p79_p3), %s1098_s18, 3  ;;  %s924_s28 = sshll.u32 (%p79_p3), %s203_s26, 8 }
  0x14   : > { %s1177_s5 = scalar_lea.vmem (%p79_p3), %s1321_s1, %s971_s27  ;;  %s1182_s6 = scalar_lea.vmem (%p79_p3), [#allocation3], %s924_s28 }
  0x15   : > { %v301_v0 = vld [vmem:[%s1177_s5] sm:$0xff] (%p79_p3)  ;;  %v303_v1 = vld [vmem:[%s1177_s5 + $0x10] sm:$0xff] (%p79_p3) }
  0x16   : > { %v305_v2 = vld [vmem:[%s1177_s5 + $0x20] sm:$0xff] (%p79_p3)  ;;  %302 = vst [vmem:[%s1182_s6] sm:$0xff] (%p79_p3), %v301_v0  ;;  %304 = vst [vmem:[%s1182_s6 + $0x8] sm:$0xff] (%p79_p3), %v303_v1  ;;  %v307_v3 = vld [vmem:[%s1177_s5 + $0x30] sm:$0xff] (%p79_p3) }
  0x17   : > { %306 = vst [vmem:[%s1182_s6 + $0x10] sm:$0xff] (%p79_p3), %v305_v2  ;;  %v309_v4 = vld [vmem:[%s1177_s5 + $0x40] sm:$0xff] (%p79_p3)  ;;  %v311_v5 = vld [vmem:[%s1177_s5 + $0x50] sm:$0xff] (%p79_p3)  ;;  %308 = vst [vmem:[%s1182_s6 + $0x18] sm:$0xff] (%p79_p3), %v307_v3 }
  0x18   : > { %310 = vst [vmem:[%s1182_s6 + $0x20] sm:$0xff] (%p79_p3), %v309_v4  ;;  %312 = vst [vmem:[%s1182_s6 + $0x28] sm:$0xff] (%p79_p3), %v311_v5  ;;  %v313_v6 = vld [vmem:[%s1177_s5 + $0x60] sm:$0xff] (%p79_p3)  ;;  %v315_v7 = vld [vmem:[%s1177_s5 + $0x70] sm:$0xff] (%p79_p3) }
  0x19   : > { %v317_v8 = vld [vmem:[%s1177_s5 + $0x80] sm:$0xff]  ;;  %314 = vst [vmem:[%s1182_s6 + $0x30] sm:$0xff] %v313_v6  ;;  %316 = vst [vmem:[%s1182_s6 + $0x38] sm:$0xff] %v315_v7  ;;  %v319_v9 = vld [vmem:[%s1177_s5 + $0x90] sm:$0xff] }
  0x1a   : > { %318 = vst [vmem:[%s1182_s6 + $0x40] sm:$0xff] %v317_v8  ;;  %v321_v10 = vld [vmem:[%s1177_s5 + $0xa0] sm:$0xff]  ;;  %v323_v11 = vld [vmem:[%s1177_s5 + $0xb0] sm:$0xff]  ;;  %320 = vst [vmem:[%s1182_s6 + $0x48] sm:$0xff] %v319_v9 }
  0x1b   : > { %322 = vst [vmem:[%s1182_s6 + $0x50] sm:$0xff] %v321_v10  ;;  %324 = vst [vmem:[%s1182_s6 + $0x58] sm:$0xff] %v323_v11  ;;  %v325_v12 = vld [vmem:[%s1177_s5 + $0xc0] sm:$0xff]  ;;  %v327_v13 = vld [vmem:[%s1177_s5 + $0xd0] sm:$0xff] }
  0x1c   : > { %v329_v14 = vld [vmem:[%s1177_s5 + $0xe0] sm:$0xff]  ;;  %326 = vst [vmem:[%s1182_s6 + $0x60] sm:$0xff] %v325_v12  ;;  %328 = vst [vmem:[%s1182_s6 + $0x68] sm:$0xff] %v327_v13  ;;  %v331_v15 = vld [vmem:[%s1177_s5 + $0xf0] sm:$0xff] }
  0x1d   : > { %330 = vst [vmem:[%s1182_s6 + $0x70] sm:$0xff] %v329_v14  ;;  %v333_v16 = vld [vmem:[%s1177_s5 + $0x100] sm:$0xff]  ;;  %v335_v17 = vld [vmem:[%s1177_s5 + $0x110] sm:$0xff]  ;;  %332 = vst [vmem:[%s1182_s6 + $0x78] sm:$0xff] %v331_v15 }
  0x1e   : > { %334 = vst [vmem:[%s1182_s6 + $0x80] sm:$0xff] %v333_v16  ;;  %336 = vst [vmem:[%s1182_s6 + $0x88] sm:$0xff] %v335_v17  ;;  %v337_v18 = vld [vmem:[%s1177_s5 + $0x120] sm:$0xff]  ;;  %v339_v19 = vld [vmem:[%s1177_s5 + $0x130] sm:$0xff] }
  0x1f   : > { %v341_v20 = vld [vmem:[%s1177_s5 + $0x140] sm:$0xff]  ;;  %338 = vst [vmem:[%s1182_s6 + $0x90] sm:$0xff] %v337_v18  ;;  %340 = vst [vmem:[%s1182_s6 + $0x98] sm:$0xff] %v339_v19  ;;  %v343_v21 = vld [vmem:[%s1177_s5 + $0x150] sm:$0xff] }
  0x20   : > { %342 = vst [vmem:[%s1182_s6 + $0xa0] sm:$0xff] %v341_v20  ;;  %v345_v22 = vld [vmem:[%s1177_s5 + $0x160] sm:$0xff]  ;;  %v347_v23 = vld [vmem:[%s1177_s5 + $0x170] sm:$0xff]  ;;  %344 = vst [vmem:[%s1182_s6 + $0xa8] sm:$0xff] %v343_v21 }
  0x21   : > { %346 = vst [vmem:[%s1182_s6 + $0xb0] sm:$0xff] %v345_v22  ;;  %348 = vst [vmem:[%s1182_s6 + $0xb8] sm:$0xff] %v347_v23  ;;  %v349_v24 = vld [vmem:[%s1177_s5 + $0x180] sm:$0xff]  ;;  %v351_v25 = vld [vmem:[%s1177_s5 + $0x190] sm:$0xff] }
  0x22   : > { %v353_v26 = vld [vmem:[%s1177_s5 + $0x1a0] sm:$0xff]  ;;  %350 = vst [vmem:[%s1182_s6 + $0xc0] sm:$0xff] %v349_v24  ;;  %352 = vst [vmem:[%s1182_s6 + $0xc8] sm:$0xff] %v351_v25  ;;  %v355_v27 = vld [vmem:[%s1177_s5 + $0x1b0] sm:$0xff] }
  0x23   : > { %354 = vst [vmem:[%s1182_s6 + $0xd0] sm:$0xff] %v353_v26  ;;  %v357_v28 = vld [vmem:[%s1177_s5 + $0x1c0] sm:$0xff]  ;;  %v359_v29 = vld [vmem:[%s1177_s5 + $0x1d0] sm:$0xff]  ;;  %356 = vst [vmem:[%s1182_s6 + $0xd8] sm:$0xff] %v355_v27 }
  0x24   : > { %358 = vst [vmem:[%s1182_s6 + $0xe0] sm:$0xff] %v357_v28  ;;  %360 = vst [vmem:[%s1182_s6 + $0xe8] sm:$0xff] %v359_v29  ;;  %v361_v30 = vld [vmem:[%s1177_s5 + $0x1e0] sm:$0xff]  ;;  %v363_v31 = vld [vmem:[%s1177_s5 + $0x1f0] sm:$0xff] }
  0x25   : > { %362 = vst [vmem:[%s1182_s6 + $0xf0] sm:$0xff] %v361_v30  ;;  %364 = vst [vmem:[%s1182_s6 + $0xf8] sm:$0xff] %v363_v31 }
  0x26 PF: > { %p927_p8 = scmp.ge.s32.totalorder %s1102_s19, 1  ;;  %p385_p9 = scmp.lt.s32.totalorder %s1102_s19, 3 }
  0x28   : > { %p386_p10 = pnand %p927_p8, %p385_p9 }
  0x29   : > { %s392_s7 = sand.u32 (!%p386_p10), 1, %s1086_s15   ;;  %v1063_v32 = vld [vmem:[%s1320_s0 + $0x4] ss:$8 sps:$4 sm:$0xff] (!%p386_p10)   ;;  %v1061_v1 = vld [vmem:[%s1320_s0] ss:$8 sps:$4 sm:$0xff] (!%p386_p10)   ;;  %s930_s14 = sshll.u32 (!%p386_p10), %s1094_s17, 1  ;;  %v736_v2 = vlaneseq (!%p386_p10) }
  0x2a   : > { %389 = sbr.rel (%p386_p10) target bundleno = 337 (0x151), region = 70  ;;  %s928_s8 = sshll.u32 (!%p386_p10), %s392_s7, 8  ;;  %708 = vmatprep.mubr.bf16.mxu0 (!%p386_p10), %v1063_v32 }
  0x2b   : > { %s1253_s11 = scalar_lea.vmem (!%p386_p10), [#allocation3], %s928_s8  ;;  %p449_p11 = scmp.lt.s32.totalorder (!%p386_p10), %s930_s14, 3  ;;  %v737_v3 = vshrl.u32 (!%p386_p10), %v736_v2, 7 }
  0x2c   : > { %v1013_v33 = vld [vmem:[%s1253_s11 + $0x4] ss:$8 sps:$4 sm:$0xff] (!%p386_p10)   ;;  %v1015_v34 = vld [vmem:[%s1253_s11] ss:$8 sps:$4 sm:$0xff] (!%p386_p10)   ;;  %v1016_v35 = vld [vmem:[%s1253_s11 + $0x14] ss:$8 sps:$4 sm:$0xff] (!%p386_p10)  }
  0x2d   : > { %676 = vmatprep.subr.bf16.mxu0 (!%p386_p10), %v1013_v33  ;;  %v1018_v36 = vld [vmem:[%s1253_s11 + $0x10] ss:$8 sps:$4 sm:$0xff] (!%p386_p10)   ;;  %v1019_v37 = vld [vmem:[%s1253_s11 + $0x24] ss:$8 sps:$4 sm:$0xff] (!%p386_p10)   ;;  %v1021_v38 = vld [vmem:[%s1253_s11 + $0x20] ss:$8 sps:$4 sm:$0xff] (!%p386_p10)  }
  0x2e   : > { %677 = vmatpush1.bf16.msra.mxu0 (!%p386_p10), %v1015_v34  ;;  %v1022_v39 = vld [vmem:[%s1253_s11 + $0x34] ss:$8 sps:$4 sm:$0xff] (!%p386_p10)   ;;  %v1024_v40 = vld [vmem:[%s1253_s11 + $0x30] ss:$8 sps:$4 sm:$0xff] (!%p386_p10)   ;;  %v1025_v41 = vld [vmem:[%s1253_s11 + $0x44] ss:$8 sps:$4 sm:$0xff] (!%p386_p10)  }
  0x2f   : > { %678 = vmatprep.subr.bf16.mxu0 (!%p386_p10), %v1016_v35  ;;  %v1027_v42 = vld [vmem:[%s1253_s11 + $0x40] ss:$8 sps:$4 sm:$0xff] (!%p386_p10)   ;;  %v1028_v43 = vld [vmem:[%s1253_s11 + $0x54] ss:$8 sps:$4 sm:$0xff] (!%p386_p10)   ;;  %v1030_v44 = vld [vmem:[%s1253_s11 + $0x50] ss:$8 sps:$4 sm:$0xff] (!%p386_p10)  }
  0x30   : > { %v1031_v45 = vld [vmem:[%s1253_s11 + $0x64] ss:$8 sps:$4 sm:$0xff] (!%p386_p10)   ;;  %v1033_v46 = vld [vmem:[%s1253_s11 + $0x60] ss:$8 sps:$4 sm:$0xff] (!%p386_p10)   ;;  %v1034_v47 = vld [vmem:[%s1253_s11 + $0x74] ss:$8 sps:$4 sm:$0xff] (!%p386_p10)  }
  0x31   : > { %v1036_v48 = vld [vmem:[%s1253_s11 + $0x70] ss:$8 sps:$4 sm:$0xff]   ;;  %v1037_v49 = vld [vmem:[%s1253_s11 + $0x84] ss:$8 sps:$4 sm:$0xff]   ;;  %v1039_v50 = vld [vmem:[%s1253_s11 + $0x80] ss:$8 sps:$4 sm:$0xff]  }
  0x32   : > { %679 = vmatpush1.bf16.msra.mxu0 %v1018_v36  ;;  %v1040_v51 = vld [vmem:[%s1253_s11 + $0x94] ss:$8 sps:$4 sm:$0xff]   ;;  %v1042_v52 = vld [vmem:[%s1253_s11 + $0x90] ss:$8 sps:$4 sm:$0xff]   ;;  %v1043_v53 = vld [vmem:[%s1253_s11 + $0xa4] ss:$8 sps:$4 sm:$0xff]  }
  0x33   : > { %680 = vmatprep.subr.bf16.mxu0 %v1019_v37  ;;  %v1045_v54 = vld [vmem:[%s1253_s11 + $0xa0] ss:$8 sps:$4 sm:$0xff]   ;;  %v1046_v55 = vld [vmem:[%s1253_s11 + $0xb4] ss:$8 sps:$4 sm:$0xff]   ;;  %v1048_v56 = vld [vmem:[%s1253_s11 + $0xb0] ss:$8 sps:$4 sm:$0xff]  }
  0x34   : > { %v1049_v57 = vld [vmem:[%s1253_s11 + $0xc4] ss:$8 sps:$4 sm:$0xff]   ;;  %v1051_v58 = vld [vmem:[%s1253_s11 + $0xc0] ss:$8 sps:$4 sm:$0xff]   ;;  %v1052_v59 = vld [vmem:[%s1253_s11 + $0xd4] ss:$8 sps:$4 sm:$0xff]  }
  0x35   : > { %v1054_v60 = vld [vmem:[%s1253_s11 + $0xd0] ss:$8 sps:$4 sm:$0xff]   ;;  %v1055_v61 = vld [vmem:[%s1253_s11 + $0xe4] ss:$8 sps:$4 sm:$0xff]   ;;  %v1057_v62 = vld [vmem:[%s1253_s11 + $0xe0] ss:$8 sps:$4 sm:$0xff]  }
  0x36   : > { %681 = vmatpush1.bf16.msra.mxu0 %v1021_v38  ;;  %v1058_v63 = vld [vmem:[%s1253_s11 + $0xf4] ss:$8 sps:$4 sm:$0xff]   ;;  %v1060_v0 = vld [vmem:[%s1253_s11 + $0xf0] ss:$8 sps:$4 sm:$0xff]   ;;  %s1333_s14 = smov (!%p449_p11, %s930_s14), 3  ;;  %v738_v4 = vsub.s32 0, %v737_v3 }
  0x37   : > { %682 = vmatprep.subr.bf16.mxu0 %v1022_v39  ;;  %s451_s23 = scalar_lea.vmem %s1322_s2, %s1333_s14  ;;  %s456_s28 = scalar_lea.vmem %s1323_s3, %s1333_s14  ;;  %v742_v6 = vsub.s32 1, %v737_v3 }
  0x38   : > { %v734_v5 = vld [vmem:[%s451_s23] sm:$0x3]  ;;  %s929_s29 = sshll.u32 %s392_s7, 5  ;;  %s972_s15 = sshll.u32 (%p1164_p6), %s1094_s17, 4 }
  0x39   : > { %v750_v7 = vld [vmem:[%s456_s28] sm:$0x3]  ;;  %v739_v8 = vrot.slane %v734_v5, %v738_v4  ;;  %v743_v9 = vrot.slane %v734_v5, %v742_v6  ;;  %s433_s30 = scalar_lea.vmem [#allocation4], %s929_s29  ;;  %s782_s7 = scalar_lea.vmem (%p1164_p6), %s1324_s4, %s972_s15 }
  0x3a   : > { %683 = vmatpush1.bf16.msra.mxu0 %v1024_v40  ;;  %v755_v10 = vrot.slane %v750_v7, %v738_v4  ;;  %v759_v12 = vrot.slane %v750_v7, %v742_v6 }
  0x3b   : > { %684 = vmatprep.subr.bf16.mxu0 %v1025_v41 }
  0x3e   : > { %685 = vmatpush1.bf16.msra.mxu0 %v1027_v42 }
  0x3f   : > { %686 = vmatprep.subr.bf16.mxu0 %v1028_v43 }
  0x42   : > { %687 = vmatpush1.bf16.msra.mxu0 %v1030_v44 }
  0x43   : > { %688 = vmatprep.subr.bf16.mxu0 %v1031_v45 }
  0x46   : > { %689 = vmatpush1.bf16.msra.mxu0 %v1033_v46 }
  0x47   : > { %690 = vmatprep.subr.bf16.mxu0 %v1034_v47 }
  0x4a   : > { %691 = vmatpush1.bf16.msra.mxu0 %v1036_v48 }
  0x4b   : > { %692 = vmatprep.subr.bf16.mxu0 %v1037_v49 }
  0x4e   : > { %693 = vmatpush1.bf16.msra.mxu0 %v1039_v50 }
  0x4f   : > { %694 = vmatprep.subr.bf16.mxu0 %v1040_v51 }
  0x52   : > { %695 = vmatpush1.bf16.msra.mxu0 %v1042_v52 }
  0x53   : > { %696 = vmatprep.subr.bf16.mxu0 %v1043_v53 }
  0x56   : > { %697 = vmatpush1.bf16.msra.mxu0 %v1045_v54 }
  0x57   : > { %698 = vmatprep.subr.bf16.mxu0 %v1046_v55 }
  0x5a   : > { %699 = vmatpush1.bf16.msra.mxu0 %v1048_v56 }
  0x5b   : > { %700 = vmatprep.subr.bf16.mxu0 %v1049_v57 }
  0x5e   : > { %701 = vmatpush1.bf16.msra.mxu0 %v1051_v58 }
  0x5f   : > { %702 = vmatprep.subr.bf16.mxu0 %v1052_v59 }
  0x62   : > { %703 = vmatpush1.bf16.msra.mxu0 %v1054_v60 }
  0x63   : > { %704 = vmatprep.subr.bf16.mxu0 %v1055_v61 }
  0x66   : > { %705 = vmatpush1.bf16.msra.mxu0 %v1057_v62 }
  0x67   : > { %706 = vmatprep.subr.bf16.mxu0 %v1058_v63 }
  0x6a   : > { %707 = vmatpush1.bf16.msra.mxu0 %v1060_v0 }
  0x6d   : > { %709 = vmatmul.mubr.bf16.vlgmr.msra.gmra.mrb[0].mxu0 %v1061_v1 }
 0x140   : > { %v710_v11 = vpop.f32.mrb[0].mxu0 }
 0x141   : > { %v746_v13 = vmul.f32 %v739_v8, %v710_v11  ;;  %v712_v14 = vpop.f32.mrb[1].mxu0 }
 0x142   : > { %v747_v15 = vmul.f32 %v743_v9, %v712_v14  ;;  %v714_v16 = vpop.f32.mrb[2].mxu0  ;;  %776 = sbr.rel (!%p1164_p6) target bundleno = 337 (0x151), region = 86 }
 0x143   : > { %v762_v17 = vadd.f32 %v755_v10, %v746_v13  ;;  %v748_v18 = vmul.f32 %v739_v8, %v714_v16  ;;  %v716_v19 = vpop.f32.mrb[3].mxu0 }
 0x144   : > { %v763_v20 = vadd.f32 %v759_v12, %v747_v15  ;;  %v749_v21 = vmul.f32 %v743_v9, %v716_v19 }
 0x145   : > { %766 = vst [vmem:[%s433_s30] sm:$0xff] %v762_v17  ;;  %v764_v22 = vadd.f32 %v755_v10, %v748_v18 }
 0x146   : > { %767 = vst [vmem:[%s433_s30 + $0x8] sm:$0xff] %v763_v20  ;;  %v765_v23 = vadd.f32 %v759_v12, %v749_v21 }
 0x147   : > { %768 = vst [vmem:[%s433_s30 + $0x10] sm:$0xff] %v764_v22 }
 0x148   : > { %769 = vst [vmem:[%s433_s30 + $0x18] sm:$0xff] %v765_v23 }
 0x14c   : > { %v795_v24 = vld [vmem:[%s433_s30] sm:$0xff] }
 0x14d   : > { %v797_v25 = vld [vmem:[%s433_s30 + $0x8] sm:$0xff]  ;;  %796 = vst [vmem:[%s782_s7] sm:$0xff] %v795_v24 }
 0x14e   : > { %v799_v26 = vld [vmem:[%s433_s30 + $0x10] sm:$0xff]  ;;  %798 = vst [vmem:[%s782_s7 + $0x8] sm:$0xff] %v797_v25 }
 0x14f   : > { %v801_v27 = vld [vmem:[%s433_s30 + $0x18] sm:$0xff]  ;;  %800 = vst [vmem:[%s782_s7 + $0x20] sm:$0xff] %v799_v26 }
 0x150   : > { %802 = vst [vmem:[%s782_s7 + $0x28] sm:$0xff] %v801_v27 }
 0x151 PF: > { %s14_s19 = sadd.s32 1, %s1102_s19   ;;  %s1326_s15 = smov %s1090_s16 }
 0x152   : > { %p11_p12 = scmp.ge.s32.totalorder %s14_s19, 4   ;;  %s1327_s16 = smov %s1169_s25 }
 0x153   : > { %s1328_s17 = smov %s1098_s18  ;;  %s1329_s18 = smov %s1331_s20 }
 0x154   :  { %13 = sbr.rel (!%p11_p12) target bundleno = 3 (0x3), region = 149 }

// kernel: resnet_forward.24
= control target key start
LH: loop header
LB: loop body
LE: loop exit
PB: predicated region body
PF: predicated region fallthrough
CT: control target
= control target key end

     0   :  { %s2256_s0 = inlined_call_operand.vmem [shape: bf16[16,4608], index: 0, kind: input, shape index: {}]   ;;  %s2257_s1 = inlined_call_operand.vmem [shape: bf16[4608,512], index: 1, kind: input, shape index: {}]   ;;  %s2258_s2 = inlined_call_operand.vmem [shape: f32[1,512], index: 2, kind: input, shape index: {}]   ;;  %s2259_s3 = inlined_call_operand.vmem [shape: f32[1,512], index: 3, kind: input, shape index: {}]   ;;  %s2260_s4 = inlined_call_operand.vmem [shape: f32[16,512], index: 4, kind: input, shape index: {}]   ;;  %s2261_s5 = inlined_call_operand.vmem [shape: f32[16,512], index: 5, kind: output, shape index: {}]  }
   0x1   :  { %2265 = sst [smem:[#allocation11_spill]] %s2256_s0 }
   0x2   :  { %s1838_s18 = smov 0   ;;  %s1840_s19 = smov 0  }
   0x3   :  { %s1842_s20 = smov 0   ;;  %s1844_s21 = smov 0  }
   0x4   :  { %s1846_s22 = smov 0   ;;  %s1848_s23 = smov 0  }
   0x5   :  { %s1850_s24 = smov 0   ;;  %s1852_s25 = smov 0  }
   0x6   :  { %s1854_s26 = smov 0   ;;  %s1856_s27 = smov 0  }
   0x7   :  { %s1858_s28 = smov 0  }
   0x8 LB: > { %2266 = sst [smem:[#allocation7_spill]] %s1785_s23  ;;  %s1423_s29 = sadd.s32 4294967295, %s1805_s28   ;;  %s1805_s28 = sphi %s1858_s28, %s15_s28   ;;  %s1801_s27 = sphi %s1856_s27, %s2286_s27   ;;  %s1797_s26 = sphi %s1854_s26, %s2285_s26   ;;  %s1793_s25 = sphi %s1852_s25, %s2284_s25   ;;  %s1789_s24 = sphi %s1850_s24, %s2283_s24   ;;  %s1785_s23 = sphi %s1848_s23, %s2276_s23   ;;  %s1781_s22 = sphi %s1846_s22, %s2275_s22   ;;  %s1777_s21 = sphi %s1844_s21, %s2282_s21   ;;  %s1773_s20 = sphi %s1842_s20, %s2281_s20   ;;  %s1769_s19 = sphi %s1840_s19, %s2280_s19   ;;  %s1765_s18 = sphi %s1838_s18, %s2279_s18  }
   0x9   : > { %s27_s30 = sadd.s32 1, %s1797_s26  ;;  %s30_s6 = sadd.s32 1, %s1801_s27 }
   0xa   : > { %p28_p0 = scmp.ge.s32.totalorder %s27_s30, 9  ;;  %s43_s7 = sadd.s32 1, %s1785_s23 }
   0xb   : > { %p50_p1 = scmp.ne.s32.totalorder %s1785_s23, %s1781_s22  ;;  %p51_p2 = scmp.eq.s32.totalorder %s1805_s28, 0 }
   0xc   : > { %s2288_s30 = smov (%p28_p0, %s27_s30), 0  ;;  %s2290_s6 = smov (!%p28_p0, %s30_s6), %s1801_s27 }
   0xd   : > { %2267 = sst [smem:[#allocation8_spill]] %s2288_s30  ;;  %s39_s8 = ssub.s32 %s1797_s26, %s2288_s30 }
   0xe   : > { %p32_p3 = scmp.ge.s32.totalorder %s2290_s6, 2  ;;  %p41_p4 = scmp.eq.s32.totalorder %s39_s8, 0 }
   0xf   : > { %p1907_p5 = por %p51_p2, %p50_p1  ;;  %s71_s10 = sadd.s32 1, %s1777_s21 }
  0x10   : > { %s2292_s6 = smov (%p32_p3, %s2290_s6), 0  ;;  %p78_p6 = scmp.ne.s32.totalorder %s1777_s21, %s1773_s20 }
  0x11   : > { %2269 = sst [smem:[#allocation9_spill]] %s2292_s6  ;;  %s67_s12 = ssub.s32 %s1801_s27, %s2292_s6 }
  0x12   : > { %s1915_s11 = scalar_select %p41_p4, %s1785_s23, %s43_s7  }
  0x13   : > { %s68_s13 = sor.u32 %s67_s12, %s39_s8  ;;  %p149_p7 = scmp.eq.s32.totalorder %s67_s12, 0 }
  0x14   : > { %2270 = sst [smem:[#allocation10_spill]] %s1915_s11  ;;  %p69_p8 = scmp.eq.s32.totalorder %s68_s13, 0 }
  0x15   : > { %p1923_p9 = por %p78_p6, %p51_p2  ;;  %s151_s15 = sadd.s32 1, %s1769_s19 }
  0x16   : > { %p158_p10 = scmp.ne.s32.totalorder %s1769_s19, %s1765_s18  ;;  %p190_p12 = scmp.eq.s32.totalorder %s1423_s29, 17 }
  0x17   : > { %s1931_s16 = scalar_select %p69_p8, %s1777_s21, %s71_s10  }
  0x18   : > { %s1934_s17 = scalar_select %p149_p7, %s1769_s19, %s151_s15  }
  0x19   : > { %p1938_p11 = por %p158_p10, %p51_p2  ;;  %p1942_p13 = por %p190_p12, %p158_p10 }
  0x1a   : > { %p1426_p0 = scmp.ge.s32.totalorder %s1805_s28, 18 }
  0x1c   : > { %212 = sbr.rel (%p1426_p0) target bundleno = 93 (0x5d), region = 16 }
  0x23   : > { %215 = sbr.rel (!%p1907_p5) target bundleno = 47 (0x2f), region = 20  ;;  %s217_s10 = sand.u32 (%p1907_p5), 1, %s1785_s23  }
  0x24   : > { %s1520_s12 = sshll.u32 (%p1907_p5), %s1797_s26, 4  ;;  %s1427_s13 = sshll.u32 (%p1907_p5), %s217_s10, 5 }
  0x25   : > { %s2274_s0 = sld [smem:[#allocation11_spill]] (%p1907_p5)  ;;  %s219_s29 = scalar_lea.vmem (%p1907_p5), [#allocation3], %s1427_s13 }
  0x2b   : > { %s225_s30 = scalar_lea.vmem %s2274_s0, %s1520_s12 }
  0x2c   : > { %v238_v0 = vld [vmem:[%s225_s30] sm:$0xff]  ;;  %v240_v1 = vld [vmem:[%s225_s30 + $0x8] sm:$0xff]  ;;  %v242_v2 = vld [vmem:[%s225_s30 + $0x90] sm:$0xff] }
  0x2d   : > { %239 = vst [vmem:[%s219_s29] sm:$0xff] %v238_v0  ;;  %241 = vst [vmem:[%s219_s29 + $0x8] sm:$0xff] %v240_v1  ;;  %v244_v3 = vld [vmem:[%s225_s30 + $0x98] sm:$0xff] }
  0x2e   : > { %243 = vst [vmem:[%s219_s29 + $0x10] sm:$0xff] %v242_v2  ;;  %245 = vst [vmem:[%s219_s29 + $0x18] sm:$0xff] %v244_v3 }
  0x2f PF: > { %251 = sbr.rel (!%p1923_p9) target bundleno = 86 (0x56), region = 43  ;;  %s253_s9 = sand.u32 (%p1923_p9), 1, %s1777_s21  }
  0x30   : > { %s1432_s10 = sshll.u32 (%p1923_p9), %s1801_s27, 1  ;;  %s1430_s6 = sshll.u32 (%p1923_p9), %s253_s9, 9 }
  0x31   : > { %s1521_s12 = sshll.u32 (%p1923_p9), %s1797_s26, 8  ;;  %s1967_s30 = scalar_lea.vmem (%p1923_p9), [#allocation4], %s1430_s6 }
  0x32   : > { %s259_s15 = sadd.s32 (%p1923_p9), %s1521_s12, %s1432_s10 }
  0x33   : > { %s1434_s0 = sshll.u32 (%p1923_p9), %s259_s15, 2 }
  0x34   : > { %s1962_s23 = scalar_lea.vmem (%p1923_p9), %s2257_s1, %s1434_s0 }
  0x35   : > { %v415_v4 = vld [vmem:[%s1962_s23] sm:$0xff] (%p1923_p9)  ;;  %v417_v5 = vld [vmem:[%s1962_s23 + $0x10] sm:$0xff] (%p1923_p9) }
  0x36   : > { %v419_v6 = vld [vmem:[%s1962_s23 + $0x20] sm:$0xff]  ;;  %416 = vst [vmem:[%s1967_s30] sm:$0xff] %v415_v4  ;;  %418 = vst [vmem:[%s1967_s30 + $0x8] sm:$0xff] %v417_v5  ;;  %v421_v7 = vld [vmem:[%s1962_s23 + $0x30] sm:$0xff] }
  0x37   : > { %420 = vst [vmem:[%s1967_s30 + $0x10] sm:$0xff] %v419_v6  ;;  %v423_v8 = vld [vmem:[%s1962_s23 + $0x40] sm:$0xff]  ;;  %v425_v9 = vld [vmem:[%s1962_s23 + $0x50] sm:$0xff]  ;;  %422 = vst [vmem:[%s1967_s30 + $0x18] sm:$0xff] %v421_v7 }
  0x38   : > { %424 = vst [vmem:[%s1967_s30 + $0x20] sm:$0xff] %v423_v8  ;;  %426 = vst [vmem:[%s1967_s30 + $0x28] sm:$0xff] %v425_v9  ;;  %v427_v10 = vld [vmem:[%s1962_s23 + $0x60] sm:$0xff]  ;;  %v429_v11 = vld [vmem:[%s1962_s23 + $0x70] sm:$0xff] }
  0x39   : > { %v431_v12 = vld [vmem:[%s1962_s23 + $0x80] sm:$0xff]  ;;  %428 = vst [vmem:[%s1967_s30 + $0x30] sm:$0xff] %v427_v10  ;;  %430 = vst [vmem:[%s1967_s30 + $0x38] sm:$0xff] %v429_v11  ;;  %v433_v13 = vld [vmem:[%s1962_s23 + $0x90] sm:$0xff] }
  0x3a   : > { %432 = vst [vmem:[%s1967_s30 + $0x40] sm:$0xff] %v431_v12  ;;  %v435_v14 = vld [vmem:[%s1962_s23 + $0xa0] sm:$0xff]  ;;  %v437_v15 = vld [vmem:[%s1962_s23 + $0xb0] sm:$0xff]  ;;  %434 = vst [vmem:[%s1967_s30 + $0x48] sm:$0xff] %v433_v13 }
  0x3b   : > { %436 = vst [vmem:[%s1967_s30 + $0x50] sm:$0xff] %v435_v14  ;;  %438 = vst [vmem:[%s1967_s30 + $0x58] sm:$0xff] %v437_v15  ;;  %v439_v16 = vld [vmem:[%s1962_s23 + $0xc0] sm:$0xff]  ;;  %v441_v17 = vld [vmem:[%s1962_s23 + $0xd0] sm:$0xff] }
  0x3c   : > { %v443_v18 = vld [vmem:[%s1962_s23 + $0xe0] sm:$0xff]  ;;  %440 = vst [vmem:[%s1967_s30 + $0x60] sm:$0xff] %v439_v16  ;;  %442 = vst [vmem:[%s1967_s30 + $0x68] sm:$0xff] %v441_v17  ;;  %v445_v19 = vld [vmem:[%s1962_s23 + $0xf0] sm:$0xff] }
  0x3d   : > { %444 = vst [vmem:[%s1967_s30 + $0x70] sm:$0xff] %v443_v18  ;;  %v447_v20 = vld [vmem:[%s1962_s23 + $0x100] sm:$0xff]  ;;  %v449_v21 = vld [vmem:[%s1962_s23 + $0x110] sm:$0xff]  ;;  %446 = vst [vmem:[%s1967_s30 + $0x78] sm:$0xff] %v445_v19 }
  0x3e   : > { %448 = vst [vmem:[%s1967_s30 + $0x80] sm:$0xff] %v447_v20  ;;  %450 = vst [vmem:[%s1967_s30 + $0x88] sm:$0xff] %v449_v21  ;;  %v451_v22 = vld [vmem:[%s1962_s23 + $0x120] sm:$0xff]  ;;  %v453_v23 = vld [vmem:[%s1962_s23 + $0x130] sm:$0xff] }
  0x3f   : > { %v455_v24 = vld [vmem:[%s1962_s23 + $0x140] sm:$0xff]  ;;  %452 = vst [vmem:[%s1967_s30 + $0x90] sm:$0xff] %v451_v22  ;;  %454 = vst [vmem:[%s1967_s30 + $0x98] sm:$0xff] %v453_v23  ;;  %v457_v25 = vld [vmem:[%s1962_s23 + $0x150] sm:$0xff] }
  0x40   : > { %456 = vst [vmem:[%s1967_s30 + $0xa0] sm:$0xff] %v455_v24  ;;  %v459_v26 = vld [vmem:[%s1962_s23 + $0x160] sm:$0xff]  ;;  %v461_v27 = vld [vmem:[%s1962_s23 + $0x170] sm:$0xff]  ;;  %458 = vst [vmem:[%s1967_s30 + $0xa8] sm:$0xff] %v457_v25 }
  0x41   : > { %460 = vst [vmem:[%s1967_s30 + $0xb0] sm:$0xff] %v459_v26  ;;  %462 = vst [vmem:[%s1967_s30 + $0xb8] sm:$0xff] %v461_v27  ;;  %v463_v28 = vld [vmem:[%s1962_s23 + $0x180] sm:$0xff]  ;;  %v465_v29 = vld [vmem:[%s1962_s23 + $0x190] sm:$0xff] }
  0x42   : > { %v467_v30 = vld [vmem:[%s1962_s23 + $0x1a0] sm:$0xff]  ;;  %464 = vst [vmem:[%s1967_s30 + $0xc0] sm:$0xff] %v463_v28  ;;  %466 = vst [vmem:[%s1967_s30 + $0xc8] sm:$0xff] %v465_v29  ;;  %v469_v31 = vld [vmem:[%s1962_s23 + $0x1b0] sm:$0xff] }
  0x43   : > { %468 = vst [vmem:[%s1967_s30 + $0xd0] sm:$0xff] %v467_v30  ;;  %v471_v32 = vld [vmem:[%s1962_s23 + $0x1c0] sm:$0xff]  ;;  %v473_v33 = vld [vmem:[%s1962_s23 + $0x1d0] sm:$0xff]  ;;  %470 = vst [vmem:[%s1967_s30 + $0xd8] sm:$0xff] %v469_v31 }
  0x44   : > { %472 = vst [vmem:[%s1967_s30 + $0xe0] sm:$0xff] %v471_v32  ;;  %474 = vst [vmem:[%s1967_s30 + $0xe8] sm:$0xff] %v473_v33  ;;  %v475_v34 = vld [vmem:[%s1962_s23 + $0x1e0] sm:$0xff]  ;;  %v477_v35 = vld [vmem:[%s1962_s23 + $0x1f0] sm:$0xff] }
  0x45   : > { %v479_v36 = vld [vmem:[%s1962_s23 + $0x200] sm:$0xff]  ;;  %476 = vst [vmem:[%s1967_s30 + $0xf0] sm:$0xff] %v475_v34  ;;  %478 = vst [vmem:[%s1967_s30 + $0xf8] sm:$0xff] %v477_v35  ;;  %v481_v37 = vld [vmem:[%s1962_s23 + $0x210] sm:$0xff] }
  0x46   : > { %480 = vst [vmem:[%s1967_s30 + $0x100] sm:$0xff] %v479_v36  ;;  %v483_v38 = vld [vmem:[%s1962_s23 + $0x220] sm:$0xff]  ;;  %v485_v39 = vld [vmem:[%s1962_s23 + $0x230] sm:$0xff]  ;;  %482 = vst [vmem:[%s1967_s30 + $0x108] sm:$0xff] %v481_v37 }
  0x47   : > { %484 = vst [vmem:[%s1967_s30 + $0x110] sm:$0xff] %v483_v38  ;;  %486 = vst [vmem:[%s1967_s30 + $0x118] sm:$0xff] %v485_v39  ;;  %v487_v40 = vld [vmem:[%s1962_s23 + $0x240] sm:$0xff]  ;;  %v489_v41 = vld [vmem:[%s1962_s23 + $0x250] sm:$0xff] }
  0x48   : > { %v491_v42 = vld [vmem:[%s1962_s23 + $0x260] sm:$0xff]  ;;  %488 = vst [vmem:[%s1967_s30 + $0x120] sm:$0xff] %v487_v40  ;;  %490 = vst [vmem:[%s1967_s30 + $0x128] sm:$0xff] %v489_v41  ;;  %v493_v43 = vld [vmem:[%s1962_s23 + $0x270] sm:$0xff] }
  0x49   : > { %492 = vst [vmem:[%s1967_s30 + $0x130] sm:$0xff] %v491_v42  ;;  %v495_v44 = vld [vmem:[%s1962_s23 + $0x280] sm:$0xff]  ;;  %v497_v45 = vld [vmem:[%s1962_s23 + $0x290] sm:$0xff]  ;;  %494 = vst [vmem:[%s1967_s30 + $0x138] sm:$0xff] %v493_v43 }
  0x4a   : > { %496 = vst [vmem:[%s1967_s30 + $0x140] sm:$0xff] %v495_v44  ;;  %498 = vst [vmem:[%s1967_s30 + $0x148] sm:$0xff] %v497_v45  ;;  %v499_v46 = vld [vmem:[%s1962_s23 + $0x2a0] sm:$0xff]  ;;  %v501_v47 = vld [vmem:[%s1962_s23 + $0x2b0] sm:$0xff] }
  0x4b   : > { %v503_v48 = vld [vmem:[%s1962_s23 + $0x2c0] sm:$0xff]  ;;  %500 = vst [vmem:[%s1967_s30 + $0x150] sm:$0xff] %v499_v46  ;;  %502 = vst [vmem:[%s1967_s30 + $0x158] sm:$0xff] %v501_v47  ;;  %v505_v49 = vld [vmem:[%s1962_s23 + $0x2d0] sm:$0xff] }
  0x4c   : > { %504 = vst [vmem:[%s1967_s30 + $0x160] sm:$0xff] %v503_v48  ;;  %v507_v50 = vld [vmem:[%s1962_s23 + $0x2e0] sm:$0xff]  ;;  %v509_v51 = vld [vmem:[%s1962_s23 + $0x2f0] sm:$0xff]  ;;  %506 = vst [vmem:[%s1967_s30 + $0x168] sm:$0xff] %v505_v49 }
  0x4d   : > { %508 = vst [vmem:[%s1967_s30 + $0x170] sm:$0xff] %v507_v50  ;;  %510 = vst [vmem:[%s1967_s30 + $0x178] sm:$0xff] %v509_v51  ;;  %v511_v52 = vld [vmem:[%s1962_s23 + $0x300] sm:$0xff]  ;;  %v513_v53 = vld [vmem:[%s1962_s23 + $0x310] sm:$0xff] }
  0x4e   : > { %v515_v54 = vld [vmem:[%s1962_s23 + $0x320] sm:$0xff]  ;;  %512 = vst [vmem:[%s1967_s30 + $0x180] sm:$0xff] %v511_v52  ;;  %514 = vst [vmem:[%s1967_s30 + $0x188] sm:$0xff] %v513_v53  ;;  %v517_v55 = vld [vmem:[%s1962_s23 + $0x330] sm:$0xff] }
  0x4f   : > { %516 = vst [vmem:[%s1967_s30 + $0x190] sm:$0xff] %v515_v54  ;;  %v519_v56 = vld [vmem:[%s1962_s23 + $0x340] sm:$0xff]  ;;  %v521_v57 = vld [vmem:[%s1962_s23 + $0x350] sm:$0xff]  ;;  %518 = vst [vmem:[%s1967_s30 + $0x198] sm:$0xff] %v517_v55 }
  0x50   : > { %520 = vst [vmem:[%s1967_s30 + $0x1a0] sm:$0xff] %v519_v56  ;;  %522 = vst [vmem:[%s1967_s30 + $0x1a8] sm:$0xff] %v521_v57  ;;  %v523_v58 = vld [vmem:[%s1962_s23 + $0x360] sm:$0xff]  ;;  %v525_v59 = vld [vmem:[%s1962_s23 + $0x370] sm:$0xff] }
  0x51   : > { %v527_v60 = vld [vmem:[%s1962_s23 + $0x380] sm:$0xff]  ;;  %524 = vst [vmem:[%s1967_s30 + $0x1b0] sm:$0xff] %v523_v58  ;;  %526 = vst [vmem:[%s1967_s30 + $0x1b8] sm:$0xff] %v525_v59  ;;  %v529_v61 = vld [vmem:[%s1962_s23 + $0x390] sm:$0xff] }
  0x52   : > { %528 = vst [vmem:[%s1967_s30 + $0x1c0] sm:$0xff] %v527_v60  ;;  %v531_v62 = vld [vmem:[%s1962_s23 + $0x3a0] sm:$0xff]  ;;  %v533_v63 = vld [vmem:[%s1962_s23 + $0x3b0] sm:$0xff]  ;;  %530 = vst [vmem:[%s1967_s30 + $0x1c8] sm:$0xff] %v529_v61 }
  0x53   : > { %532 = vst [vmem:[%s1967_s30 + $0x1d0] sm:$0xff] %v531_v62  ;;  %534 = vst [vmem:[%s1967_s30 + $0x1d8] sm:$0xff] %v533_v63  ;;  %v535_v0 = vld [vmem:[%s1962_s23 + $0x3c0] sm:$0xff]  ;;  %v537_v1 = vld [vmem:[%s1962_s23 + $0x3d0] sm:$0xff] }
  0x54   : > { %v539_v2 = vld [vmem:[%s1962_s23 + $0x3e0] sm:$0xff]  ;;  %536 = vst [vmem:[%s1967_s30 + $0x1e0] sm:$0xff] %v535_v0  ;;  %538 = vst [vmem:[%s1967_s30 + $0x1e8] sm:$0xff] %v537_v1  ;;  %v541_v3 = vld [vmem:[%s1962_s23 + $0x3f0] sm:$0xff] }
  0x55   : > { %540 = vst [vmem:[%s1967_s30 + $0x1f0] sm:$0xff] %v539_v2  ;;  %542 = vst [vmem:[%s1967_s30 + $0x1f8] sm:$0xff] %v541_v3 }
  0x56 PF: > { %564 = sbr.rel (!%p1938_p11) target bundleno = 93 (0x5d), region = 89  ;;  %s566_s0 = sand.u32 (%p1938_p11), 1, %s1769_s19  }
  0x57   : > { %s1522_s11 = sshll.u32 (%p1938_p11), %s1801_s27, 4  ;;  %s1435_s14 = sshll.u32 (%p1938_p11), %s566_s0, 5 }
  0x58   : > { %s574_s10 = scalar_lea.vmem (%p1938_p11), %s2260_s4, %s1522_s11  ;;  %s568_s6 = scalar_lea.vmem (%p1938_p11), [#allocation5], %s1435_s14 }
  0x59   : > { %v587_v4 = vld [vmem:[%s574_s10] sm:$0xff] (%p1938_p11)  ;;  %v589_v5 = vld [vmem:[%s574_s10 + $0x8] sm:$0xff] (%p1938_p11) }
  0x5a   : > { %v591_v6 = vld [vmem:[%s574_s10 + $0x20] sm:$0xff] (%p1938_p11)  ;;  %588 = vst [vmem:[%s568_s6] sm:$0xff] (%p1938_p11), %v587_v4  ;;  %590 = vst [vmem:[%s568_s6 + $0x8] sm:$0xff] (%p1938_p11), %v589_v5  ;;  %v593_v7 = vld [vmem:[%s574_s10 + $0x28] sm:$0xff] (%p1938_p11) }
  0x5b   : > { %592 = vst [vmem:[%s568_s6 + $0x10] sm:$0xff] (%p1938_p11), %v591_v6  ;;  %594 = vst [vmem:[%s568_s6 + $0x18] sm:$0xff] (%p1938_p11), %v593_v7 }
  0x5d PF: > { %p1438_p1 = scmp.ge.s32.totalorder %s1805_s28, 1  ;;  %p599_p2 = scmp.lt.s32.totalorder %s1805_s28, 19 }
  0x5f   : > { %p600_p3 = pnand %p1438_p1, %p599_p2 }
  0x60   : > { %s606_s23 = sand.u32 (!%p600_p3), 1, %s1781_s22   ;;  %s613_s7 = sand.u32 (!%p600_p3), 1, %s1773_s20  }
  0x61   : > { %603 = sbr.rel (%p600_p3) target bundleno = 421 (0x1a5), region = 112  ;;  %s1439_s12 = sshll.u32 (!%p600_p3), %s606_s23, 5 }
  0x62   : > { %s1440_s15 = sshll.u32 (!%p600_p3), %s613_s7, 9  ;;  %s620_s13 = sand.u32 (!%p600_p3), 1, %s1765_s18  }
  0x63   : > { %s1443_s30 = sshll.u32 (!%p600_p3), %s1793_s25, 1  ;;  %s1441_s0 = sshll.u32 (!%p600_p3), %s620_s13, 5 }
  0x64   : > { %p667_p4 = scmp.lt.s32.totalorder (!%p600_p3), %s1443_s30, 3  ;;  %s2117_s22 = scalar_lea.vmem (!%p600_p3), [#allocation3], %s1439_s12 }
  0x65   : > { %s2119_s20 = scalar_lea.vmem (!%p600_p3), [#allocation4], %s1440_s15  ;;  %s2121_s18 = scalar_lea.vmem (!%p600_p3), [#allocation5], %s1441_s0 }
  0x66   : > { %s2123_s23 = scalar_lea.vmem (!%p600_p3), [#allocation6], %s1441_s0  ;;  %p1445_p5 = scmp.ne.s32.totalorder (!%p600_p3), %s1789_s24, 0 }
  0x68   : > { %s2294_s30 = smov (!%p667_p4, %s1443_s30), 3  ;;  %683 = sbr.rel (%p1445_p5) target bundleno = 111 (0x6f), region = 128 }
  0x69   : > { %s669_s29 = scalar_lea.vmem %s2258_s2, %s2294_s30  ;;  %s674_s6 = scalar_lea.vmem %s2259_s3, %s2294_s30  ;;  %v1807_v8 = vmov (!%p1445_p5), 0.0  }
  0x6a   : > { %684 = vst [vmem:[#allocation2] sm:$0xff] (!%p1445_p5), %v1807_v8  ;;  %685 = vst [vmem:[#allocation2 + $0x8] sm:$0xff] (!%p1445_p5), %v1807_v8 }
  0x6b   : > { %686 = vst [vmem:[#allocation2 + $0x10] sm:$0xff] (!%p1445_p5), %v1807_v8  ;;  %687 = vst [vmem:[#allocation2 + $0x18] sm:$0xff] (!%p1445_p5), %v1807_v8 }
  0x6f PF: > { %v1617_v9 = vld [vmem:[%s2119_s20 + $0x4] ss:$8 sps:$4 sm:$0xff]   ;;  %v1621_v11 = vld [vmem:[%s2119_s20] ss:$8 sps:$4 sm:$0xff]   ;;  %v1623_v13 = vld [vmem:[%s2119_s20 + $0x14] ss:$8 sps:$4 sm:$0xff]  }
  0x70   : > { %v1619_v10 = vld [vmem:[%s2119_s20 + $0x104] ss:$8 sps:$4 sm:$0xff]   ;;  %1100 = vmatprep.subr.bf16.mxu1 %v1617_v9  ;;  %v1622_v12 = vld [vmem:[%s2119_s20 + $0x100] ss:$8 sps:$4 sm:$0xff]   ;;  %v1625_v14 = vld [vmem:[%s2119_s20 + $0x114] ss:$8 sps:$4 sm:$0xff]  }
  0x71   : > { %1143 = vmatprep.subr.bf16.mxu0 %v1619_v10  ;;  %1101 = vmatpush1.bf16.msra.mxu1 %v1621_v11  ;;  %v1627_v15 = vld [vmem:[%s2119_s20 + $0x10] ss:$8 sps:$4 sm:$0xff]   ;;  %v1629_v17 = vld [vmem:[%s2119_s20 + $0x24] ss:$8 sps:$4 sm:$0xff]   ;;  %v1633_v19 = vld [vmem:[%s2119_s20 + $0x20] ss:$8 sps:$4 sm:$0xff]  }
  0x72   : > { %1144 = vmatpush1.bf16.msra.mxu0 %v1622_v12  ;;  %1102 = vmatprep.subr.bf16.mxu1 %v1623_v13  ;;  %v1628_v16 = vld [vmem:[%s2119_s20 + $0x110] ss:$8 sps:$4 sm:$0xff]   ;;  %v1631_v18 = vld [vmem:[%s2119_s20 + $0x124] ss:$8 sps:$4 sm:$0xff]   ;;  %v1634_v20 = vld [vmem:[%s2119_s20 + $0x120] ss:$8 sps:$4 sm:$0xff]  }
  0x73   : > { %1145 = vmatprep.subr.bf16.mxu0 %v1625_v14  ;;  %v1635_v21 = vld [vmem:[%s2119_s20 + $0x34] ss:$8 sps:$4 sm:$0xff]   ;;  %v1639_v23 = vld [vmem:[%s2119_s20 + $0x30] ss:$8 sps:$4 sm:$0xff]   ;;  %v1641_v25 = vld [vmem:[%s2119_s20 + $0x44] ss:$8 sps:$4 sm:$0xff]  }
  0x74   : > { %v1637_v22 = vld [vmem:[%s2119_s20 + $0x134] ss:$8 sps:$4 sm:$0xff]   ;;  %v1640_v24 = vld [vmem:[%s2119_s20 + $0x130] ss:$8 sps:$4 sm:$0xff]   ;;  %v1643_v26 = vld [vmem:[%s2119_s20 + $0x144] ss:$8 sps:$4 sm:$0xff]  }
  0x75   : > { %1103 = vmatpush1.bf16.msra.mxu1 %v1627_v15  ;;  %v1645_v27 = vld [vmem:[%s2119_s20 + $0x40] ss:$8 sps:$4 sm:$0xff]   ;;  %v1647_v29 = vld [vmem:[%s2119_s20 + $0x54] ss:$8 sps:$4 sm:$0xff]   ;;  %v1651_v31 = vld [vmem:[%s2119_s20 + $0x50] ss:$8 sps:$4 sm:$0xff]  }
  0x76   : > { %1146 = vmatpush1.bf16.msra.mxu0 %v1628_v16  ;;  %1104 = vmatprep.subr.bf16.mxu1 %v1629_v17  ;;  %v1646_v28 = vld [vmem:[%s2119_s20 + $0x140] ss:$8 sps:$4 sm:$0xff]   ;;  %v1649_v30 = vld [vmem:[%s2119_s20 + $0x154] ss:$8 sps:$4 sm:$0xff]   ;;  %v1652_v32 = vld [vmem:[%s2119_s20 + $0x150] ss:$8 sps:$4 sm:$0xff]  }
  0x77   : > { %1147 = vmatprep.subr.bf16.mxu0 %v1631_v18  ;;  %v1653_v33 = vld [vmem:[%s2119_s20 + $0x64] ss:$8 sps:$4 sm:$0xff]   ;;  %v1657_v35 = vld [vmem:[%s2119_s20 + $0x60] ss:$8 sps:$4 sm:$0xff]   ;;  %v1659_v37 = vld [vmem:[%s2119_s20 + $0x74] ss:$8 sps:$4 sm:$0xff]  }
  0x78   : > { %v1655_v34 = vld [vmem:[%s2119_s20 + $0x164] ss:$8 sps:$4 sm:$0xff]   ;;  %v1658_v36 = vld [vmem:[%s2119_s20 + $0x160] ss:$8 sps:$4 sm:$0xff]   ;;  %v1661_v38 = vld [vmem:[%s2119_s20 + $0x174] ss:$8 sps:$4 sm:$0xff]  }
  0x79   : > { %1105 = vmatpush1.bf16.msra.mxu1 %v1633_v19  ;;  %v1663_v39 = vld [vmem:[%s2119_s20 + $0x70] ss:$8 sps:$4 sm:$0xff]   ;;  %v1665_v41 = vld [vmem:[%s2119_s20 + $0x84] ss:$8 sps:$4 sm:$0xff]   ;;  %v1669_v43 = vld [vmem:[%s2119_s20 + $0x80] ss:$8 sps:$4 sm:$0xff]  }
  0x7a   : > { %1148 = vmatpush1.bf16.msra.mxu0 %v1634_v20  ;;  %1106 = vmatprep.subr.bf16.mxu1 %v1635_v21  ;;  %v1664_v40 = vld [vmem:[%s2119_s20 + $0x170] ss:$8 sps:$4 sm:$0xff]   ;;  %v1667_v42 = vld [vmem:[%s2119_s20 + $0x184] ss:$8 sps:$4 sm:$0xff]   ;;  %v1670_v44 = vld [vmem:[%s2119_s20 + $0x180] ss:$8 sps:$4 sm:$0xff]  }
  0x7b   : > { %1149 = vmatprep.subr.bf16.mxu0 %v1637_v22  ;;  %v1671_v45 = vld [vmem:[%s2119_s20 + $0x94] ss:$8 sps:$4 sm:$0xff]   ;;  %v1675_v47 = vld [vmem:[%s2119_s20 + $0x90] ss:$8 sps:$4 sm:$0xff]   ;;  %v1677_v49 = vld [vmem:[%s2119_s20 + $0xa4] ss:$8 sps:$4 sm:$0xff]  }
  0x7c   : > { %v1673_v46 = vld [vmem:[%s2119_s20 + $0x194] ss:$8 sps:$4 sm:$0xff]   ;;  %v1676_v48 = vld [vmem:[%s2119_s20 + $0x190] ss:$8 sps:$4 sm:$0xff]   ;;  %v1679_v50 = vld [vmem:[%s2119_s20 + $0x1a4] ss:$8 sps:$4 sm:$0xff]  }
  0x7d   : > { %1107 = vmatpush1.bf16.msra.mxu1 %v1639_v23  ;;  %v1681_v51 = vld [vmem:[%s2119_s20 + $0xa0] ss:$8 sps:$4 sm:$0xff]   ;;  %v1683_v53 = vld [vmem:[%s2119_s20 + $0xb4] ss:$8 sps:$4 sm:$0xff]   ;;  %v1687_v55 = vld [vmem:[%s2119_s20 + $0xb0] ss:$8 sps:$4 sm:$0xff]  }
  0x7e   : > { %1150 = vmatpush1.bf16.msra.mxu0 %v1640_v24  ;;  %1108 = vmatprep.subr.bf16.mxu1 %v1641_v25  ;;  %v1682_v52 = vld [vmem:[%s2119_s20 + $0x1a0] ss:$8 sps:$4 sm:$0xff]   ;;  %v1685_v54 = vld [vmem:[%s2119_s20 + $0x1b4] ss:$8 sps:$4 sm:$0xff]   ;;  %v1688_v57 = vld [vmem:[%s2119_s20 + $0x1b0] ss:$8 sps:$4 sm:$0xff]  }
  0x7f   : > { %1151 = vmatprep.subr.bf16.mxu0 %v1643_v26  ;;  %v1715_v56 = vld [vmem:[%s2117_s22 + $0x4] ss:$16 sps:$4 sm:$0xff]   ;;  %v1718_v60 = vld [vmem:[%s2117_s22 + $0xc] ss:$16 sps:$4 sm:$0xff]   ;;  %v1693_v61 = vld [vmem:[%s2119_s20 + $0xc0] ss:$8 sps:$4 sm:$0xff]  }
  0x80   : > { %v1689_v58 = vld [vmem:[%s2119_s20 + $0xc4] ss:$8 sps:$4 sm:$0xff]   ;;  %1132 = vmatprep.mubr.bf16.mxu1 %v1715_v56  ;;  %1175 = vmatprep.mubr.bf16.mxu0 %v1718_v60  ;;  %v1694_v62 = vld [vmem:[%s2119_s20 + $0x1c0] ss:$8 sps:$4 sm:$0xff]   ;;  %v1695_v63 = vld [vmem:[%s2119_s20 + $0xd4] ss:$8 sps:$4 sm:$0xff]  }
  0x81   : > { %1109 = vmatpush1.bf16.msra.mxu1 %v1645_v27  ;;  %v1691_v59 = vld [vmem:[%s2119_s20 + $0x1c4] ss:$8 sps:$4 sm:$0xff]   ;;  %v1697_v0 = vld [vmem:[%s2119_s20 + $0x1d4] ss:$8 sps:$4 sm:$0xff]   ;;  %v1699_v1 = vld [vmem:[%s2119_s20 + $0xd0] ss:$8 sps:$4 sm:$0xff]  }
  0x82   : > { %1152 = vmatpush1.bf16.msra.mxu0 %v1646_v28  ;;  %1110 = vmatprep.subr.bf16.mxu1 %v1647_v29  ;;  %v1700_v2 = vld [vmem:[%s2119_s20 + $0x1d0] ss:$8 sps:$4 sm:$0xff]   ;;  %v1701_v3 = vld [vmem:[%s2119_s20 + $0xe4] ss:$8 sps:$4 sm:$0xff]   ;;  %v1705_v5 = vld [vmem:[%s2119_s20 + $0xe0] ss:$8 sps:$4 sm:$0xff]  }
  0x83   : > { %1153 = vmatprep.subr.bf16.mxu0 %v1649_v30  ;;  %v1703_v4 = vld [vmem:[%s2119_s20 + $0x1e4] ss:$8 sps:$4 sm:$0xff]   ;;  %v1706_v6 = vld [vmem:[%s2119_s20 + $0x1e0] ss:$8 sps:$4 sm:$0xff]   ;;  %v1707_v7 = vld [vmem:[%s2119_s20 + $0xf4] ss:$8 sps:$4 sm:$0xff]  }
  0x84   : > { %v1709_v8 = vld [vmem:[%s2119_s20 + $0x1f4] ss:$8 sps:$4 sm:$0xff]   ;;  %v1711_v9 = vld [vmem:[%s2119_s20 + $0xf0] ss:$8 sps:$4 sm:$0xff]   ;;  %v688_v14 = vld [vmem:[#allocation2] sm:$0xff]  ;;  %p1514_p6 = scmp.ne.s32.totalorder %s1789_s24, 8 }
  0x85   : > { %1111 = vmatpush1.bf16.msra.mxu1 %v1651_v31  ;;  %v1712_v10 = vld [vmem:[%s2119_s20 + $0x1f0] ss:$8 sps:$4 sm:$0xff]   ;;  %v689_v18 = vld [vmem:[#allocation2 + $0x8] sm:$0xff] }
  0x86   : > { %1154 = vmatpush1.bf16.msra.mxu0 %v1652_v32  ;;  %1112 = vmatprep.subr.bf16.mxu1 %v1653_v33  ;;  %v1713_v11 = vld [vmem:[%s2117_s22] ss:$16 sps:$4 sm:$0xff]   ;;  %v1716_v12 = vld [vmem:[%s2117_s22 + $0x8] ss:$16 sps:$4 sm:$0xff]   ;;  %v1204_v33 = vlaneseq (!%p1514_p6) }
  0x87   : > { %1155 = vmatprep.subr.bf16.mxu0 %v1655_v34  ;;  %v690_v22 = vld [vmem:[#allocation2 + $0x10] sm:$0xff]  ;;  %v691_v27 = vld [vmem:[#allocation2 + $0x18] sm:$0xff] }
  0x88   : > { %v1205_v34 = vshrl.u32 (!%p1514_p6), %v1204_v33, 7 }
  0x89   : > { %1113 = vmatpush1.bf16.msra.mxu1 %v1657_v35  ;;  %v1202_v35 = vld [vmem:[%s669_s29] sm:$0x3] (!%p1514_p6) }
  0x8a   : > { %1156 = vmatpush1.bf16.msra.mxu0 %v1658_v36  ;;  %1114 = vmatprep.subr.bf16.mxu1 %v1659_v37  ;;  %v1218_v36 = vld [vmem:[%s674_s6] sm:$0x3] (!%p1514_p6) }
  0x8b   : > { %1157 = vmatprep.subr.bf16.mxu0 %v1661_v38  ;;  %v1206_v38 = vsub.s32 (!%p1514_p6), 0, %v1205_v34 }
  0x8d   : > { %1115 = vmatpush1.bf16.msra.mxu1 %v1663_v39  ;;  %v1210_v39 = vsub.s32 (!%p1514_p6), 1, %v1205_v34 }
  0x8e   : > { %1158 = vmatpush1.bf16.msra.mxu0 %v1664_v40  ;;  %1116 = vmatprep.subr.bf16.mxu1 %v1665_v41 }
  0x8f   : > { %1159 = vmatprep.subr.bf16.mxu0 %v1667_v42 }
  0x91   : > { %1117 = vmatpush1.bf16.msra.mxu1 %v1669_v43  ;;  %v1207_v43 = vrot.slane (!%p1514_p6), %v1202_v35, %v1206_v38 }
  0x92   : > { %1160 = vmatpush1.bf16.msra.mxu0 %v1670_v44  ;;  %1118 = vmatprep.subr.bf16.mxu1 %v1671_v45  ;;  %v1223_v44 = vrot.slane (!%p1514_p6), %v1218_v36, %v1206_v38  ;;  %v1211_v45 = vrot.slane (!%p1514_p6), %v1202_v35, %v1210_v39 }
  0x93   : > { %1161 = vmatprep.subr.bf16.mxu0 %v1673_v46  ;;  %v1227_v46 = vrot.slane (!%p1514_p6), %v1218_v36, %v1210_v39 }
  0x95   : > { %1119 = vmatpush1.bf16.msra.mxu1 %v1675_v47 }
  0x96   : > { %1162 = vmatpush1.bf16.msra.mxu0 %v1676_v48  ;;  %1120 = vmatprep.subr.bf16.mxu1 %v1677_v49  ;;  %v1234_v48 = vld [vmem:[%s2121_s18] sm:$0xff] (!%p1514_p6) }
  0x97   : > { %1163 = vmatprep.subr.bf16.mxu0 %v1679_v50 }
  0x99   : > { %1121 = vmatpush1.bf16.msra.mxu1 %v1681_v51 }
  0x9a   : > { %1164 = vmatpush1.bf16.msra.mxu0 %v1682_v52  ;;  %1122 = vmatprep.subr.bf16.mxu1 %v1683_v53  ;;  %v1235_v52 = vld [vmem:[%s2121_s18 + $0x8] sm:$0xff] (!%p1514_p6)  ;;  %v1236_v53 = vld [vmem:[%s2121_s18 + $0x10] sm:$0xff] (!%p1514_p6) }
  0x9b   : > { %1165 = vmatprep.subr.bf16.mxu0 %v1685_v54  ;;  %v1237_v54 = vld [vmem:[%s2121_s18 + $0x18] sm:$0xff] (!%p1514_p6) }
  0x9d   : > { %1123 = vmatpush1.bf16.msra.mxu1 %v1687_v55 }
  0x9e   : > { %1166 = vmatpush1.bf16.msra.mxu0 %v1688_v57  ;;  %1124 = vmatprep.subr.bf16.mxu1 %v1689_v58 }
  0x9f   : > { %1167 = vmatprep.subr.bf16.mxu0 %v1691_v59 }
  0xa1   : > { %1125 = vmatpush1.bf16.msra.mxu1 %v1693_v61 }
  0xa2   : > { %1168 = vmatpush1.bf16.msra.mxu0 %v1694_v62  ;;  %1126 = vmatprep.subr.bf16.mxu1 %v1695_v63 }
  0xa3   : > { %1169 = vmatprep.subr.bf16.mxu0 %v1697_v0 }
  0xa5   : > { %1127 = vmatpush1.bf16.msra.mxu1 %v1699_v1 }
  0xa6   : > { %1170 = vmatpush1.bf16.msra.mxu0 %v1700_v2  ;;  %1128 = vmatprep.subr.bf16.mxu1 %v1701_v3 }
  0xa7   : > { %1171 = vmatprep.subr.bf16.mxu0 %v1703_v4 }
  0xa9   : > { %1129 = vmatpush1.bf16.msra.mxu1 %v1705_v5 }
  0xaa   : > { %1172 = vmatpush1.bf16.msra.mxu0 %v1706_v6  ;;  %1130 = vmatprep.subr.bf16.mxu1 %v1707_v7 }
  0xab   : > { %1173 = vmatprep.subr.bf16.mxu0 %v1709_v8 }
  0xad   : > { %1131 = vmatpush1.bf16.msra.mxu1 %v1711_v9 }
  0xae   : > { %1174 = vmatpush1.bf16.msra.mxu0 %v1712_v10 }
  0xb0   : > { %1133 = vmatmul.mubr.bf16.vlgmr.msra.gmra.mrb[0].mxu1 %v1713_v11 }
  0xb1   : > { %1176 = vmatmul.mubr.bf16.vlgmr.msra.gmra.mrb[0].mxu0 %v1716_v12 }
 0x183   : > { %v1134_v13 = vpop.f32.mrb[0].mxu1 }
 0x184   : > { %v1177_v15 = vpop.f32.mrb[0].mxu0  ;;  %v1136_v17 = vpop.f32.mrb[1].mxu1 }
 0x185   : > { %v1178_v16 = vadd.f32 %v1177_v15, %v1134_v13  ;;  %v1179_v19 = vpop.f32.mrb[1].mxu0  ;;  %v1138_v21 = vpop.f32.mrb[2].mxu1 }
 0x186   : > { %v1180_v20 = vadd.f32 %v1179_v19, %v1136_v17  ;;  %v1181_v23 = vpop.f32.mrb[2].mxu0  ;;  %v1140_v26 = vpop.f32.mrb[3].mxu1  ;;  %1197 = sbr.rel (%p1514_p6) target bundleno = 413 (0x19d), region = 132 }
 0x187   : > { %v1186_v24 = vadd.f32 %v1178_v16, %v688_v14  ;;  %v1182_v25 = vadd.f32 %v1181_v23, %v1138_v21  ;;  %v1183_v28 = vpop.f32.mrb[3].mxu0 }
 0x188   : > { %v1187_v29 = vadd.f32 %v1180_v20, %v689_v18  ;;  %v1184_v30 = vadd.f32 %v1183_v28, %v1140_v26 }
 0x189   : > { %1190 = vst [vmem:[#allocation2] sm:$0xff] %v1186_v24  ;;  %v1188_v31 = vadd.f32 %v1182_v25, %v690_v22 }
 0x18a   : > { %1191 = vst [vmem:[#allocation2 + $0x8] sm:$0xff] %v1187_v29  ;;  %v1189_v32 = vadd.f32 %v1184_v30, %v691_v27 }
 0x18b   : > { %1192 = vst [vmem:[#allocation2 + $0x10] sm:$0xff] %v1188_v31 }
 0x18c   : > { %1193 = vst [vmem:[#allocation2 + $0x18] sm:$0xff] %v1189_v32 }
 0x190   : > { %v1198_v37 = vld [vmem:[#allocation2] sm:$0xff] }
 0x191   : > { %v1199_v40 = vld [vmem:[#allocation2 + $0x8] sm:$0xff]  ;;  %v1214_v47 = vmul.f32 %v1207_v43, %v1198_v37 }
 0x192   : > { %v1200_v41 = vld [vmem:[#allocation2 + $0x10] sm:$0xff]  ;;  %v1215_v49 = vmul.f32 %v1211_v45, %v1199_v40 }
 0x193   : > { %v1201_v42 = vld [vmem:[#allocation2 + $0x18] sm:$0xff]  ;;  %v1216_v50 = vmul.f32 %v1207_v43, %v1200_v41  ;;  %v1230_v55 = vadd.f32 %v1223_v44, %v1214_v47 }
 0x194   : > { %v1217_v51 = vmul.f32 %v1211_v45, %v1201_v42  ;;  %v1231_v56 = vadd.f32 %v1227_v46, %v1215_v49 }
 0x195   : > { %v1232_v57 = vadd.f32 %v1223_v44, %v1216_v50  ;;  %v1238_v59 = vadd.f32 %v1234_v48, %v1230_v55 }
 0x196   : > { %v1233_v58 = vadd.f32 %v1227_v46, %v1217_v51  ;;  %v1239_v60 = vadd.f32 %v1235_v52, %v1231_v56 }
 0x197   : > { %v1240_v61 = vadd.f32 %v1236_v53, %v1232_v57  ;;  %v1242_v63 = vmax.f32 %v1238_v59, 0.0 }
 0x198   : > { %v1241_v62 = vadd.f32 %v1237_v54, %v1233_v58  ;;  %v1243_v0 = vmax.f32 %v1239_v60, 0.0 }
 0x199   : > { %v1244_v1 = vmax.f32 %v1240_v61, 0.0  ;;  %1246 = vst [vmem:[%s2123_s23] sm:$0xff] %v1242_v63 }
 0x19a   : > { %v1245_v2 = vmax.f32 %v1241_v62, 0.0  ;;  %1247 = vst [vmem:[%s2123_s23 + $0x8] sm:$0xff] %v1243_v0 }
 0x19b   : > { %1248 = vst [vmem:[%s2123_s23 + $0x10] sm:$0xff] %v1244_v1 }
 0x19c   : > { %1249 = vst [vmem:[%s2123_s23 + $0x18] sm:$0xff] %v1245_v2 }
 0x19d PF: > { %1256 = sbr.rel (!%p1942_p13) target bundleno = 421 (0x1a5), region = 136  ;;  %s1523_s24 = sshll.u32 (%p1942_p13), %s1793_s25, 4 }
 0x19e   : > { %s1262_s11 = scalar_lea.vmem (%p1942_p13), %s2261_s5, %s1523_s24 }
 0x1a0   : > { %v1275_v3 = vld [vmem:[%s2123_s23] sm:$0xff] (%p1942_p13) }
 0x1a1   : > { %v1277_v4 = vld [vmem:[%s2123_s23 + $0x8] sm:$0xff] (%p1942_p13)  ;;  %1276 = vst [vmem:[%s1262_s11] sm:$0xff] (%p1942_p13), %v1275_v3 }
 0x1a2   : > { %v1279_v5 = vld [vmem:[%s2123_s23 + $0x10] sm:$0xff] (%p1942_p13)  ;;  %1278 = vst [vmem:[%s1262_s11 + $0x8] sm:$0xff] (%p1942_p13), %v1277_v4 }
 0x1a3   : > { %v1281_v6 = vld [vmem:[%s2123_s23 + $0x18] sm:$0xff] (%p1942_p13)  ;;  %1280 = vst [vmem:[%s1262_s11 + $0x20] sm:$0xff] (%p1942_p13), %v1279_v5 }
 0x1a4   : > { %1282 = vst [vmem:[%s1262_s11 + $0x28] sm:$0xff] %v1281_v6 }
 0x1a5 PF: > { %s15_s28 = sadd.s32 1, %s1805_s28   ;;  %s2275_s22 = sld [smem:[#allocation7_spill]] }
 0x1a6   : > { %p12_p7 = scmp.ge.s32.totalorder %s15_s28, 20   ;;  %s2276_s23 = sld [smem:[#allocation10_spill]] }
 0x1a7   : > { %s2277_s8 = sld [smem:[#allocation8_spill]]  ;;  %s2278_s14 = sld [smem:[#allocation9_spill]] }
 0x1a8   : > { %s2279_s18 = smov %s1769_s19  ;;  %s2280_s19 = smov %s1934_s17 }
 0x1a9   : > { %s2281_s20 = smov %s1777_s21  ;;  %s2282_s21 = smov %s1931_s16 }
 0x1aa   : > { %s2283_s24 = smov %s1797_s26  ;;  %s2284_s25 = smov %s1801_s27 }
 0x1ab   :  { %14 = sbr.rel (!%p12_p7) target bundleno = 8 (0x8), region = 212 }
 0x1ad   : > { %s2285_s26 = smov %s2277_s8  ;;  %s2286_s27 = smov %s2278_s14 }

// kernel: resnet_forward.25
= control target key start
LH: loop header
LB: loop body
LE: loop exit
PB: predicated region body
PF: predicated region fallthrough
CT: control target
= control target key end

     0   :  { %v439_v51 = vmov 1966171168   ;;  %v96_v53 = vlaneseq  ;;  %s671_s0 = inlined_call_operand.vmem [shape: f32[2,1,512], index: 0, kind: input, shape index: {}]   ;;  %s672_s1 = inlined_call_operand.vmem [shape: f32[512,128], index: 1, kind: input, shape index: {}]   ;;  %s673_s2 = inlined_call_operand.vmem [shape: f32[1,128], index: 2, kind: input, shape index: {}]   ;;  %s674_s3 = inlined_call_operand.hbm [shape: f32[2,128], index: 3, kind: output, shape index: {}]  }
   0x1   :  { %v35_v0 = vld [vmem:[%s672_s1 + $0x80] sm:$0xff]  ;;  %v36_v1 = vld [vmem:[%s672_s1 + $0x88] sm:$0xff]  ;;  %v37_v11 = vld [vmem:[%s672_s1 + $0x90] sm:$0xff]  ;;  %v94_v52 = vunpack.c.l.s4 %v439_v51 }
   0x2   :  { %v19_v2 = vld [vmem:[%s672_s1] sm:$0xff]  ;;  %v347_v3 = vpack.c.bf16 %v36_v1, %v35_v0  ;;  %v20_v4 = vld [vmem:[%s672_s1 + $0x8] sm:$0xff]  ;;  %v38_v13 = vld [vmem:[%s672_s1 + $0x98] sm:$0xff] }
   0x3   :  { %v67_v5 = vld [vmem:[%s672_s1 + $0x180] sm:$0xff]  ;;  %v68_v6 = vld [vmem:[%s672_s1 + $0x188] sm:$0xff]  ;;  %v349_v7 = vpack.c.bf16 %v20_v4, %v19_v2  ;;  %v21_v14 = vld [vmem:[%s672_s1 + $0x10] sm:$0xff]  ;;  %v351_v16 = vpack.c.bf16 %v38_v13, %v37_v11  ;;  %v95_v2 = vunpack.c.0.s8 %v94_v52 }
   0x4   :  { %v379_v8 = vpack.c.bf16 %v68_v6, %v67_v5  ;;  %v51_v9 = vld [vmem:[%s672_s1 + $0x100] sm:$0xff]  ;;  %v52_v10 = vld [vmem:[%s672_s1 + $0x108] sm:$0xff]  ;;  %348 = vmatprep.subr.bf16.mxu0 %v347_v3  ;;  %v22_v15 = vld [vmem:[%s672_s1 + $0x18] sm:$0xff]  ;;  %v97_v3 = vshrl.u32 %v96_v53, 7 }
   0x5   :  { %v381_v12 = vpack.c.bf16 %v52_v10, %v51_v9  ;;  %350 = vmatpush3.bf16.msra.mxu0 %v349_v7  ;;  %v353_v17 = vpack.c.bf16 %v22_v15, %v21_v14  ;;  %v69_v18 = vld [vmem:[%s672_s1 + $0x190] sm:$0xff]  ;;  %v70_v19 = vld [vmem:[%s672_s1 + $0x198] sm:$0xff]  ;;  %v39_v23 = vld [vmem:[%s672_s1 + $0xa0] sm:$0xff] }
   0x6   :  { %380 = vmatprep.subr.bf16.mxu1 %v379_v8  ;;  %v53_v20 = vld [vmem:[%s672_s1 + $0x110] sm:$0xff]  ;;  %v383_v21 = vpack.c.bf16 %v70_v19, %v69_v18  ;;  %v54_v22 = vld [vmem:[%s672_s1 + $0x118] sm:$0xff]  ;;  %v40_v24 = vld [vmem:[%s672_s1 + $0xa8] sm:$0xff]  ;;  %352 = vmatprep.subr.bf16.mxu0 %v351_v16 }
   0x7   :  { %382 = vmatpush3.bf16.msra.mxu1 %v381_v12  ;;  %v385_v25 = vpack.c.bf16 %v54_v22, %v53_v20  ;;  %v355_v26 = vpack.c.bf16 %v40_v24, %v39_v23  ;;  %v23_v27 = vld [vmem:[%s672_s1 + $0x20] sm:$0xff]  ;;  %v24_v28 = vld [vmem:[%s672_s1 + $0x28] sm:$0xff]  ;;  %v41_v35 = vld [vmem:[%s672_s1 + $0xb0] sm:$0xff]  ;;  %v98_v20 = vsub.s32 %v95_v2, %v97_v3 }
   0x8   :  { %v71_v29 = vld [vmem:[%s672_s1 + $0x1a0] sm:$0xff]  ;;  %384 = vmatprep.subr.bf16.mxu1 %v383_v21  ;;  %v72_v30 = vld [vmem:[%s672_s1 + $0x1a8] sm:$0xff]  ;;  %v357_v33 = vpack.c.bf16 %v24_v28, %v23_v27  ;;  %v42_v36 = vld [vmem:[%s672_s1 + $0xb8] sm:$0xff] }
   0x9   :  { %v55_v31 = vld [vmem:[%s672_s1 + $0x120] sm:$0xff]  ;;  %v56_v32 = vld [vmem:[%s672_s1 + $0x128] sm:$0xff]  ;;  %354 = vmatpush3.bf16.msra.mxu0 %v353_v17  ;;  %v387_v34 = vpack.c.bf16 %v72_v30, %v71_v29  ;;  %v25_v37 = vld [vmem:[%s672_s1 + $0x30] sm:$0xff]  ;;  %v359_v39 = vpack.c.bf16 %v42_v36, %v41_v35 }
   0xa   :  { %356 = vmatprep.subr.bf16.mxu0 %v355_v26  ;;  %v389_v38 = vpack.c.bf16 %v56_v32, %v55_v31  ;;  %v26_v40 = vld [vmem:[%s672_s1 + $0x38] sm:$0xff]  ;;  %v73_v41 = vld [vmem:[%s672_s1 + $0x1b0] sm:$0xff]  ;;  %v43_v46 = vld [vmem:[%s672_s1 + $0xc0] sm:$0xff] }
   0xb   :  { %386 = vmatpush3.bf16.msra.mxu1 %v385_v25  ;;  %v74_v42 = vld [vmem:[%s672_s1 + $0x1b8] sm:$0xff]  ;;  %v57_v44 = vld [vmem:[%s672_s1 + $0x130] sm:$0xff]  ;;  %v44_v47 = vld [vmem:[%s672_s1 + $0xc8] sm:$0xff]  ;;  %v361_v48 = vpack.c.bf16 %v26_v40, %v25_v37 }
   0xc   :  { %388 = vmatprep.subr.bf16.mxu1 %v387_v34  ;;  %v391_v43 = vpack.c.bf16 %v74_v42, %v73_v41  ;;  %v58_v45 = vld [vmem:[%s672_s1 + $0x138] sm:$0xff]  ;;  %v75_v49 = vld [vmem:[%s672_s1 + $0x1c0] sm:$0xff]  ;;  %v76_v50 = vld [vmem:[%s672_s1 + $0x1c8] sm:$0xff]  ;;  %v363_v55 = vpack.c.bf16 %v44_v47, %v43_v46 }
   0xd   :  { %358 = vmatpush3.bf16.msra.mxu0 %v357_v33  ;;  %v393_v54 = vpack.c.bf16 %v58_v45, %v57_v44  ;;  %v27_v56 = vld [vmem:[%s672_s1 + $0x40] sm:$0xff]  ;;  %v28_v57 = vld [vmem:[%s672_s1 + $0x48] sm:$0xff]  ;;  %v395_v59 = vpack.c.bf16 %v76_v50, %v75_v49  ;;  %v45_v61 = vld [vmem:[%s672_s1 + $0xd0] sm:$0xff] }
   0xe   :  { %360 = vmatprep.subr.bf16.mxu0 %v359_v39  ;;  %v59_v58 = vld [vmem:[%s672_s1 + $0x140] sm:$0xff]  ;;  %v60_v60 = vld [vmem:[%s672_s1 + $0x148] sm:$0xff]  ;;  %v46_v62 = vld [vmem:[%s672_s1 + $0xd8] sm:$0xff]  ;;  %v365_v1 = vpack.c.bf16 %v28_v57, %v27_v56 }
   0xf   :  { %390 = vmatpush3.bf16.msra.mxu1 %v389_v38  ;;  %v77_v63 = vld [vmem:[%s672_s1 + $0x1d0] sm:$0xff]  ;;  %v78_v0 = vld [vmem:[%s672_s1 + $0x1d8] sm:$0xff]  ;;  %v397_v4 = vpack.c.bf16 %v60_v60, %v59_v58  ;;  %v367_v5 = vpack.c.bf16 %v46_v62, %v45_v61  ;;  %v47_v11 = vld [vmem:[%s672_s1 + $0xe0] sm:$0xff] }
  0x10   :  { %392 = vmatprep.subr.bf16.mxu1 %v391_v43  ;;  %v29_v6 = vld [vmem:[%s672_s1 + $0x50] sm:$0xff]  ;;  %v30_v7 = vld [vmem:[%s672_s1 + $0x58] sm:$0xff]  ;;  %v399_v9 = vpack.c.bf16 %v78_v0, %v77_v63  ;;  %v48_v12 = vld [vmem:[%s672_s1 + $0xe8] sm:$0xff] }
  0x11   :  { %362 = vmatpush3.bf16.msra.mxu0 %v361_v48  ;;  %v61_v8 = vld [vmem:[%s672_s1 + $0x150] sm:$0xff]  ;;  %v62_v10 = vld [vmem:[%s672_s1 + $0x158] sm:$0xff]  ;;  %v31_v13 = vld [vmem:[%s672_s1 + $0x60] sm:$0xff]  ;;  %v369_v16 = vpack.c.bf16 %v30_v7, %v29_v6  ;;  %v371_v22 = vpack.c.bf16 %v48_v12, %v47_v11 }
  0x12   :  { %364 = vmatprep.subr.bf16.mxu0 %v363_v55  ;;  %v79_v14 = vld [vmem:[%s672_s1 + $0x1e0] sm:$0xff]  ;;  %v80_v15 = vld [vmem:[%s672_s1 + $0x1e8] sm:$0xff]  ;;  %v401_v21 = vpack.c.bf16 %v62_v10, %v61_v8  ;;  %v49_v23 = vld [vmem:[%s672_s1 + $0xf0] sm:$0xff] }
  0x13   :  { %394 = vmatpush3.bf16.msra.mxu1 %v393_v54  ;;  %v32_v17 = vld [vmem:[%s672_s1 + $0x68] sm:$0xff]  ;;  %v63_v18 = vld [vmem:[%s672_s1 + $0x160] sm:$0xff]  ;;  %v403_v24 = vpack.c.bf16 %v80_v15, %v79_v14  ;;  %v50_v25 = vld [vmem:[%s672_s1 + $0xf8] sm:$0xff] }
  0x14   :  { %396 = vmatprep.subr.bf16.mxu1 %v395_v59  ;;  %v64_v19 = vld [vmem:[%s672_s1 + $0x168] sm:$0xff]  ;;  %v414_v26 = vld.sshfl [vmem:[%s671_s0] sm:$0xff pattern:$0x75316420] }
  0x15   :  { %366 = vmatpush3.bf16.msra.mxu0 %v365_v1 }
  0x16   :  { %368 = vmatprep.subr.bf16.mxu0 %v367_v5 }
  0x17   :  { %398 = vmatpush3.bf16.msra.mxu1 %v397_v4 }
  0x18   :  { %400 = vmatprep.subr.bf16.mxu1 %v399_v9 }
  0x19   :  { %8 = vsyncpa [#allocation3], 0  ;;  %v81_v27 = vld [vmem:[%s672_s1 + $0x1f0] sm:$0xff]  ;;  %v82_v28 = vld [vmem:[%s672_s1 + $0x1f8] sm:$0xff]  ;;  %370 = vmatpush3.bf16.msra.mxu0 %v369_v16  ;;  %v373_v29 = vpack.c.bf16 %v32_v17, %v31_v13  ;;  %v405_v30 = vpack.c.bf16 %v64_v19, %v63_v18  ;;  %v375_v31 = vpack.c.bf16 %v50_v25, %v49_v23  ;;  %v100_v37 = vcombine.high %v414_v26, %v414_v26  ;;  %s440_s7 = smov [#allocation2]  }
  0x1a   :  { %372 = vmatprep.subr.bf16.mxu0 %v371_v22  ;;  %v33_v32 = vld [vmem:[%s672_s1 + $0x70] sm:$0xff]  ;;  %v34_v33 = vld [vmem:[%s672_s1 + $0x78] sm:$0xff]  ;;  %v407_v34 = vpack.c.bf16 %v82_v28, %v81_v27  ;;  %v107_v40 = vrot.slane %v414_v26, %v98_v20  ;;  %v276_v45 = vld [vmem:[%s673_s2] ss:$0 sm:$0xff]  ;;  %s268_s8 = sshll.u32 %s440_s7, 4  ;;  %s269_s8 = int_to_ptr.vmem [resolvable:$true] %s268_s8 }
  0x1b   :  { %402 = vmatpush3.bf16.msra.mxu1 %v401_v21  ;;  %v65_v35 = vld [vmem:[%s672_s1 + $0x170] sm:$0xff]  ;;  %v66_v36 = vld [vmem:[%s672_s1 + $0x178] sm:$0xff]  ;;  %v377_v38 = vpack.c.bf16 %v34_v33, %v33_v32  ;;  %v114_v39 = vrot.slane %v100_v37, %v98_v20  ;;  %s415_s9 = scalar_lea.vmem %s269_s8, 32  ;;  %p420_p1 = scmp.lt.s32.totalorder %s269_s8, %s269_s8 }
  0x1c   :  { %404 = vmatprep.subr.bf16.mxu1 %v403_v24  ;;  %v409_v41 = vpack.c.bf16 %v66_v36, %v65_v35  ;;  %v115_v43 = vcombine.high %v107_v40, %v107_v40  ;;  %p416_p0 = scmp.ne.s32.totalorder %s269_s8, %s415_s9  ;;  %p421_p2 = scmp.lt.s32.totalorder %s415_s9, %s415_s9 }
  0x1d   :  { %374 = vmatpush3.bf16.msra.mxu0 %v373_v29  ;;  %185 = vmatprep.mubr.f32.mxu0 %v114_v39  ;;  %v116_v42 = vcombine.high %v114_v39, %v114_v39 }
  0x1e   :  { %376 = vmatprep.subr.bf16.mxu0 %v375_v31  ;;  %p422_p3 = por %p421_p2, %p420_p1 }
  0x1f   :  { %406 = vmatpush3.bf16.msra.mxu1 %v405_v30  ;;  %255 = vmatprep.mubr.f32.mxu1 %v116_v42 }
  0x20   :  { %408 = vmatprep.subr.bf16.mxu1 %v407_v34  ;;  %p423_p4 = pnand %p422_p3, %p416_p0 }
  0x21   :  { %378 = vmatpush3.bf16.msra.mxu0 %v377_v38 }
  0x23   :  { %410 = vmatpush3.bf16.msra.mxu1 %v409_v41 }
  0x24   :  { %186 = vmatmul.mubr.f32.vlgmr.msra.gmra.mrb[0].mxu0 %v107_v40 }
  0x26   :  { %256 = vmatmul.mubr.f32.vlgmr.msra.gmra.mrb[0].mxu1 %v115_v43 }
  0xf7   :  { %v309_v44 = vpop.f32.mrb[0].mxu0 }
  0xf8   :  { %v310_v46 = vpop.f32.mrb[1].mxu0 }
  0xf9   :  { %v344_v47 = vpop.f32.mrb[0].mxu1  ;;  %v311_v48 = vadd.f32 %v310_v46, %v309_v44 }
  0xfa   :  { %v345_v49 = vpop.f32.mrb[1].mxu1 }
  0xfb   :  { %v346_v50 = vadd.f32 %v345_v49, %v344_v47  ;;  %v188_v51 = vadd.f32 %v311_v48, %v276_v45 }
  0xfd   :  { %v258_v52 = vadd.f32 %v346_v50, %v188_v51 }
  0xff   :  { %261 = vst [vmem:[#allocation2] sm:$0x3] %v258_v52 }
 0x100   :  { %426 = shalt.err (!%p423_p4)
}
 0x101   :  { %s427_s11 = scalar_lea.hbm %s674_s3, 32 }
 0x102   :  { %p428_p5 = scmp.ne.s32.totalorder %s674_s3, %s427_s11  ;;  %p431_p6 = scmp.lt.u32.totalorder %s427_s11, %s674_s3 }
 0x104   :  { %p433_p7 = pnand %p431_p6, %p428_p5 }
 0x106   :  { %436 = shalt.err (!%p433_p7)
}
 0x107   :  { %271 = dma.vmem_to_hbm [thread:$0]  %s269_s8, 32, %s674_s3, [#allocation3]  }
 0x108   :  { %437 = dma.done.wait [#allocation3], 32  }
 0x109   :  { %438 = vsyncadd [#allocation3], 4294967264 }
 0x10a   :  { %275 = vsyncpa [#allocation3], 1 }

</bundles_post_ra>
